<compile_context>
chip_gen: v7x
topology: tpu7x:2x2x1
jax: 0.10.0
libtpu: 0.0.40
codegen_flags: <defaults>
</compile_context>

<pallas_src>
import math
import functools

import jax
import jax.numpy as jnp
from jax.experimental import pallas as pl
from jax.experimental.pallas import tpu as pltpu


# ----------------------------- fused transformer + MMD kernel -----------------------------
def _fused_mmd_kernel(tokens_ref,
                      enc_w_qkv_ref, enc_b_qkv_ref, enc_w_out_ref, enc_b_out_ref,
                      enc_ln_g_ref, enc_ln_b_ref,
                      dec_q_ref, dec_w_kv_ref, dec_b_kv_ref, dec_w_out_ref, dec_b_out_ref,
                      dec_ln_g_ref, dec_ln_b_ref,
                      out_ref,
                      *, nhead, n_way, k_shot, n_prompt, n_query, alphas):
    """One episode batch element: encoder self-attn -> decoder (meta prompt) cross-attn
    -> LayerNorms -> centering -> multi-scale gaussian kernel -> MMD distances."""
    x = tokens_ref[0].astype(jnp.float32)            # (N, L, E) all sequences of this episode
    N, L, E = x.shape
    NL = N * L
    hd = E // nhead
    scale = 1.0 / math.sqrt(hd)

    def layer_norm(o, g, beta):                      # nn.LayerNorm: biased var, eps=1e-5
        mu = jnp.mean(o, axis=-1, keepdims=True)
        var = jnp.mean((o - mu) ** 2, axis=-1, keepdims=True)
        return (o - mu) * jax.lax.rsqrt(var + 1e-5) * g + beta

    def softmax_last(s):
        s = s - jnp.max(s, axis=-1, keepdims=True)
        p = jnp.exp(s)
        return p * pl.reciprocal(jnp.sum(p, axis=-1, keepdims=True), approx=True)

    # ---------------- encoder: self-attention over each sequence, batched over N ----------------
    xf = x.reshape(NL, E)
    qkv = jnp.dot(xf, enc_w_qkv_ref[...], preferred_element_type=jnp.float32) + enc_b_qkv_ref[...]
    q_all, k_all, v_all = qkv[:, 0:E], qkv[:, E:2 * E], qkv[:, 2 * E:3 * E]
    heads = []
    for h in range(nhead):                           # nhead is tiny (static); sequences are batched
        sl = slice(h * hd, (h + 1) * hd)
        qh = (q_all[:, sl] * scale).reshape(N, L, hd)
        kh = k_all[:, sl].reshape(N, L, hd)
        vh = v_all[:, sl].reshape(N, L, hd)
        s = jnp.einsum('nqd,nkd->nqk', qh, kh, preferred_element_type=jnp.float32)
        p = softmax_last(s)
        heads.append(jnp.einsum('nqk,nkd->nqd', p, vh,
                                preferred_element_type=jnp.float32).reshape(NL, hd))
    o = jnp.concatenate(heads, axis=-1)              # (NL, E)
    o = jnp.dot(o, enc_w_out_ref[...], preferred_element_type=jnp.float32) + enc_b_out_ref[...]
    memory = layer_norm(o, enc_ln_g_ref[...], enc_ln_b_ref[...])   # (NL, E)

    # ---------------- decoder: meta-prompt queries attend to encoder memory ----------------
    kv = jnp.dot(memory, dec_w_kv_ref[...], preferred_element_type=jnp.float32) + dec_b_kv_ref[...]
    kd_all, vd_all = kv[:, 0:E], kv[:, E:2 * E]
    dq = dec_q_ref[...].astype(jnp.float32)          # (n_prompt, E), prompt already Q-projected
    heads = []
    for h in range(nhead):
        sl = slice(h * hd, (h + 1) * hd)
        qh = jnp.broadcast_to((dq[:, sl] * scale)[None], (N, n_prompt, hd))
        kh = kd_all[:, sl].reshape(N, L, hd)
        vh = vd_all[:, sl].reshape(N, L, hd)
        s = jnp.einsum('npd,nkd->npk', qh, kh, preferred_element_type=jnp.float32)
        p = softmax_last(s)
        heads.append(jnp.einsum('npk,nkd->npd', p, vh,
                                preferred_element_type=jnp.float32).reshape(N * n_prompt, hd))
    o = jnp.concatenate(heads, axis=-1)              # (R, E), R = N * n_prompt
    o = jnp.dot(o, dec_w_out_ref[...], preferred_element_type=jnp.float32) + dec_b_out_ref[...]
    feats = layer_norm(o, dec_ln_g_ref[...], dec_ln_b_ref[...])    # (R, E)

    # ---------------- centering + single Gram matrix + multi-scale gaussian kernel ----------------
    R = N * n_prompt
    P = k_shot * n_prompt                            # prototypes per support class
    M = n_prompt                                     # prototypes per query
    n_q = n_query
    n_sup_rows = n_way * P                           # support rows come first (way-major)
    n_alpha = len(alphas)

    F = feats - jnp.mean(feats, axis=-1, keepdims=True)            # centering()
    gram = jax.lax.dot_general(F, F, dimension_numbers=(((1,), (1,)), ((), ())),
                               preferred_element_type=jnp.float32)  # (R, R) = F @ F.T
    rr = jax.lax.broadcasted_iota(jnp.int32, (R, R), 0)
    cc = jax.lax.broadcasted_iota(jnp.int32, (R, R), 1)
    eye = rr == cc
    gd_col = jnp.sum(jnp.where(eye, gram, 0.0), axis=1, keepdims=True)   # (R,1) diag(G)
    gd_row = jnp.sum(jnp.where(eye, gram, 0.0), axis=0, keepdims=True)   # (1,R)
    d2 = jnp.maximum(gd_col + gd_row - 2.0 * gram, 0.0)                  # squared cdist

    # sum_a exp(-a * d2); alphas = base^k are doubling -> one exp + repeated squaring (EUP relief)
    doubling = n_alpha > 1 and all(
        abs(alphas[i + 1] - 2.0 * alphas[i]) < 1e-9 * abs(alphas[i + 1]) for i in range(n_alpha - 1))
    if doubling:
        e = jnp.exp(-alphas[0] * d2)
        ksum = e
        for _ in range(n_alpha - 1):
            e = e * e
            ksum = ksum + e
    else:
        ksum = jnp.zeros_like(d2)
        for a in alphas:
            ksum = ksum + jnp.exp(-float(a) * d2)

    # ---------------- block sums -> MMD_s / MMD_q / MMD_sq (lane-dense output) ----------------
    OUT_LANES = out_ref.shape[-1]
    # group assignment matrix A: lane g < n_way -> support way g; n_way <= g < n_way+n_q -> query g-n_way
    rA = jax.lax.broadcasted_iota(jnp.int32, (R, OUT_LANES), 0)
    gA = jax.lax.broadcasted_iota(jnp.int32, (R, OUT_LANES), 1)
    sup_lo = gA * P
    qry_lo = n_sup_rows + (gA - n_way) * M
    sup_sel = (gA < n_way) & (rA >= sup_lo) & (rA < sup_lo + P)
    qry_sel = (gA >= n_way) & (gA < n_way + n_q) & (rA >= qry_lo) & (rA < qry_lo + M)
    A = (sup_sel | qry_sel).astype(jnp.float32)                    # (R, OUT_LANES)

    qi = jax.lax.broadcasted_iota(jnp.int32, (n_q, R), 0)
    cr = jax.lax.broadcasted_iota(jnp.int32, (n_q, R), 1)
    q_lo = n_sup_rows + qi * M
    A_Tq = ((cr >= q_lo) & (cr < q_lo + M)).astype(jnp.float32)    # (n_q, R)

    wi = jax.lax.broadcasted_iota(jnp.int32, (n_way, R), 0)
    cs = jax.lax.broadcasted_iota(jnp.int32, (n_way, R), 1)
    s_lo = wi * P
    A_Ts = ((cs >= s_lo) & (cs < s_lo + P)).astype(jnp.float32)    # (n_way, R)

    KA = jnp.dot(ksum, A, preferred_element_type=jnp.float32)      # (R, OUT_LANES)
    cross = jnp.dot(A_Tq, KA, preferred_element_type=jnp.float32)  # (n_q, OUT_LANES): [:, :n_way]=QS, [:, n_way+qi]=QQ
    s_blk = jnp.dot(A_Ts, KA, preferred_element_type=jnp.float32)  # (n_way, OUT_LANES): [w, w]=SS

    # diagonal of the gaussian kernel is exactly len(alphas) (d2 diag == 0 by construction),
    # so off-diagonal block sums = block sum - group_size * n_alpha.
    r_s = jax.lax.broadcasted_iota(jnp.int32, (n_way, OUT_LANES), 0)
    l_s = jax.lax.broadcasted_iota(jnp.int32, (n_way, OUT_LANES), 1)
    s_bdiag = jnp.sum(jnp.where(r_s == l_s, s_blk, 0.0), axis=0, keepdims=True)   # (1, OUT_LANES)
    r_q = jax.lax.broadcasted_iota(jnp.int32, (n_q, OUT_LANES), 0)
    l_q = jax.lax.broadcasted_iota(jnp.int32, (n_q, OUT_LANES), 1)
    q_bdiag = jnp.sum(jnp.where(l_q == n_way + r_q, cross, 0.0), axis=1, keepdims=True)  # (n_q, 1)

    s_term = (s_bdiag - float(P * n_alpha)) * (1.0 / float(P * (P - 1)))   # mmd_s  (lanes < n_way valid)
    q_term = (q_bdiag - float(M * n_alpha)) * (1.0 / float(M * (M - 1)))   # mmd_q  (per query row)
    mmd = s_term + q_term + (-2.0 / float(M * P)) * cross                  # (n_q, OUT_LANES)
    # lanes >= n_way are garbage by construction; the wrapper slices [:, :, :n_way].
    out_ref[0] = mmd.astype(out_ref.dtype)


# ----------------------------- JAX glue -----------------------------
def mmd_forward(support_xf, query_xf, params, *, n_way, k_shot, nhead, n_prompt, alphas):
    """Eval-mode MMD.forward (minus the prompt inner-loop update): returns mmd_dis (b*q, n_way)."""
    b, n_s, c, h, w = support_xf.shape
    n_q = query_xf.shape[1]
    assert n_s == n_way * k_shot
    E = c
    L = h * w
    P = k_shot * n_prompt
    M = n_prompt
    assert P > 1 and M > 1, "MMD off-diagonal normalization divides by P*(P-1) / M*(M-1)"

    # tokens: (b, N, L, E), support sequences first (way-major) then query sequences
    toks_s = support_xf.reshape(b, n_s, c, L).transpose(0, 1, 3, 2)
    toks_q = query_xf.reshape(b, n_q, c, L).transpose(0, 1, 3, 2)
    tokens = jnp.concatenate([toks_s, toks_q], axis=1).astype(jnp.float32)
    N = n_s + n_q

    # pre-transpose / pre-pack weights (no .T inside the kernel); pre-project the meta prompt.
    enc_w_qkv = params["enc_w_in"].T                         # (E, 3E)
    enc_b_qkv = params["enc_b_in"].reshape(1, 3 * E)
    enc_w_out_t = params["enc_w_out"].T                      # (E, E)
    dec_w_in = params["dec_w_in"]
    dec_b_flat = params["dec_b_in"].reshape(3 * E)
    dec_q_tok = (params["meta_prompt"] @ dec_w_in[0:E].T + dec_b_flat[0:E][None, :])   # (n_prompt, E)
    dec_w_kv_t = dec_w_in[E:3 * E].T                         # (E, 2E) -> [K | V] columns
    dec_b_kv = dec_b_flat[E:3 * E].reshape(1, 2 * E)
    dec_w_out_t = params["dec_w_out"].T

    out_lanes = max(128, ((n_way + n_q + 127) // 128) * 128)   # lane-dense output slab

    kernel = functools.partial(
        _fused_mmd_kernel, nhead=nhead, n_way=n_way, k_shot=k_shot,
        n_prompt=n_prompt, n_query=n_q, alphas=tuple(float(a) for a in alphas))

    full2 = lambda i: (0, 0)   # weights: constant index map (re-staged per grid step; b is tiny)
    out = pl.pallas_call(
        kernel,
        out_shape=jax.ShapeDtypeStruct((b, n_q, out_lanes), jnp.float32),
        grid=(b,),
        in_specs=[
            pl.BlockSpec((1, N, L, E), lambda i: (i, 0, 0, 0)),
            pl.BlockSpec((E, 3 * E), full2),
            pl.BlockSpec((1, 3 * E), full2),
            pl.BlockSpec((E, E), full2),
            pl.BlockSpec((1, E), full2),
            pl.BlockSpec((1, E), full2),
            pl.BlockSpec((1, E), full2),
            pl.BlockSpec((n_prompt, E), full2),
            pl.BlockSpec((E, 2 * E), full2),
            pl.BlockSpec((1, 2 * E), full2),
            pl.BlockSpec((E, E), full2),
            pl.BlockSpec((1, E), full2),
            pl.BlockSpec((1, E), full2),
            pl.BlockSpec((1, E), full2),
        ],
        out_specs=pl.BlockSpec((1, n_q, out_lanes), lambda i: (i, 0, 0)),
        compiler_params=pltpu.CompilerParams(dimension_semantics=("parallel",)),
    )(tokens, enc_w_qkv, enc_b_qkv, enc_w_out_t, params["enc_b_out"],
      params["enc_ln_g"], params["enc_ln_b"],
      dec_q_tok, dec_w_kv_t, dec_b_kv, dec_w_out_t, params["dec_b_out"],
      params["dec_ln_g"], params["dec_ln_b"])

    return out[:, :, :n_way].reshape(b * n_q, n_way)


def _xavier_uniform(key, shape):
    fan_out, fan_in = shape
    a = math.sqrt(6.0 / (fan_in + fan_out))
    return jax.random.uniform(key, shape, jnp.float32, -a, a)


if __name__ == "__main__":
    # --- small config consistent with the module ---
    b = 2
    n_way = 2
    k_shot = 1
    q = 4
    feat_dim = 32            # in_channels (c)
    H = W = 4
    proj_dim = 64
    head_dim = 32
    num_head = proj_dim // head_dim            # transformer nhead = 2
    num_prompt_per_way = 2
    n_meta_prompt = n_way * num_prompt_per_way
    alphas = [2.0 ** k for k in range(-3, 2)]  # cfg.model.mmd.alphas = 2.0, kernel='gaussian'
    # cfg.model.mmd.l2norm = False (no l2 normalization after centering)

    key = jax.random.PRNGKey(0)
    keys = jax.random.split(key, 10)

    # --- deterministic synthetic parameters (shapes match the module) ---
    params = dict(
        meta_prompt=_xavier_uniform(keys[0], (n_meta_prompt, feat_dim)),
        enc_w_in=_xavier_uniform(keys[1], (3 * feat_dim, feat_dim)),
        enc_b_in=jnp.zeros((3, feat_dim), jnp.float32),
        enc_w_out=_xavier_uniform(keys[2], (feat_dim, feat_dim)),
        enc_b_out=jnp.zeros((1, feat_dim), jnp.float32),
        enc_ln_g=jnp.ones((1, feat_dim), jnp.float32),
        enc_ln_b=jnp.zeros((1, feat_dim), jnp.float32),
        dec_w_in=_xavier_uniform(keys[3], (3 * feat_dim, feat_dim)),
        dec_b_in=jnp.zeros((3, feat_dim), jnp.float32),
        dec_w_out=_xavier_uniform(keys[4], (feat_dim, feat_dim)),
        dec_b_out=jnp.zeros((1, feat_dim), jnp.float32),
        dec_ln_g=jnp.ones((1, feat_dim), jnp.float32),
        dec_ln_b=jnp.zeros((1, feat_dim), jnp.float32),
    )

    # --- inputs (NCHW feature maps, like the PyTorch module) ---
    n_s = n_way * k_shot
    support_xf = jax.random.normal(keys[5], (b, n_s, feat_dim, H, W), jnp.float32)
    query_xf = jax.random.normal(keys[6], (b, q, feat_dim, H, W), jnp.float32)
    query_y = jax.random.randint(keys[7], (b, q), 0, n_way, dtype=jnp.int32)

    mmd_dis = mmd_forward(support_xf, query_xf, params,
                          n_way=n_way, k_shot=k_shot, nhead=num_head,
                          n_prompt=n_meta_prompt, alphas=alphas)        # (b*q, n_way)

    # eval-mode tail of forward(): argmin over classes -> rewards
    predict_labels = jnp.argmin(mmd_dis, axis=1)
    rewards = (predict_labels == query_y.reshape(b * q)).astype(jnp.int32)

    mmd_dis = jax.block_until_ready(mmd_dis)
    rewards = jax.block_until_ready(rewards)
    assert mmd_dis.shape == (b * q, n_way)
    assert rewards.shape == (b * q,)
    assert bool(jnp.all(jnp.isfinite(mmd_dis)))
    print("KERNEL_OK")
</pallas_src>

<mosaic_0001>
module attributes {stable_mosaic.version = 11 : i64} {
  func.func @_fused_mmd_kernel(%arg0: i32, %arg1: memref<1x6x16x32xf32, #tpu.memory_space<vmem>>, %arg2: memref<32x96xf32, #tpu.memory_space<vmem>>, %arg3: memref<1x96xf32, #tpu.memory_space<vmem>>, %arg4: memref<32x32xf32, #tpu.memory_space<vmem>>, %arg5: memref<1x32xf32, #tpu.memory_space<vmem>>, %arg6: memref<1x32xf32, #tpu.memory_space<vmem>>, %arg7: memref<1x32xf32, #tpu.memory_space<vmem>>, %arg8: memref<4x32xf32, #tpu.memory_space<vmem>>, %arg9: memref<32x64xf32, #tpu.memory_space<vmem>>, %arg10: memref<1x64xf32, #tpu.memory_space<vmem>>, %arg11: memref<32x32xf32, #tpu.memory_space<vmem>>, %arg12: memref<1x32xf32, #tpu.memory_space<vmem>>, %arg13: memref<1x32xf32, #tpu.memory_space<vmem>>, %arg14: memref<1x32xf32, #tpu.memory_space<vmem>>, %arg15: memref<1x4x128xf32, #tpu.memory_space<vmem>>) attributes {dimension_semantics = [#tpu.dimension_semantics<parallel>], iteration_bounds = array<i64: 2>, scalar_prefetch = 0 : i64, scratch_operands = 0 : i64, tpu.core_type = #tpu.core_type<tc>, window_params = [{transform_indices = @transform_0, window_bounds = array<i64: 1, 6, 16, 32>}, {pipeline_mode = #tpu.pipeline_mode<synchronous>, transform_indices = @transform_1, window_bounds = array<i64: 32, 96>}, {pipeline_mode = #tpu.pipeline_mode<synchronous>, transform_indices = @transform_2, window_bounds = array<i64: 1, 96>}, {pipeline_mode = #tpu.pipeline_mode<synchronous>, transform_indices = @transform_3, window_bounds = array<i64: 32, 32>}, {pipeline_mode = #tpu.pipeline_mode<synchronous>, transform_indices = @transform_4, window_bounds = array<i64: 1, 32>}, {pipeline_mode = #tpu.pipeline_mode<synchronous>, transform_indices = @transform_5, window_bounds = array<i64: 1, 32>}, {pipeline_mode = #tpu.pipeline_mode<synchronous>, transform_indices = @transform_6, window_bounds = array<i64: 1, 32>}, {pipeline_mode = #tpu.pipeline_mode<synchronous>, transform_indices = @transform_7, window_bounds = array<i64: 4, 32>}, {pipeline_mode = #tpu.pipeline_mode<synchronous>, transform_indices = @transform_8, window_bounds = array<i64: 32, 64>}, {pipeline_mode = #tpu.pipeline_mode<synchronous>, transform_indices = @transform_9, window_bounds = array<i64: 1, 64>}, {pipeline_mode = #tpu.pipeline_mode<synchronous>, transform_indices = @transform_10, window_bounds = array<i64: 32, 32>}, {pipeline_mode = #tpu.pipeline_mode<synchronous>, transform_indices = @transform_11, window_bounds = array<i64: 1, 32>}, {pipeline_mode = #tpu.pipeline_mode<synchronous>, transform_indices = @transform_12, window_bounds = array<i64: 1, 32>}, {pipeline_mode = #tpu.pipeline_mode<synchronous>, transform_indices = @transform_13, window_bounds = array<i64: 1, 32>}, {transform_indices = @transform_14, window_bounds = array<i64: 1, 4, 128>}]} {
    %c0 = arith.constant 0 : index
    %c0_0 = arith.constant 0 : index
    %c0_1 = arith.constant 0 : index
    %c0_2 = arith.constant 0 : index
    %0 = vector.load %arg1[%c0, %c0_0, %c0_1, %c0_2] : memref<1x6x16x32xf32, #tpu.memory_space<vmem>>, vector<1x6x16x32xf32>
    %1 = vector.shape_cast %0 : vector<1x6x16x32xf32> to vector<6x16x32xf32>
    %2 = vector.shape_cast %1 : vector<6x16x32xf32> to vector<96x32xf32>
    %c0_3 = arith.constant 0 : index
    %c0_4 = arith.constant 0 : index
    %3 = vector.load %arg2[%c0_3, %c0_4] : memref<32x96xf32, #tpu.memory_space<vmem>>, vector<32x96xf32>
    %cst = arith.constant dense<0.000000e+00> : vector<96x96xf32>
    %4 = tpu.matmul %2, %3, %cst {dimension_numbers = #tpu.dot_dimension_numbers<[1], [0], [0], [1], [0, 0, 1, 1], [], []>} : vector<96x32xf32>, vector<32x96xf32>, vector<96x96xf32> -> vector<96x96xf32>
    %c0_5 = arith.constant 0 : index
    %c0_6 = arith.constant 0 : index
    %5 = vector.load %arg3[%c0_5, %c0_6] : memref<1x96xf32, #tpu.memory_space<vmem>>, vector<1x96xf32>
    %6 = vector.broadcast %5 : vector<1x96xf32> to vector<96x96xf32>
    %7 = arith.addf %4, %6 : vector<96x96xf32>
    %8 = vector.extract_strided_slice %7 {offsets = [0, 0], sizes = [96, 32], strides = [1, 1]} : vector<96x96xf32> to vector<96x32xf32>
    %9 = vector.extract_strided_slice %7 {offsets = [0, 32], sizes = [96, 32], strides = [1, 1]} : vector<96x96xf32> to vector<96x32xf32>
    %10 = vector.extract_strided_slice %7 {offsets = [0, 64], sizes = [96, 32], strides = [1, 1]} : vector<96x96xf32> to vector<96x32xf32>
    %11 = vector.extract_strided_slice %8 {offsets = [0, 0], sizes = [96, 16], strides = [1, 1]} : vector<96x32xf32> to vector<96x16xf32>
    %cst_7 = arith.constant 2.500000e-01 : f32
    %12 = vector.broadcast %cst_7 : f32 to vector<96x16xf32>
    %13 = arith.mulf %11, %12 : vector<96x16xf32>
    %14 = vector.shape_cast %13 : vector<96x16xf32> to vector<6x16x16xf32>
    %15 = vector.extract_strided_slice %9 {offsets = [0, 0], sizes = [96, 16], strides = [1, 1]} : vector<96x32xf32> to vector<96x16xf32>
    %16 = vector.shape_cast %15 : vector<96x16xf32> to vector<6x16x16xf32>
    %17 = vector.extract_strided_slice %10 {offsets = [0, 0], sizes = [96, 16], strides = [1, 1]} : vector<96x32xf32> to vector<96x16xf32>
    %18 = vector.shape_cast %17 : vector<96x16xf32> to vector<6x16x16xf32>
    "tpu.trace_start"() <{level = 10 : i32, message = "nqd,nkd->nqk"}> : () -> ()
    %cst_8 = arith.constant dense<0.000000e+00> : vector<6x16x16xf32>
    %19 = tpu.matmul %14, %16, %cst_8 {dimension_numbers = #tpu.dot_dimension_numbers<[2], [2], [1], [1], [0, 0, 0, 1, 1, 1], [0], [0]>} : vector<6x16x16xf32>, vector<6x16x16xf32>, vector<6x16x16xf32> -> vector<6x16x16xf32>
    "tpu.trace_stop"() : () -> ()
    %cst_9 = arith.constant dense<0xFF800000> : vector<6x16xf32>
    %20 = vector.multi_reduction <maximumf>, %19, %cst_9 [2] : vector<6x16x16xf32> to vector<6x16xf32>
    %21 = vector.shape_cast %20 : vector<6x16xf32> to vector<6x16x1xf32>
    %22 = vector.broadcast %21 : vector<6x16x1xf32> to vector<6x16x16xf32>
    %23 = arith.subf %19, %22 : vector<6x16x16xf32>
    %24 = math.exp %23 : vector<6x16x16xf32>
    %cst_10 = arith.constant dense<0.000000e+00> : vector<6x16xf32>
    %25 = vector.multi_reduction <add>, %24, %cst_10 [2] : vector<6x16x16xf32> to vector<6x16xf32>
    %26 = vector.shape_cast %25 : vector<6x16xf32> to vector<6x16x1xf32>
    %27 = tpu.reciprocal %26 {approx = true} : vector<6x16x1xf32> -> vector<6x16x1xf32>
    %28 = vector.broadcast %27 : vector<6x16x1xf32> to vector<6x16x16xf32>
    %29 = arith.mulf %24, %28 : vector<6x16x16xf32>
    "tpu.trace_start"() <{level = 10 : i32, message = "nqk,nkd->nqd"}> : () -> ()
    %cst_11 = arith.constant dense<0.000000e+00> : vector<6x16x16xf32>
    %30 = tpu.matmul %29, %18, %cst_11 {dimension_numbers = #tpu.dot_dimension_numbers<[2], [1], [1], [2], [0, 0, 0, 1, 1, 2], [0], [0]>} : vector<6x16x16xf32>, vector<6x16x16xf32>, vector<6x16x16xf32> -> vector<6x16x16xf32>
    "tpu.trace_stop"() : () -> ()
    %31 = vector.shape_cast %30 : vector<6x16x16xf32> to vector<96x16xf32>
    %32 = vector.extract_strided_slice %8 {offsets = [0, 16], sizes = [96, 16], strides = [1, 1]} : vector<96x32xf32> to vector<96x16xf32>
    %cst_12 = arith.constant 2.500000e-01 : f32
    %33 = vector.broadcast %cst_12 : f32 to vector<96x16xf32>
    %34 = arith.mulf %32, %33 : vector<96x16xf32>
    %35 = vector.shape_cast %34 : vector<96x16xf32> to vector<6x16x16xf32>
    %36 = vector.extract_strided_slice %9 {offsets = [0, 16], sizes = [96, 16], strides = [1, 1]} : vector<96x32xf32> to vector<96x16xf32>
    %37 = vector.shape_cast %36 : vector<96x16xf32> to vector<6x16x16xf32>
    %38 = vector.extract_strided_slice %10 {offsets = [0, 16], sizes = [96, 16], strides = [1, 1]} : vector<96x32xf32> to vector<96x16xf32>
    %39 = vector.shape_cast %38 : vector<96x16xf32> to vector<6x16x16xf32>
    "tpu.trace_start"() <{level = 10 : i32, message = "nqd,nkd->nqk"}> : () -> ()
    %cst_13 = arith.constant dense<0.000000e+00> : vector<6x16x16xf32>
    %40 = tpu.matmul %35, %37, %cst_13 {dimension_numbers = #tpu.dot_dimension_numbers<[2], [2], [1], [1], [0, 0, 0, 1, 1, 1], [0], [0]>} : vector<6x16x16xf32>, vector<6x16x16xf32>, vector<6x16x16xf32> -> vector<6x16x16xf32>
    "tpu.trace_stop"() : () -> ()
    %cst_14 = arith.constant dense<0xFF800000> : vector<6x16xf32>
    %41 = vector.multi_reduction <maximumf>, %40, %cst_14 [2] : vector<6x16x16xf32> to vector<6x16xf32>
    %42 = vector.shape_cast %41 : vector<6x16xf32> to vector<6x16x1xf32>
    %43 = vector.broadcast %42 : vector<6x16x1xf32> to vector<6x16x16xf32>
    %44 = arith.subf %40, %43 : vector<6x16x16xf32>
    %45 = math.exp %44 : vector<6x16x16xf32>
    %cst_15 = arith.constant dense<0.000000e+00> : vector<6x16xf32>
    %46 = vector.multi_reduction <add>, %45, %cst_15 [2] : vector<6x16x16xf32> to vector<6x16xf32>
    %47 = vector.shape_cast %46 : vector<6x16xf32> to vector<6x16x1xf32>
    %48 = tpu.reciprocal %47 {approx = true} : vector<6x16x1xf32> -> vector<6x16x1xf32>
    %49 = vector.broadcast %48 : vector<6x16x1xf32> to vector<6x16x16xf32>
    %50 = arith.mulf %45, %49 : vector<6x16x16xf32>
    "tpu.trace_start"() <{level = 10 : i32, message = "nqk,nkd->nqd"}> : () -> ()
    %cst_16 = arith.constant dense<0.000000e+00> : vector<6x16x16xf32>
    %51 = tpu.matmul %50, %39, %cst_16 {dimension_numbers = #tpu.dot_dimension_numbers<[2], [1], [1], [2], [0, 0, 0, 1, 1, 2], [0], [0]>} : vector<6x16x16xf32>, vector<6x16x16xf32>, vector<6x16x16xf32> -> vector<6x16x16xf32>
    "tpu.trace_stop"() : () -> ()
    %52 = vector.shape_cast %51 : vector<6x16x16xf32> to vector<96x16xf32>
    %53 = tpu.concatenate %31, %52 in 1 : vector<96x16xf32>, vector<96x16xf32> -> vector<96x32xf32>
    %c0_17 = arith.constant 0 : index
    %c0_18 = arith.constant 0 : index
    %54 = vector.load %arg4[%c0_17, %c0_18] : memref<32x32xf32, #tpu.memory_space<vmem>>, vector<32x32xf32>
    %cst_19 = arith.constant dense<0.000000e+00> : vector<96x32xf32>
    %55 = tpu.matmul %53, %54, %cst_19 {dimension_numbers = #tpu.dot_dimension_numbers<[1], [0], [0], [1], [0, 0, 1, 1], [], []>} : vector<96x32xf32>, vector<32x32xf32>, vector<96x32xf32> -> vector<96x32xf32>
    %c0_20 = arith.constant 0 : index
    %c0_21 = arith.constant 0 : index
    %56 = vector.load %arg5[%c0_20, %c0_21] : memref<1x32xf32, #tpu.memory_space<vmem>>, vector<1x32xf32>
    %57 = vector.broadcast %56 : vector<1x32xf32> to vector<96x32xf32>
    %58 = arith.addf %55, %57 : vector<96x32xf32>
    %c0_22 = arith.constant 0 : index
    %c0_23 = arith.constant 0 : index
    %59 = vector.load %arg6[%c0_22, %c0_23] : memref<1x32xf32, #tpu.memory_space<vmem>>, vector<1x32xf32>
    %c0_24 = arith.constant 0 : index
    %c0_25 = arith.constant 0 : index
    %60 = vector.load %arg7[%c0_24, %c0_25] : memref<1x32xf32, #tpu.memory_space<vmem>>, vector<1x32xf32>
    %cst_26 = arith.constant dense<0.000000e+00> : vector<96xf32>
    %61 = vector.multi_reduction <add>, %58, %cst_26 [1] : vector<96x32xf32> to vector<96xf32>
    %62 = vector.shape_cast %61 : vector<96xf32> to vector<96x1xf32>
    %cst_27 = arith.constant 3.200000e+01 : f32
    %63 = vector.broadcast %cst_27 : f32 to vector<96x1xf32>
    %64 = arith.divf %62, %63 : vector<96x1xf32>
    %65 = vector.broadcast %64 : vector<96x1xf32> to vector<96x32xf32>
    %66 = arith.subf %58, %65 : vector<96x32xf32>
    %67 = arith.mulf %66, %66 : vector<96x32xf32>
    %cst_28 = arith.constant dense<0.000000e+00> : vector<96xf32>
    %68 = vector.multi_reduction <add>, %67, %cst_28 [1] : vector<96x32xf32> to vector<96xf32>
    %69 = vector.shape_cast %68 : vector<96xf32> to vector<96x1xf32>
    %cst_29 = arith.constant 3.200000e+01 : f32
    %70 = vector.broadcast %cst_29 : f32 to vector<96x1xf32>
    %71 = arith.divf %69, %70 : vector<96x1xf32>
    %72 = vector.broadcast %64 : vector<96x1xf32> to vector<96x32xf32>
    %73 = arith.subf %58, %72 : vector<96x32xf32>
    %cst_30 = arith.constant 9.99999974E-6 : f32
    %74 = vector.broadcast %cst_30 : f32 to vector<96x1xf32>
    %75 = arith.addf %71, %74 : vector<96x1xf32>
    %76 = math.rsqrt %75 : vector<96x1xf32>
    %77 = vector.broadcast %76 : vector<96x1xf32> to vector<96x32xf32>
    %78 = arith.mulf %73, %77 : vector<96x32xf32>
    %79 = vector.broadcast %59 : vector<1x32xf32> to vector<96x32xf32>
    %80 = arith.mulf %78, %79 : vector<96x32xf32>
    %81 = vector.broadcast %60 : vector<1x32xf32> to vector<96x32xf32>
    %82 = arith.addf %80, %81 : vector<96x32xf32>
    %c0_31 = arith.constant 0 : index
    %c0_32 = arith.constant 0 : index
    %83 = vector.load %arg9[%c0_31, %c0_32] : memref<32x64xf32, #tpu.memory_space<vmem>>, vector<32x64xf32>
    %cst_33 = arith.constant dense<0.000000e+00> : vector<96x64xf32>
    %84 = tpu.matmul %82, %83, %cst_33 {dimension_numbers = #tpu.dot_dimension_numbers<[1], [0], [0], [1], [0, 0, 1, 1], [], []>} : vector<96x32xf32>, vector<32x64xf32>, vector<96x64xf32> -> vector<96x64xf32>
    %c0_34 = arith.constant 0 : index
    %c0_35 = arith.constant 0 : index
    %85 = vector.load %arg10[%c0_34, %c0_35] : memref<1x64xf32, #tpu.memory_space<vmem>>, vector<1x64xf32>
    %86 = vector.broadcast %85 : vector<1x64xf32> to vector<96x64xf32>
    %87 = arith.addf %84, %86 : vector<96x64xf32>
    %88 = vector.extract_strided_slice %87 {offsets = [0, 0], sizes = [96, 32], strides = [1, 1]} : vector<96x64xf32> to vector<96x32xf32>
    %89 = vector.extract_strided_slice %87 {offsets = [0, 32], sizes = [96, 32], strides = [1, 1]} : vector<96x64xf32> to vector<96x32xf32>
    %c0_36 = arith.constant 0 : index
    %c0_37 = arith.constant 0 : index
    %90 = vector.load %arg8[%c0_36, %c0_37] : memref<4x32xf32, #tpu.memory_space<vmem>>, vector<4x32xf32>
    %91 = vector.extract_strided_slice %90 {offsets = [0, 0], sizes = [4, 16], strides = [1, 1]} : vector<4x32xf32> to vector<4x16xf32>
    %cst_38 = arith.constant 2.500000e-01 : f32
    %92 = vector.broadcast %cst_38 : f32 to vector<4x16xf32>
    %93 = arith.mulf %91, %92 : vector<4x16xf32>
    %94 = vector.shape_cast %93 : vector<4x16xf32> to vector<1x4x16xf32>
    %95 = vector.shape_cast %94 : vector<1x4x16xf32> to vector<1x4x16xf32>
    %96 = vector.broadcast %95 : vector<1x4x16xf32> to vector<6x4x16xf32>
    %97 = vector.extract_strided_slice %88 {offsets = [0, 0], sizes = [96, 16], strides = [1, 1]} : vector<96x32xf32> to vector<96x16xf32>
    %98 = vector.shape_cast %97 : vector<96x16xf32> to vector<6x16x16xf32>
    %99 = vector.extract_strided_slice %89 {offsets = [0, 0], sizes = [96, 16], strides = [1, 1]} : vector<96x32xf32> to vector<96x16xf32>
    %100 = vector.shape_cast %99 : vector<96x16xf32> to vector<6x16x16xf32>
    "tpu.trace_start"() <{level = 10 : i32, message = "npd,nkd->npk"}> : () -> ()
    %cst_39 = arith.constant dense<0.000000e+00> : vector<6x4x16xf32>
    %101 = tpu.matmul %96, %98, %cst_39 {dimension_numbers = #tpu.dot_dimension_numbers<[2], [2], [1], [1], [0, 0, 0, 1, 1, 1], [0], [0]>} : vector<6x4x16xf32>, vector<6x16x16xf32>, vector<6x4x16xf32> -> vector<6x4x16xf32>
    "tpu.trace_stop"() : () -> ()
    %cst_40 = arith.constant dense<0xFF800000> : vector<6x4xf32>
    %102 = vector.multi_reduction <maximumf>, %101, %cst_40 [2] : vector<6x4x16xf32> to vector<6x4xf32>
    %103 = vector.shape_cast %102 : vector<6x4xf32> to vector<6x4x1xf32>
    %104 = vector.broadcast %103 : vector<6x4x1xf32> to vector<6x4x16xf32>
    %105 = arith.subf %101, %104 : vector<6x4x16xf32>
    %106 = math.exp %105 : vector<6x4x16xf32>
    %cst_41 = arith.constant dense<0.000000e+00> : vector<6x4xf32>
    %107 = vector.multi_reduction <add>, %106, %cst_41 [2] : vector<6x4x16xf32> to vector<6x4xf32>
    %108 = vector.shape_cast %107 : vector<6x4xf32> to vector<6x4x1xf32>
    %109 = tpu.reciprocal %108 {approx = true} : vector<6x4x1xf32> -> vector<6x4x1xf32>
    %110 = vector.broadcast %109 : vector<6x4x1xf32> to vector<6x4x16xf32>
    %111 = arith.mulf %106, %110 : vector<6x4x16xf32>
    "tpu.trace_start"() <{level = 10 : i32, message = "npk,nkd->npd"}> : () -> ()
    %cst_42 = arith.constant dense<0.000000e+00> : vector<6x4x16xf32>
    %112 = tpu.matmul %111, %100, %cst_42 {dimension_numbers = #tpu.dot_dimension_numbers<[2], [1], [1], [2], [0, 0, 0, 1, 1, 2], [0], [0]>} : vector<6x4x16xf32>, vector<6x16x16xf32>, vector<6x4x16xf32> -> vector<6x4x16xf32>
    "tpu.trace_stop"() : () -> ()
    %113 = vector.shape_cast %112 : vector<6x4x16xf32> to vector<24x16xf32>
    %114 = vector.extract_strided_slice %90 {offsets = [0, 16], sizes = [4, 16], strides = [1, 1]} : vector<4x32xf32> to vector<4x16xf32>
    %cst_43 = arith.constant 2.500000e-01 : f32
    %115 = vector.broadcast %cst_43 : f32 to vector<4x16xf32>
    %116 = arith.mulf %114, %115 : vector<4x16xf32>
    %117 = vector.shape_cast %116 : vector<4x16xf32> to vector<1x4x16xf32>
    %118 = vector.shape_cast %117 : vector<1x4x16xf32> to vector<1x4x16xf32>
    %119 = vector.broadcast %118 : vector<1x4x16xf32> to vector<6x4x16xf32>
    %120 = vector.extract_strided_slice %88 {offsets = [0, 16], sizes = [96, 16], strides = [1, 1]} : vector<96x32xf32> to vector<96x16xf32>
    %121 = vector.shape_cast %120 : vector<96x16xf32> to vector<6x16x16xf32>
    %122 = vector.extract_strided_slice %89 {offsets = [0, 16], sizes = [96, 16], strides = [1, 1]} : vector<96x32xf32> to vector<96x16xf32>
    %123 = vector.shape_cast %122 : vector<96x16xf32> to vector<6x16x16xf32>
    "tpu.trace_start"() <{level = 10 : i32, message = "npd,nkd->npk"}> : () -> ()
    %cst_44 = arith.constant dense<0.000000e+00> : vector<6x4x16xf32>
    %124 = tpu.matmul %119, %121, %cst_44 {dimension_numbers = #tpu.dot_dimension_numbers<[2], [2], [1], [1], [0, 0, 0, 1, 1, 1], [0], [0]>} : vector<6x4x16xf32>, vector<6x16x16xf32>, vector<6x4x16xf32> -> vector<6x4x16xf32>
    "tpu.trace_stop"() : () -> ()
    %cst_45 = arith.constant dense<0xFF800000> : vector<6x4xf32>
    %125 = vector.multi_reduction <maximumf>, %124, %cst_45 [2] : vector<6x4x16xf32> to vector<6x4xf32>
    %126 = vector.shape_cast %125 : vector<6x4xf32> to vector<6x4x1xf32>
    %127 = vector.broadcast %126 : vector<6x4x1xf32> to vector<6x4x16xf32>
    %128 = arith.subf %124, %127 : vector<6x4x16xf32>
    %129 = math.exp %128 : vector<6x4x16xf32>
    %cst_46 = arith.constant dense<0.000000e+00> : vector<6x4xf32>
    %130 = vector.multi_reduction <add>, %129, %cst_46 [2] : vector<6x4x16xf32> to vector<6x4xf32>
    %131 = vector.shape_cast %130 : vector<6x4xf32> to vector<6x4x1xf32>
    %132 = tpu.reciprocal %131 {approx = true} : vector<6x4x1xf32> -> vector<6x4x1xf32>
    %133 = vector.broadcast %132 : vector<6x4x1xf32> to vector<6x4x16xf32>
    %134 = arith.mulf %129, %133 : vector<6x4x16xf32>
    "tpu.trace_start"() <{level = 10 : i32, message = "npk,nkd->npd"}> : () -> ()
    %cst_47 = arith.constant dense<0.000000e+00> : vector<6x4x16xf32>
    %135 = tpu.matmul %134, %123, %cst_47 {dimension_numbers = #tpu.dot_dimension_numbers<[2], [1], [1], [2], [0, 0, 0, 1, 1, 2], [0], [0]>} : vector<6x4x16xf32>, vector<6x16x16xf32>, vector<6x4x16xf32> -> vector<6x4x16xf32>
    "tpu.trace_stop"() : () -> ()
    %136 = vector.shape_cast %135 : vector<6x4x16xf32> to vector<24x16xf32>
    %137 = tpu.concatenate %113, %136 in 1 : vector<24x16xf32>, vector<24x16xf32> -> vector<24x32xf32>
    %c0_48 = arith.constant 0 : index
    %c0_49 = arith.constant 0 : index
    %138 = vector.load %arg11[%c0_48, %c0_49] : memref<32x32xf32, #tpu.memory_space<vmem>>, vector<32x32xf32>
    %cst_50 = arith.constant dense<0.000000e+00> : vector<24x32xf32>
    %139 = tpu.matmul %137, %138, %cst_50 {dimension_numbers = #tpu.dot_dimension_numbers<[1], [0], [0], [1], [0, 0, 1, 1], [], []>} : vector<24x32xf32>, vector<32x32xf32>, vector<24x32xf32> -> vector<24x32xf32>
    %c0_51 = arith.constant 0 : index
    %c0_52 = arith.constant 0 : index
    %140 = vector.load %arg12[%c0_51, %c0_52] : memref<1x32xf32, #tpu.memory_space<vmem>>, vector<1x32xf32>
    %141 = vector.broadcast %140 : vector<1x32xf32> to vector<24x32xf32>
    %142 = arith.addf %139, %141 : vector<24x32xf32>
    %c0_53 = arith.constant 0 : index
    %c0_54 = arith.constant 0 : index
    %143 = vector.load %arg13[%c0_53, %c0_54] : memref<1x32xf32, #tpu.memory_space<vmem>>, vector<1x32xf32>
    %c0_55 = arith.constant 0 : index
    %c0_56 = arith.constant 0 : index
    %144 = vector.load %arg14[%c0_55, %c0_56] : memref<1x32xf32, #tpu.memory_space<vmem>>, vector<1x32xf32>
    %cst_57 = arith.constant dense<0.000000e+00> : vector<24xf32>
    %145 = vector.multi_reduction <add>, %142, %cst_57 [1] : vector<24x32xf32> to vector<24xf32>
    %146 = vector.shape_cast %145 : vector<24xf32> to vector<24x1xf32>
    %cst_58 = arith.constant 3.200000e+01 : f32
    %147 = vector.broadcast %cst_58 : f32 to vector<24x1xf32>
    %148 = arith.divf %146, %147 : vector<24x1xf32>
    %149 = vector.broadcast %148 : vector<24x1xf32> to vector<24x32xf32>
    %150 = arith.subf %142, %149 : vector<24x32xf32>
    %151 = arith.mulf %150, %150 : vector<24x32xf32>
    %cst_59 = arith.constant dense<0.000000e+00> : vector<24xf32>
    %152 = vector.multi_reduction <add>, %151, %cst_59 [1] : vector<24x32xf32> to vector<24xf32>
    %153 = vector.shape_cast %152 : vector<24xf32> to vector<24x1xf32>
    %cst_60 = arith.constant 3.200000e+01 : f32
    %154 = vector.broadcast %cst_60 : f32 to vector<24x1xf32>
    %155 = arith.divf %153, %154 : vector<24x1xf32>
    %156 = vector.broadcast %148 : vector<24x1xf32> to vector<24x32xf32>
    %157 = arith.subf %142, %156 : vector<24x32xf32>
    %cst_61 = arith.constant 9.99999974E-6 : f32
    %158 = vector.broadcast %cst_61 : f32 to vector<24x1xf32>
    %159 = arith.addf %155, %158 : vector<24x1xf32>
    %160 = math.rsqrt %159 : vector<24x1xf32>
    %161 = vector.broadcast %160 : vector<24x1xf32> to vector<24x32xf32>
    %162 = arith.mulf %157, %161 : vector<24x32xf32>
    %163 = vector.broadcast %143 : vector<1x32xf32> to vector<24x32xf32>
    %164 = arith.mulf %162, %163 : vector<24x32xf32>
    %165 = vector.broadcast %144 : vector<1x32xf32> to vector<24x32xf32>
    %166 = arith.addf %164, %165 : vector<24x32xf32>
    %cst_62 = arith.constant dense<0.000000e+00> : vector<24xf32>
    %167 = vector.multi_reduction <add>, %166, %cst_62 [1] : vector<24x32xf32> to vector<24xf32>
    %168 = vector.shape_cast %167 : vector<24xf32> to vector<24x1xf32>
    %cst_63 = arith.constant 3.200000e+01 : f32
    %169 = vector.broadcast %cst_63 : f32 to vector<24x1xf32>
    %170 = arith.divf %168, %169 : vector<24x1xf32>
    %171 = vector.broadcast %170 : vector<24x1xf32> to vector<24x32xf32>
    %172 = arith.subf %166, %171 : vector<24x32xf32>
    %cst_64 = arith.constant dense<0.000000e+00> : vector<24x24xf32>
    %173 = tpu.matmul %172, %172, %cst_64 {dimension_numbers = #tpu.dot_dimension_numbers<[1], [1], [0], [0], [0, 0, 1, 0], [], []>} : vector<24x32xf32>, vector<24x32xf32>, vector<24x24xf32> -> vector<24x24xf32>
    %174 = tpu.iota {dimensions = array<i32: 0>} : vector<24x24xi32>
    %175 = tpu.iota {dimensions = array<i32: 1>} : vector<24x24xi32>
    %176 = arith.cmpi eq, %174, %175 : vector<24x24xi32>
    %cst_65 = arith.constant 0.000000e+00 : f32
    %177 = vector.broadcast %cst_65 : f32 to vector<24x24xf32>
    %178 = arith.select %176, %173, %177 : vector<24x24xi1>, vector<24x24xf32>
    %cst_66 = arith.constant dense<0.000000e+00> : vector<24xf32>
    %179 = vector.multi_reduction <add>, %178, %cst_66 [1] : vector<24x24xf32> to vector<24xf32>
    %180 = vector.shape_cast %179 : vector<24xf32> to vector<24x1xf32>
    %cst_67 = arith.constant 0.000000e+00 : f32
    %181 = vector.broadcast %cst_67 : f32 to vector<24x24xf32>
    %182 = arith.select %176, %173, %181 : vector<24x24xi1>, vector<24x24xf32>
    %cst_68 = arith.constant dense<0.000000e+00> : vector<24xf32>
    %183 = vector.multi_reduction <add>, %182, %cst_68 [0] : vector<24x24xf32> to vector<24xf32>
    %184 = vector.shape_cast %183 : vector<24xf32> to vector<1x24xf32>
    %185 = vector.broadcast %180 : vector<24x1xf32> to vector<24x24xf32>
    %186 = vector.broadcast %184 : vector<1x24xf32> to vector<24x24xf32>
    %187 = arith.addf %185, %186 : vector<24x24xf32>
    %cst_69 = arith.constant 2.000000e+00 : f32
    %188 = vector.broadcast %cst_69 : f32 to vector<24x24xf32>
    %189 = arith.mulf %188, %173 : vector<24x24xf32>
    %190 = arith.subf %187, %189 : vector<24x24xf32>
    %cst_70 = arith.constant 0.000000e+00 : f32
    %191 = vector.broadcast %cst_70 : f32 to vector<24x24xf32>
    %192 = arith.maximumf %190, %191 : vector<24x24xf32>
    %cst_71 = arith.constant -1.250000e-01 : f32
    %193 = vector.broadcast %cst_71 : f32 to vector<24x24xf32>
    %194 = arith.mulf %193, %192 : vector<24x24xf32>
    %195 = math.exp %194 : vector<24x24xf32>
    %196 = arith.mulf %195, %195 : vector<24x24xf32>
    %197 = arith.addf %195, %196 : vector<24x24xf32>
    %198 = arith.mulf %196, %196 : vector<24x24xf32>
    %199 = arith.addf %197, %198 : vector<24x24xf32>
    %200 = arith.mulf %198, %198 : vector<24x24xf32>
    %201 = arith.addf %199, %200 : vector<24x24xf32>
    %202 = arith.mulf %200, %200 : vector<24x24xf32>
    %203 = arith.addf %201, %202 : vector<24x24xf32>
    %204 = tpu.iota {dimensions = array<i32: 0>} : vector<24x128xi32>
    %205 = tpu.iota {dimensions = array<i32: 1>} : vector<24x128xi32>
    %c4_i32 = arith.constant 4 : i32
    %206 = vector.broadcast %c4_i32 : i32 to vector<24x128xi32>
    %207 = arith.muli %205, %206 : vector<24x128xi32>
    %c2_i32 = arith.constant 2 : i32
    %208 = vector.broadcast %c2_i32 : i32 to vector<24x128xi32>
    %209 = arith.subi %205, %208 : vector<24x128xi32>
    %c4_i32_72 = arith.constant 4 : i32
    %210 = vector.broadcast %c4_i32_72 : i32 to vector<24x128xi32>
    %211 = arith.muli %209, %210 : vector<24x128xi32>
    %c8_i32 = arith.constant 8 : i32
    %212 = vector.broadcast %c8_i32 : i32 to vector<24x128xi32>
    %213 = arith.addi %212, %211 : vector<24x128xi32>
    %c2_i32_73 = arith.constant 2 : i32
    %214 = vector.broadcast %c2_i32_73 : i32 to vector<24x128xi32>
    %215 = arith.cmpi slt, %205, %214 : vector<24x128xi32>
    %216 = arith.cmpi sge, %204, %207 : vector<24x128xi32>
    %217 = arith.andi %215, %216 : vector<24x128xi1>
    %c4_i32_74 = arith.constant 4 : i32
    %218 = vector.broadcast %c4_i32_74 : i32 to vector<24x128xi32>
    %219 = arith.addi %207, %218 : vector<24x128xi32>
    %220 = arith.cmpi slt, %204, %219 : vector<24x128xi32>
    %221 = arith.andi %217, %220 : vector<24x128xi1>
    %c2_i32_75 = arith.constant 2 : i32
    %222 = vector.broadcast %c2_i32_75 : i32 to vector<24x128xi32>
    %223 = arith.cmpi sge, %205, %222 : vector<24x128xi32>
    %c6_i32 = arith.constant 6 : i32
    %224 = vector.broadcast %c6_i32 : i32 to vector<24x128xi32>
    %225 = arith.cmpi slt, %205, %224 : vector<24x128xi32>
    %226 = arith.andi %223, %225 : vector<24x128xi1>
    %227 = arith.cmpi sge, %204, %213 : vector<24x128xi32>
    %228 = arith.andi %226, %227 : vector<24x128xi1>
    %c4_i32_76 = arith.constant 4 : i32
    %229 = vector.broadcast %c4_i32_76 : i32 to vector<24x128xi32>
    %230 = arith.addi %213, %229 : vector<24x128xi32>
    %231 = arith.cmpi slt, %204, %230 : vector<24x128xi32>
    %232 = arith.andi %228, %231 : vector<24x128xi1>
    %233 = arith.ori %221, %232 : vector<24x128xi1>
    %234 = arith.extui %233 : vector<24x128xi1> to vector<24x128xi32>
    %235 = arith.sitofp %234 : vector<24x128xi32> to vector<24x128xf32>
    %236 = tpu.iota {dimensions = array<i32: 0>} : vector<4x24xi32>
    %237 = tpu.iota {dimensions = array<i32: 1>} : vector<4x24xi32>
    %c4_i32_77 = arith.constant 4 : i32
    %238 = vector.broadcast %c4_i32_77 : i32 to vector<4x24xi32>
    %239 = arith.muli %236, %238 : vector<4x24xi32>
    %c8_i32_78 = arith.constant 8 : i32
    %240 = vector.broadcast %c8_i32_78 : i32 to vector<4x24xi32>
    %241 = arith.addi %240, %239 : vector<4x24xi32>
    %242 = arith.cmpi sge, %237, %241 : vector<4x24xi32>
    %c4_i32_79 = arith.constant 4 : i32
    %243 = vector.broadcast %c4_i32_79 : i32 to vector<4x24xi32>
    %244 = arith.addi %241, %243 : vector<4x24xi32>
    %245 = arith.cmpi slt, %237, %244 : vector<4x24xi32>
    %246 = arith.andi %242, %245 : vector<4x24xi1>
    %247 = arith.extui %246 : vector<4x24xi1> to vector<4x24xi32>
    %248 = arith.sitofp %247 : vector<4x24xi32> to vector<4x24xf32>
    %249 = tpu.iota {dimensions = array<i32: 0>} : vector<2x24xi32>
    %250 = tpu.iota {dimensions = array<i32: 1>} : vector<2x24xi32>
    %c4_i32_80 = arith.constant 4 : i32
    %251 = vector.broadcast %c4_i32_80 : i32 to vector<2x24xi32>
    %252 = arith.muli %249, %251 : vector<2x24xi32>
    %253 = arith.cmpi sge, %250, %252 : vector<2x24xi32>
    %c4_i32_81 = arith.constant 4 : i32
    %254 = vector.broadcast %c4_i32_81 : i32 to vector<2x24xi32>
    %255 = arith.addi %252, %254 : vector<2x24xi32>
    %256 = arith.cmpi slt, %250, %255 : vector<2x24xi32>
    %257 = arith.andi %253, %256 : vector<2x24xi1>
    %258 = arith.extui %257 : vector<2x24xi1> to vector<2x24xi32>
    %259 = arith.sitofp %258 : vector<2x24xi32> to vector<2x24xf32>
    %cst_82 = arith.constant dense<0.000000e+00> : vector<24x128xf32>
    %260 = tpu.matmul %203, %235, %cst_82 {dimension_numbers = #tpu.dot_dimension_numbers<[1], [0], [0], [1], [0, 0, 1, 1], [], []>} : vector<24x24xf32>, vector<24x128xf32>, vector<24x128xf32> -> vector<24x128xf32>
    %cst_83 = arith.constant dense<0.000000e+00> : vector<4x128xf32>
    %261 = tpu.matmul %248, %260, %cst_83 {dimension_numbers = #tpu.dot_dimension_numbers<[1], [0], [0], [1], [0, 0, 1, 1], [], []>} : vector<4x24xf32>, vector<24x128xf32>, vector<4x128xf32> -> vector<4x128xf32>
    %cst_84 = arith.constant dense<0.000000e+00> : vector<2x128xf32>
    %262 = tpu.matmul %259, %260, %cst_84 {dimension_numbers = #tpu.dot_dimension_numbers<[1], [0], [0], [1], [0, 0, 1, 1], [], []>} : vector<2x24xf32>, vector<24x128xf32>, vector<2x128xf32> -> vector<2x128xf32>
    %263 = tpu.iota {dimensions = array<i32: 0>} : vector<2x128xi32>
    %264 = tpu.iota {dimensions = array<i32: 1>} : vector<2x128xi32>
    %265 = arith.cmpi eq, %263, %264 : vector<2x128xi32>
    %cst_85 = arith.constant 0.000000e+00 : f32
    %266 = vector.broadcast %cst_85 : f32 to vector<2x128xf32>
    %267 = arith.select %265, %262, %266 : vector<2x128xi1>, vector<2x128xf32>
    %cst_86 = arith.constant dense<0.000000e+00> : vector<128xf32>
    %268 = vector.multi_reduction <add>, %267, %cst_86 [0] : vector<2x128xf32> to vector<128xf32>
    %269 = vector.shape_cast %268 : vector<128xf32> to vector<1x128xf32>
    %270 = tpu.iota {dimensions = array<i32: 0>} : vector<4x128xi32>
    %271 = tpu.iota {dimensions = array<i32: 1>} : vector<4x128xi32>
    %c2_i32_87 = arith.constant 2 : i32
    %272 = vector.broadcast %c2_i32_87 : i32 to vector<4x128xi32>
    %273 = arith.addi %272, %270 : vector<4x128xi32>
    %274 = arith.cmpi eq, %271, %273 : vector<4x128xi32>
    %cst_88 = arith.constant 0.000000e+00 : f32
    %275 = vector.broadcast %cst_88 : f32 to vector<4x128xf32>
    %276 = arith.select %274, %261, %275 : vector<4x128xi1>, vector<4x128xf32>
    %cst_89 = arith.constant dense<0.000000e+00> : vector<4xf32>
    %277 = vector.multi_reduction <add>, %276, %cst_89 [1] : vector<4x128xf32> to vector<4xf32>
    %278 = vector.shape_cast %277 : vector<4xf32> to vector<4x1xf32>
    %cst_90 = arith.constant 2.000000e+01 : f32
    %279 = vector.broadcast %cst_90 : f32 to vector<1x128xf32>
    %280 = arith.subf %269, %279 : vector<1x128xf32>
    %cst_91 = arith.constant 0.0833333358 : f32
    %281 = vector.broadcast %cst_91 : f32 to vector<1x128xf32>
    %282 = arith.mulf %280, %281 : vector<1x128xf32>
    %cst_92 = arith.constant 2.000000e+01 : f32
    %283 = vector.broadcast %cst_92 : f32 to vector<4x1xf32>
    %284 = arith.subf %278, %283 : vector<4x1xf32>
    %cst_93 = arith.constant 0.0833333358 : f32
    %285 = vector.broadcast %cst_93 : f32 to vector<4x1xf32>
    %286 = arith.mulf %284, %285 : vector<4x1xf32>
    %287 = vector.broadcast %282 : vector<1x128xf32> to vector<4x128xf32>
    %288 = vector.broadcast %286 : vector<4x1xf32> to vector<4x128xf32>
    %289 = arith.addf %287, %288 : vector<4x128xf32>
    %cst_94 = arith.constant -1.250000e-01 : f32
    %290 = vector.broadcast %cst_94 : f32 to vector<4x128xf32>
    %291 = arith.mulf %290, %261 : vector<4x128xf32>
    %292 = arith.addf %289, %291 : vector<4x128xf32>
    %c0_95 = arith.constant 0 : index
    %c0_96 = arith.constant 0 : index
    %c0_97 = arith.constant 0 : index
    %293 = vector.load %arg15[%c0_95, %c0_96, %c0_97] : memref<1x4x128xf32, #tpu.memory_space<vmem>>, vector<1x4x128xf32>
    %294 = vector.shape_cast %293 : vector<1x4x128xf32> to vector<4x128xf32>
    %295 = vector.shape_cast %292 : vector<4x128xf32> to vector<1x4x128xf32>
    tpu.vector_store %arg15[%c0_95, %c0_96, %c0_97], %295 {strides = array<i32>} : memref<1x4x128xf32, #tpu.memory_space<vmem>>, vector<1x4x128xf32>,
    return
  }
  func.func @transform_0(%arg0: i32) -> (i32, i32, i32, i32) {
    %c0_i32 = arith.constant 0 : i32
    %c0_i32_0 = arith.constant 0 : i32
    %c0_i32_1 = arith.constant 0 : i32
    %c0_i32_2 = arith.constant 0 : i32
    return %arg0, %c0_i32, %c0_i32_0, %c0_i32_1 : i32, i32, i32, i32
  }
  func.func @transform_1(%arg0: i32) -> (i32, i32) {
    %c0_i32 = arith.constant 0 : i32
    %c0_i32_0 = arith.constant 0 : i32
    %c0_i32_1 = arith.constant 0 : i32
    return %c0_i32, %c0_i32_0 : i32, i32
  }
  func.func @transform_2(%arg0: i32) -> (i32, i32) {
    %c0_i32 = arith.constant 0 : i32
    %c0_i32_0 = arith.constant 0 : i32
    %c0_i32_1 = arith.constant 0 : i32
    return %c0_i32, %c0_i32_0 : i32, i32
  }
  func.func @transform_3(%arg0: i32) -> (i32, i32) {
    %c0_i32 = arith.constant 0 : i32
    %c0_i32_0 = arith.constant 0 : i32
    %c0_i32_1 = arith.constant 0 : i32
    return %c0_i32, %c0_i32_0 : i32, i32
  }
  func.func @transform_4(%arg0: i32) -> (i32, i32) {
    %c0_i32 = arith.constant 0 : i32
    %c0_i32_0 = arith.constant 0 : i32
    %c0_i32_1 = arith.constant 0 : i32
    return %c0_i32, %c0_i32_0 : i32, i32
  }
  func.func @transform_5(%arg0: i32) -> (i32, i32) {
    %c0_i32 = arith.constant 0 : i32
    %c0_i32_0 = arith.constant 0 : i32
    %c0_i32_1 = arith.constant 0 : i32
    return %c0_i32, %c0_i32_0 : i32, i32
  }
  func.func @transform_6(%arg0: i32) -> (i32, i32) {
    %c0_i32 = arith.constant 0 : i32
    %c0_i32_0 = arith.constant 0 : i32
    %c0_i32_1 = arith.constant 0 : i32
    return %c0_i32, %c0_i32_0 : i32, i32
  }
  func.func @transform_7(%arg0: i32) -> (i32, i32) {
    %c0_i32 = arith.constant 0 : i32
    %c0_i32_0 = arith.constant 0 : i32
    %c0_i32_1 = arith.constant 0 : i32
    return %c0_i32, %c0_i32_0 : i32, i32
  }
  func.func @transform_8(%arg0: i32) -> (i32, i32) {
    %c0_i32 = arith.constant 0 : i32
    %c0_i32_0 = arith.constant 0 : i32
    %c0_i32_1 = arith.constant 0 : i32
    return %c0_i32, %c0_i32_0 : i32, i32
  }
  func.func @transform_9(%arg0: i32) -> (i32, i32) {
    %c0_i32 = arith.constant 0 : i32
    %c0_i32_0 = arith.constant 0 : i32
    %c0_i32_1 = arith.constant 0 : i32
    return %c0_i32, %c0_i32_0 : i32, i32
  }
  func.func @transform_10(%arg0: i32) -> (i32, i32) {
    %c0_i32 = arith.constant 0 : i32
    %c0_i32_0 = arith.constant 0 : i32
    %c0_i32_1 = arith.constant 0 : i32
    return %c0_i32, %c0_i32_0 : i32, i32
  }
  func.func @transform_11(%arg0: i32) -> (i32, i32) {
    %c0_i32 = arith.constant 0 : i32
    %c0_i32_0 = arith.constant 0 : i32
    %c0_i32_1 = arith.constant 0 : i32
    return %c0_i32, %c0_i32_0 : i32, i32
  }
  func.func @transform_12(%arg0: i32) -> (i32, i32) {
    %c0_i32 = arith.constant 0 : i32
    %c0_i32_0 = arith.constant 0 : i32
    %c0_i32_1 = arith.constant 0 : i32
    return %c0_i32, %c0_i32_0 : i32, i32
  }
  func.func @transform_13(%arg0: i32) -> (i32, i32) {
    %c0_i32 = arith.constant 0 : i32
    %c0_i32_0 = arith.constant 0 : i32
    %c0_i32_1 = arith.constant 0 : i32
    return %c0_i32, %c0_i32_0 : i32, i32
  }
  func.func @transform_14(%arg0: i32) -> (i32, i32, i32) {
    %c0_i32 = arith.constant 0 : i32
    %c0_i32_0 = arith.constant 0 : i32
    %c0_i32_1 = arith.constant 0 : i32
    return %arg0, %c0_i32, %c0_i32_0 : i32, i32, i32
  }
}

</mosaic_0001>

<bundles_post_ra>
// kernel: tpu_custom_call.1
= control target key start
LH: loop header
LB: loop body
LE: loop exit
PB: predicated region body
PF: predicated region fallthrough
CT: control target
= control target key end

     0   :  { %s10170_s0 = inlined_call_operand.hbm [shape: f32[2,6,16,32], index: 0, kind: input, shape index: {}]   ;;  %s10171_s1 = inlined_call_operand.hbm [shape: f32[32,96], index: 1, kind: input, shape index: {}]   ;;  %s10172_s2 = inlined_call_operand.vmem [shape: f32[1,96], index: 2, kind: input, shape index: {}]   ;;  %s10173_s3 = inlined_call_operand.hbm [shape: f32[32,32], index: 3, kind: input, shape index: {}]   ;;  %s10174_s4 = inlined_call_operand.hbm [shape: f32[1,32], index: 4, kind: input, shape index: {}]   ;;  %s10175_s5 = inlined_call_operand.hbm [shape: f32[1,32], index: 5, kind: input, shape index: {}]   ;;  %s10176_s6 = inlined_call_operand.hbm [shape: f32[1,32], index: 6, kind: input, shape index: {}]   ;;  %s10177_s7 = inlined_call_operand.vmem [shape: f32[4,32], index: 7, kind: input, shape index: {}]   ;;  %s10178_s8 = inlined_call_operand.hbm [shape: f32[32,64], index: 8, kind: input, shape index: {}]   ;;  %s10179_s9 = inlined_call_operand.hbm [shape: f32[1,64], index: 9, kind: input, shape index: {}]   ;;  %s10180_s10 = inlined_call_operand.vmem [shape: f32[32,32], index: 10, kind: input, shape index: {}]   ;;  %s10181_s11 = inlined_call_operand.vmem [shape: f32[1,32], index: 11, kind: input, shape index: {}]   ;;  %s10182_s12 = inlined_call_operand.vmem [shape: f32[1,32], index: 12, kind: input, shape index: {}]   ;;  %s10183_s13 = inlined_call_operand.vmem [shape: f32[1,32], index: 13, kind: input, shape index: {}]   ;;  %s10184_s14 = inlined_call_operand.hbm [shape: f32[2,4,128], index: 14, kind: output, shape index: {}]  }
   0x1   :  { %10200 = sst [smem:[#allocation23_spill]] %s10171_s1 }
   0x2   :  { %10201 = sst [smem:[#allocation24_spill]] %s10173_s3 }
   0x3   :  { %10202 = sst [smem:[#allocation25_spill]] %s10174_s4 }
   0x4   :  { %10203 = sst [smem:[#allocation26_spill]] %s10175_s5 }
   0x5   :  { %10204 = sst [smem:[#allocation27_spill]] %s10177_s7 }
   0x6   :  { %10205 = sst [smem:[#allocation28_spill]] %s10180_s10 }
   0x7   :  { %10206 = sst [smem:[#allocation29_spill]] %s10181_s11 }
   0x8   :  { %10207 = sst [smem:[#allocation30_spill]] %s10182_s12 }
   0x9   :  { %10208 = sst [smem:[#allocation31_spill]] %s10183_s13 }
   0xa   :  { %10209 = sst [smem:[#allocation32_spill]] %s10184_s14 }
   0xb   :  { %19 = vsyncpa [#allocation3], 0 }
   0xc   :  { %21 = vsyncpa [#allocation3 + $0x1], 0 }
   0xd   :  { %22 = vsyncpa [#allocation6], 0 }
   0xe   :  { %23 = vsyncpa [#allocation9], 0 }
   0xf   :  { %24 = vsyncpa [#allocation12], 0 }
  0x10   :  { %25 = vsyncpa [#allocation15], 0 }
  0x11   :  { %26 = vsyncpa [#allocation4], 0 }
  0x12   :  { %28 = vsyncpa [#allocation4 + $0x1], 0  ;;  %s8734_s29 = smov 0   ;;  %s8736_s30 = smov 0  }
  0x13   :  { %s8738_s15 = smov 0   ;;  %s8740_s16 = smov 0  }
  0x14 LB: > { %s8639_s17 = smov [#allocation5]   ;;  %s8755_s19 = sadd.s32 4294967295, %s8637_s16   ;;  %s8637_s16 = sphi %s8740_s16, %s10258_s16   ;;  %s8633_s15 = sphi %s8738_s15, %s10257_s15   ;;  %s8629_s30 = sphi %s8736_s30, %s10256_s30   ;;  %s8625_s29 = sphi %s8734_s29, %s10255_s29  }
  0x15   : > { %s376_s18 = sshll.u32 %s8639_s17, 4  ;;  %p6630_p0 = scmp.ge.s32.totalorder %s8637_s16, 1  ;;  %s8760_s18 = int_to_ptr.vmem [resolvable:$true] %s376_s18 }
  0x16   : > { %p10189_p1 = scmp.eq.s32.totalorder %s8755_s19, 0  ;;  %p364_p2 = scmp.lt.s32.totalorder %s8637_s16, 3 }
  0x17   : > { %s8640_s21 = smov [#allocation8]   ;;  %s8641_s24 = smov [#allocation11]  }
  0x18   : > { %p8762_p3 = pnand %p6630_p0, %p364_p2  ;;  %s406_s22 = sshll.u32 %s8640_s21, 4  ;;  %s8775_s22 = int_to_ptr.vmem [resolvable:$true] %s406_s22 }
  0x19   : > { %s428_s25 = sshll.u32 %s8641_s24, 4  ;;  %s10212_s1 = sld [smem:[#allocation23_spill]]  ;;  %s8777_s25 = int_to_ptr.vmem [resolvable:$true] %s428_s25 }
  0x1a   : > { %s10210_s20 = scalar_select %p8762_p3, 1, 0 }
  0x1b   : > { %p7843_p5 = pneg %p8762_p3 }
  0x1d   : > { %p8771_p6 = pnand %p7843_p5, %p10189_p1 }
  0x1f   : > { %s8329_s28 = scalar_lea.hbm %s10212_s1, 512  ;;  %p8787_p8 = pneg %p8771_p6 }
  0x20   : > { %p8330_p7 = scmp.ne.s32.totalorder %s10212_s1, %s8329_s28  ;;  %p8336_p11 = scmp.lt.u32.totalorder %s8329_s28, %s10212_s1 }
  0x22   : > { %p8332_p9 = pnand %p8787_p8, %p8330_p7 }
  0x24   : > { %p8333_p10 = pneg %p8332_p9 }
  0x26   : > { %p8338_p12 = pnand %p8336_p11, %p8333_p10 }
  0x28   : > { %8341 = shalt.err (!%p8338_p12)
}
  0x29   : > { %s8342_s14 = scalar_lea.vmem %s8760_s18, 512  ;;  %p8350_p5 = scmp.lt.s32.totalorder %s8760_s18, %s8760_s18 }
  0x2a   : > { %p8343_p13 = scmp.ne.s32.totalorder %s8760_s18, %s8342_s14  ;;  %p8351_p4 = scmp.lt.s32.totalorder %s8342_s14, %s8342_s14 }
  0x2c   : > { %p8345_p0 = pnand %p8343_p13, %p8787_p8  ;;  %p8352_p7 = por %p8351_p4, %p8350_p5 }
  0x2e   : > { %p8346_p2 = pneg %p8345_p0 }
  0x30   : > { %p8353_p9 = pnand %p8352_p7, %p8346_p2 }
  0x32   : > { %8356 = shalt.err (!%p8353_p9)
}
  0x33   : > { %s10187_s26 = smov 128   ;;  %s10191_s13 = smov 8  }
  0x34   : > { %7846 = dma.hbm_to_vmem [thread:$0]  (!%p8771_p6), %s10212_s1, 512, %s8760_s18, [#allocation6], %s10187_s26, %s10187_s26, %s10191_s13  }
  0x35   : > { %s10214_s4 = sld [smem:[#allocation25_spill]] }
  0x3b   : > { %s8357_s14 = scalar_lea.hbm %s10214_s4, 16 }
  0x3c   : > { %p8358_p4 = scmp.ne.s32.totalorder %s10214_s4, %s8357_s14  ;;  %p8364_p12 = scmp.lt.u32.totalorder %s8357_s14, %s10214_s4 }
  0x3e   : > { %p8360_p10 = pnand %p8358_p4, %p8787_p8 }
  0x40   : > { %p8361_p11 = pneg %p8360_p10 }
  0x42   : > { %p8366_p13 = pnand %p8364_p12, %p8361_p11 }
  0x44   : > { %8369 = shalt.err (!%p8366_p13)
}
  0x45   : > { %s8370_s18 = scalar_lea.vmem %s8775_s22, 16  ;;  %s8377_s11 = scalar_lea.vmem %s8775_s22, 32 }
  0x46   : > { %p8371_p0 = scmp.ne.s32.totalorder %s8775_s22, %s8370_s18  ;;  %p8378_p7 = scmp.lt.s32.totalorder %s8775_s22, %s8775_s22 }
  0x47   : > { %p8379_p9 = scmp.lt.s32.totalorder %s8377_s11, %s8370_s18 }
  0x48   : > { %p8373_p2 = pnand %p8371_p0, %p8787_p8 }
  0x49   : > { %p8380_p4 = por %p8379_p9, %p8378_p7 }
  0x4a   : > { %p8374_p5 = pneg %p8373_p2 }
  0x4c   : > { %p8381_p10 = pnand %p8380_p4, %p8374_p5 }
  0x4e   : > { %8384 = shalt.err (!%p8381_p10)
}
  0x4f   : > { %7852 = dma.hbm_to_vmem [thread:$0]  (!%p8771_p6), %s10214_s4, 16, %s8775_s22, [#allocation9]  }
  0x50   : > { %s8385_s28 = scalar_lea.hbm %s10176_s6, 16 }
  0x51   : > { %p8386_p11 = scmp.ne.s32.totalorder %s10176_s6, %s8385_s28  ;;  %p8392_p0 = scmp.lt.u32.totalorder %s8385_s28, %s10176_s6 }
  0x53   : > { %p8388_p12 = pnand %p8386_p11, %p8787_p8 }
  0x55   : > { %p8389_p13 = pneg %p8388_p12 }
  0x57   : > { %p8394_p2 = pnand %p8392_p0, %p8389_p13 }
  0x59   : > { %8397 = shalt.err (!%p8394_p2)
}
  0x5a   : > { %s8398_s22 = scalar_lea.vmem %s8777_s25, 16  ;;  %s8405_s11 = scalar_lea.vmem %s8777_s25, 32 }
  0x5b   : > { %p8399_p5 = scmp.ne.s32.totalorder %s8777_s25, %s8398_s22  ;;  %p8406_p4 = scmp.lt.s32.totalorder %s8777_s25, %s8777_s25 }
  0x5c   : > { %p8407_p10 = scmp.lt.s32.totalorder %s8405_s11, %s8398_s22 }
  0x5d   : > { %p8401_p7 = pnand %p8399_p5, %p8787_p8 }
  0x5e   : > { %p8408_p11 = por %p8407_p10, %p8406_p4 }
  0x5f   : > { %p8402_p9 = pneg %p8401_p7 }
  0x61   : > { %p8409_p12 = pnand %p8408_p11, %p8402_p9 }
  0x63   : > { %8412 = shalt.err (!%p8409_p12)
}
  0x64   : > { %7858 = dma.hbm_to_vmem [thread:$0]  (!%p8771_p6), %s10176_s6, 16, %s8777_s25, [#allocation12]  }
  0x65   : > { %s8644_s12 = smov [#allocation7]   ;;  %s8645_s28 = smov [#allocation10]  }
  0x66   : > { %s392_s27 = sshll.u32 %s8644_s12, 4  ;;  %s417_s17 = sshll.u32 %s8645_s28, 4  ;;  %s393_s27 = int_to_ptr.vmem [resolvable:$true] %s392_s27  ;;  %s418_s17 = int_to_ptr.vmem [resolvable:$true] %s417_s17 }
  0x67   : > { %s10215_s3 = sld [smem:[#allocation24_spill]] }
  0x6d   : > { %s8413_s18 = scalar_lea.hbm %s10215_s3, 512 }
  0x6e   : > { %p8414_p13 = scmp.ne.s32.totalorder %s10215_s3, %s8413_s18  ;;  %p8420_p5 = scmp.lt.u32.totalorder %s8413_s18, %s10215_s3 }
  0x70   : > { %p8416_p0 = pnand %p8414_p13, %p8787_p8 }
  0x72   : > { %p8417_p2 = pneg %p8416_p0 }
  0x74   : > { %p8422_p7 = pnand %p8420_p5, %p8417_p2 }
  0x76   : > { %8425 = shalt.err (!%p8422_p7)
}
  0x77   : > { %s8426_s25 = scalar_lea.vmem %s393_s27, 512  ;;  %p8434_p11 = scmp.lt.s32.totalorder %s393_s27, %s393_s27 }
  0x78   : > { %p8427_p9 = scmp.ne.s32.totalorder %s393_s27, %s8426_s25  ;;  %p8435_p12 = scmp.lt.s32.totalorder %s8426_s25, %s8426_s25 }
  0x7a   : > { %p8429_p4 = pnand %p8427_p9, %p8787_p8  ;;  %p8436_p1 = por %p8435_p12, %p8434_p11 }
  0x7c   : > { %p8430_p10 = pneg %p8429_p4 }
  0x7e   : > { %p8437_p3 = pnand %p8436_p1, %p8430_p10 }
  0x80   : > { %8440 = shalt.err (!%p8437_p3)
}
  0x81   : > { %s10216_s10 = smov 128   ;;  %s10217_s5 = sld [smem:[#allocation26_spill]] }
  0x82   : > { %7849 = dma.hbm_to_vmem [thread:$0]  (!%p8771_p6), %s10215_s3, 512, %s393_s27, [#allocation6], %s10216_s10, %s10216_s10, %s10191_s13  }
  0x87   : > { %s8441_s14 = scalar_lea.hbm %s10217_s5, 16 }
  0x88   : > { %p8442_p1 = scmp.ne.s32.totalorder %s10217_s5, %s8441_s14  ;;  %p8448_p0 = scmp.lt.u32.totalorder %s8441_s14, %s10217_s5 }
  0x8a   : > { %p8444_p3 = pnand %p8442_p1, %p8787_p8 }
  0x8c   : > { %p8445_p13 = pneg %p8444_p3 }
  0x8e   : > { %p8450_p2 = pnand %p8448_p0, %p8445_p13 }
  0x90   : > { %8453 = shalt.err (!%p8450_p2)
}
  0x91   : > { %s8454_s25 = scalar_lea.vmem %s418_s17, 16  ;;  %s8461_s27 = scalar_lea.vmem %s418_s17, 32 }
  0x92   : > { %p8455_p5 = scmp.ne.s32.totalorder %s418_s17, %s8454_s25  ;;  %p8462_p4 = scmp.lt.s32.totalorder %s418_s17, %s418_s17 }
  0x93   : > { %p8463_p10 = scmp.lt.s32.totalorder %s8461_s27, %s8454_s25 }
  0x94   : > { %p8457_p7 = pnand %p8455_p5, %p8787_p8 }
  0x95   : > { %p8464_p11 = por %p8463_p10, %p8462_p4 }
  0x96   : > { %p8458_p9 = pneg %p8457_p7 }
  0x98   : > { %p8465_p12 = pnand %p8464_p11, %p8458_p9 }
  0x9a   : > { %8468 = shalt.err (!%p8465_p12)
}
  0x9b   : > { %7855 = dma.hbm_to_vmem [thread:$0]  (!%p8771_p6), %s10217_s5, 16, %s418_s17, [#allocation9]  }
  0x9c   : > { %s8646_s28 = smov [#allocation13]   ;;  %s8647_s14 = smov [#allocation14]  }
  0x9d   : > { %s441_s24 = sshll.u32 %s8646_s28, 4  ;;  %s455_s18 = sshll.u32 %s8647_s14, 4  ;;  %s442_s24 = int_to_ptr.vmem [resolvable:$true] %s441_s24  ;;  %s456_s18 = int_to_ptr.vmem [resolvable:$true] %s455_s18 }
  0x9e   : > { %s8469_s7 = scalar_lea.hbm %s10178_s8, 512 }
  0x9f   : > { %p8470_p1 = scmp.ne.s32.totalorder %s10178_s8, %s8469_s7  ;;  %p8476_p0 = scmp.lt.u32.totalorder %s8469_s7, %s10178_s8 }
  0xa1   : > { %p8472_p3 = pnand %p8470_p1, %p8787_p8 }
  0xa3   : > { %p8473_p13 = pneg %p8472_p3 }
  0xa5   : > { %p8478_p2 = pnand %p8476_p0, %p8473_p13 }
  0xa7   : > { %8481 = shalt.err (!%p8478_p2)
}
  0xa8   : > { %s8482_s17 = scalar_lea.vmem %s442_s24, 512  ;;  %p8490_p4 = scmp.lt.s32.totalorder %s442_s24, %s442_s24 }
  0xa9   : > { %p8483_p5 = scmp.ne.s32.totalorder %s442_s24, %s8482_s17  ;;  %p8491_p10 = scmp.lt.s32.totalorder %s8482_s17, %s8482_s17 }
  0xab   : > { %p8485_p7 = pnand %p8483_p5, %p8787_p8  ;;  %p8492_p11 = por %p8491_p10, %p8490_p4 }
  0xad   : > { %p8486_p9 = pneg %p8485_p7 }
  0xaf   : > { %p8493_p12 = pnand %p8492_p11, %p8486_p9 }
  0xb1   : > { %8496 = shalt.err (!%p8493_p12)
}
  0xb2   : > { %s10218_s12 = smov 8   ;;  %s8497_s11 = scalar_lea.hbm %s10179_s9, 16 }
  0xb3   : > { %7861 = dma.hbm_to_vmem [thread:$0]  (!%p8771_p6), %s10178_s8, 512, %s442_s24, [#allocation12], %s10216_s10, %s10216_s10, %s10218_s12  }
  0xb4   : > { %p8498_p1 = scmp.ne.s32.totalorder %s10179_s9, %s8497_s11  ;;  %p8504_p0 = scmp.lt.u32.totalorder %s8497_s11, %s10179_s9 }
  0xb6   : > { %p8500_p3 = pnand %p8498_p1, %p8787_p8 }
  0xb8   : > { %p8501_p13 = pneg %p8500_p3 }
  0xba   : > { %p8506_p2 = pnand %p8504_p0, %p8501_p13 }
  0xbc   : > { %8509 = shalt.err (!%p8506_p2)
}
  0xbd   : > { %s8510_s17 = scalar_lea.vmem %s456_s18, 16  ;;  %s8517_s24 = scalar_lea.vmem %s456_s18, 32 }
  0xbe   : > { %p8511_p5 = scmp.ne.s32.totalorder %s456_s18, %s8510_s17  ;;  %p8518_p4 = scmp.lt.s32.totalorder %s456_s18, %s456_s18 }
  0xbf   : > { %p8519_p10 = scmp.lt.s32.totalorder %s8517_s24, %s8510_s17 }
  0xc0   : > { %p8513_p7 = pnand %p8511_p5, %p8787_p8 }
  0xc1   : > { %p8520_p11 = por %p8519_p10, %p8518_p4 }
  0xc2   : > { %p8514_p9 = pneg %p8513_p7 }
  0xc4   : > { %p8521_p12 = pnand %p8520_p11, %p8514_p9 }
  0xc6   : > { %8524 = shalt.err (!%p8521_p12)
}
  0xc7   : > { %7864 = dma.hbm_to_vmem [thread:$0]  (!%p8771_p6), %s10179_s9, 16, %s456_s18, [#allocation15]  }
  0xc8   : > { %s6629_s21 = sadd.s32 4294967294, %s8637_s16   ;;  %s8939_s23 = sadd.s32 1, %s8637_s16  }
  0xc9   : > { %s41_s14 = sadd.s32 1, %s8633_s15  ;;  %s38_s22 = ssub.s32 %s8637_s16, %s8939_s23 }
  0xca   : > { %p48_p8 = scmp.ne.s32.totalorder %s8633_s15, %s8629_s30  ;;  %p39_p1 = scmp.eq.s32.totalorder %s38_s22, 0 }
  0xcb   : > { %p49_p3 = scmp.eq.s32.totalorder %s8637_s16, 0  ;;  %p54_p13 = scmp.ne.s32.totalorder %s8629_s30, %s8625_s29 }
  0xcc   : > { %p351_p0 = scmp.eq.s32.totalorder %s8755_s19, 1  ;;  %p10219_p5 = scmp.eq.s32.totalorder %s8755_s19, 0 }
  0xcd   : > { %s8951_s11 = scalar_select %p39_p1, %s8633_s15, %s41_s14  }
  0xce   : > { %p50_p2 = por %p49_p3, %p48_p8  ;;  %p8955_p7 = por %p10219_p5, %p54_p13 }
  0xcf   : > { %p8959_p6 = por %p351_p0, %p48_p8  ;;  %p357_p9 = scmp.eq.s32.totalorder %s6629_s21, 1 }
  0xd0   : > { %p7880_p4 = scmp.lt.s32.totalorder %s8637_s16, 2  ;;  %s478_s25 = sand.u32 1, %s8633_s15  }
  0xd1   : > { %s10221_s18 = scalar_select %p8959_p6, 1, 0 }
  0xd2   : > { %p8965_p10 = por %p357_p9, %p54_p13  ;;  %s7808_s26 = smul.u32 96, %s478_s25 }
  0xd3   : > { %p8969_p11 = pnand %p7880_p4, %p50_p2  ;;  %s7809_s24 = smul.u32 1536, %s8637_s16 }
  0xd4   : > { %s10222_s27 = scalar_select %p8965_p10, 1, 0 }
  0xd5   : > { %s8977_s14 = scalar_lea.hbm %s10170_s0, %s7809_s24  ;;  %s482_s21 = scalar_lea.vmem [#allocation2], %s7808_s26 }
  0xd6   : > { %s489_s22 = sshll.u32 %s482_s21, 4  ;;  %s8981_s1 = scalar_lea.sflag [#allocation3], %s478_s25  ;;  %s8979_s22 = int_to_ptr.vmem [resolvable:$true] %s489_s22 }
  0xd7   : > { %s8525_s3 = scalar_lea.hbm %s8977_s14, 1536  ;;  %p8527_p8 = pneg %p8969_p11 }
  0xd8   : > { %p8526_p12 = scmp.ne.s32.totalorder %s8977_s14, %s8525_s3  ;;  %s8530_s28 = scalar_lea.hbm %s10170_s0, 3072 }
  0xd9   : > { %p8531_p13 = scmp.lt.u32.totalorder %s8977_s14, %s10170_s0  ;;  %p8532_p0 = scmp.lt.u32.totalorder %s8530_s28, %s8525_s3 }
  0xda   : > { %p8528_p1 = pnand %p8527_p8, %p8526_p12  ;;  %p8534_p5 = scmp.lt.u32.totalorder %s8525_s3, %s8977_s14 }
  0xdb   : > { %p8533_p2 = por %p8532_p0, %p8531_p13 }
  0xdc   : > { %p8529_p3 = pneg %p8528_p1 }
  0xdd   : > { %p8535_p9 = por %p8534_p5, %p8533_p2 }
  0xdf   : > { %p8536_p4 = pnand %p8535_p9, %p8529_p3 }
  0xe1   : > { %8539 = shalt.err (!%p8536_p4)
}
  0xe2   : > { %s8540_s25 = scalar_lea.vmem %s8979_s22, 1536  ;;  %s8648_s26 = smov [#allocation2]  }
  0xe3   : > { %p8541_p12 = scmp.ne.s32.totalorder %s8979_s22, %s8540_s25  ;;  %s8545_s21 = sshll.u32 %s8648_s26, 4  ;;  %s8546_s21 = int_to_ptr.vmem [resolvable:$false] %s8545_s21 }
  0xe4   : > { %s8547_s4 = scalar_lea.vmem %s8546_s21, 3072  ;;  %p8548_p6 = scmp.lt.s32.totalorder %s8979_s22, %s8546_s21 }
  0xe5   : > { %p8543_p1 = pnand %p8541_p12, %p8527_p8  ;;  %p8549_p13 = scmp.lt.s32.totalorder %s8547_s4, %s8540_s25 }
  0xe7   : > { %p8544_p10 = pneg %p8543_p1  ;;  %p8550_p0 = por %p8549_p13, %p8548_p6 }
  0xe9   : > { %p8551_p2 = pnand %p8550_p0, %p8544_p10 }
  0xeb   : > { %8554 = shalt.err (!%p8551_p2)
}
  0xec   : > { %7868 = dma.hbm_to_vmem [thread:$0]  (!%p8969_p11), %s8977_s14, 1536, %s8979_s22, %s8981_s1, %s10216_s10, %s10216_s10, %s10218_s12  }
  0xed   : > { %p10224_p8 = scmp.ne.s32.totalorder %s10210_s20, 0 }
  0xee   : > { %s9015_s3 = sand.u32 (!%p10224_p8), 1, %s8629_s30  }
  0xef   : > { %501 = sbr.rel (%p10224_p8) target bundleno = 6004 (0x1774), region = 76  ;;  %s504_s24 = scalar_lea.sflag (!%p10224_p8), [#allocation3], %s9015_s3 }
  0xf0   : > { %s7810_s5 = smul.u32 (!%p10224_p8), 96, %s9015_s3 }
  0xf2   : > { %s9019_s13 = scalar_lea.vmem (!%p10224_p8), [#allocation2], %s7810_s5 }
  0xf6   : > { %8600 = dma.done.wait (%p8955_p7), %s504_s24, 1536  }
  0xf7   : > { %8602 = vsyncadd (%p8955_p7), %s504_s24, 4294965760  ;;  %p10225_p6 = scmp.eq.s32.totalorder %s8755_s19, 0 }
  0xf9   : > { %8604 = dma.done.wait (%p10225_p6), [#allocation6], 1024   ;;  %p10226_p10 = pmov %p10225_p6 }
  0xfa   : > { %p10227_p11 = pmov %p10225_p6 }
  0xfb   : > { %8606 = vsyncadd (%p10226_p10), [#allocation6], 4294966272 }
  0xfc   : > { %8608 = dma.done.wait (%p10227_p11), [#allocation9], 32   ;;  %p10228_p3 = pmov %p10225_p6 }
  0xfe   : > { %8610 = vsyncadd (%p10228_p3), [#allocation9], 4294967264  ;;  %p10229_p5 = pmov %p10228_p3 }
  0xff   : > { %p10230_p9 = pmov %p10228_p3 }
 0x100   : > { %8612 = dma.done.wait (%p10229_p5), [#allocation12], 528  }
 0x101   : > { %8614 = vsyncadd (%p10230_p9), [#allocation12], 4294966768  ;;  %p10231_p7 = pmov %p10228_p3 }
 0x102   : > { %p10232_p4 = pmov %p10228_p3 }
 0x103   : > { %8616 = dma.done.wait (%p10231_p7), [#allocation15], 16  }
 0x104   : > { %8618 = vsyncadd (%p10232_p4), [#allocation15], 4294967280  ;;  %vm603_vm0 = vcmask 261120   ;;  %v592_v0 = vld [vmem:[#allocation5] sm:$0xff]  ;;  %v593_v1 = vld [vmem:[#allocation5 + $0x8] sm:$0xff]  ;;  %vm783_vm1 = vcmask 130048  }
 0x105   : > { %v594_v2 = vld [vmem:[#allocation5 + $0x10] sm:$0xff]  ;;  %v7561_v3 = vpack.c.bf16 %v593_v1, %v592_v0  ;;  %v595_v4 = vld [vmem:[#allocation5 + $0x18] sm:$0xff]  ;;  %v580_v5 = vld [vmem:[%s9019_s13] sm:$0xff]  ;;  %s8649_s10 = smov 96   ;;  %s8650_s12 = smov 64   ;;  %vm10195_vm3 = vmmov 0  }
 0x106   : > { %v7565_v6 = vpack.c.bf16 %v595_v4, %v594_v2  ;;  %7090 = vmatprep.mubr.msk.f32.mxu0 %vm603_vm0, %v580_v5  ;;  %v581_v7 = vld [vmem:[%s9019_s13 + $0x8] sm:$0xff]  ;;  %v582_v8 = vld [vmem:[%s9019_s13 + $0x10] sm:$0xff]  ;;  %v583_v9 = vld [vmem:[%s9019_s13 + $0x18] sm:$0xff]  ;;  %s8651_s7 = smov 80   ;;  %s8652_s17 = smov 112   ;;  %vm4238_vm4 = vcmask 125952  }
 0x107   : > { %7562 = vmatprep.subr.bf16.mxu0 %v7561_v3  ;;  %v584_v10 = vld [vmem:[%s9019_s13 + $0x20] sm:$0xff]  ;;  %v585_v11 = vld [vmem:[%s9019_s13 + $0x28] sm:$0xff]  ;;  %v586_v12 = vld [vmem:[%s9019_s13 + $0x30] sm:$0xff]  ;;  %s8653_s14 = smov 48   ;;  %s8654_s22 = smov 16   ;;  %vm10197_vm7 = vcmask 195584  }
 0x108   : > { %7564 = vmatpush3.bf16.msra.mxu0 %v7561_v3  ;;  %v587_v13 = vld [vmem:[%s9019_s13 + $0x38] sm:$0xff]  ;;  %v588_v14 = vld [vmem:[%s9019_s13 + $0x40] sm:$0xff]  ;;  %v589_v15 = vld [vmem:[%s9019_s13 + $0x48] sm:$0xff]  ;;  %s10235_s26 = sld [smem:[#allocation27_spill]]  ;;  %s10236_s5 = sld [smem:[#allocation28_spill]] }
 0x109   : > { %7566 = vmatprep.subr.bf16.mxu0 %v7565_v6  ;;  %v590_v16 = vld [vmem:[%s9019_s13 + $0x50] sm:$0xff]  ;;  %v591_v17 = vld [vmem:[%s9019_s13 + $0x58] sm:$0xff]  ;;  %v6649_v18 = vld [vmem:[%s10172_s2] ss:$0 sm:$0xff]  ;;  %s10238_s25 = sld [smem:[#allocation30_spill]]  ;;  %s10239_s4 = sld [smem:[#allocation31_spill]] }
 0x10a   : > { %vm9111_vm2 = vmpackc.low %vm783_vm1, %vm783_vm1  ;;  %s6648_s24 = sshll.u32 %s9015_s3, 2  ;;  %s6836_s13 = sshll.u32 %s8755_s19, 6 }
 0x10b   : > { %vm7797_vm5 = vmpackc.low %vm603_vm0, %vm603_vm0  ;;  %s579_s1 = scalar_lea.vmem [#allocation16], %s6648_s24  ;;  %p10252_p1 = scmp.ne.s32.totalorder %s10221_s18, 0 }
 0x10c   : > { %7568 = vmatpush3.bf16.msra.mxu0 %v7565_v6  ;;  %s6492_s20 = sshll.u32 %s579_s1, 4  ;;  %s8658_s19 = smov [#allocation16]   ;;  %s10128_s20 = int_to_ptr.vmem [resolvable:$true] %s6492_s20 }
 0x10d   : > { %s8559_s28 = sshll.u32 %s8658_s19, 4  ;;  %s8560_s28 = int_to_ptr.vmem [resolvable:$false] %s8559_s28 }
 0x10e   : > { %p8562_p2 = scmp.lt.s32.totalorder %s10128_s20, %s8560_s28 }
 0x10f   : > { %7091 = vmatmul.mubr.msk.f32.vlgmr.msra.gmra.mrb[0].mxu0 %vm603_vm0, %v581_v7 }
 0x110   : > { %7093 = vmatprep.mubr.msk.f32.mxu0 %vm603_vm0, %v582_v8 }
 0x113   : > { %7094 = vmatmul.mubr.msk.f32.gmra.mrb[2].mxu0 %vm603_vm0, %v583_v9 }
 0x114   : > { %7096 = vmatprep.mubr.msk.f32.mxu0 %vm603_vm0, %v584_v10 }
 0x117   : > { %7097 = vmatmul.mubr.msk.f32.gmra.mrb[4].mxu0 %vm603_vm0, %v585_v11 }
 0x118   : > { %7099 = vmatprep.mubr.msk.f32.mxu0 %vm603_vm0, %v586_v12 }
 0x11b   : > { %7100 = vmatmul.mubr.msk.f32.gmra.mrb[6].mxu0 %vm603_vm0, %v587_v13 }
 0x11c   : > { %7102 = vmatprep.mubr.msk.f32.mxu0 %vm603_vm0, %v588_v14 }
 0x11f   : > { %7103 = vmatmul.mubr.msk.f32.gmra.mrb[8].mxu0 %vm603_vm0, %v589_v15 }
 0x120   : > { %7105 = vmatprep.mubr.msk.f32.mxu0 %vm603_vm0, %v590_v16 }
 0x123   : > { %7106 = vmatmul.mubr.msk.f32.gmra.mrb[10].mxu0 %vm603_vm0, %v591_v17 }
 0x1e2   : > { %v7092_v19 = vpop.f32.mrb[0].mxu0 }
 0x1e3   : > { %v712_v20 = vadd.f32 %v7092_v19, %v6649_v18  ;;  %v706_v21 = vpop.f32.mrb[1].mxu0 }
 0x1e4   : > { %v707_v22 = vadd.f32 %v6649_v18, %v706_v21 }
 0x1e5   : > { %v9121_v63 = vmul.f32 0.25, %v712_v20 }
 0x1e6   : > { %v7095_v23 = vpop.f32.mrb[2].mxu0  ;;  %v9068_v24 = vpack.i.bf16 %v712_v20, %v707_v22  ;;  %v9070_v25 = vmul.f32 0.25, %v707_v22 }
 0x1e7   : > { %v9072_v26 = vadd.f32 %v7095_v23, %v6649_v18  ;;  %v716_v27 = vpop.f32.mrb[3].mxu0 }
 0x1e8   : > { %v717_v28 = vadd.f32 %v6649_v18, %v716_v27  ;;  %7940 = vrot.lane.b32.xlu0 %v9068_v24, %s8649_s10  ;;  %7112 = vmatprep.mubr.msk.f32.mxu1 %vm783_vm1, %v9070_v25 }
 0x1e9   : > { %v9138_v9 = vmul.f32 0.25, %v9072_v26 }
 0x1ea   : > { %v7098_v29 = vpop.f32.mrb[4].mxu0  ;;  %v9079_v30 = vpack.i.bf16 %v9072_v26, %v717_v28  ;;  %v9123_v1 = vmul.f32 0.25, %v717_v28 }
 0x1eb   : > { %v9081_v31 = vadd.f32 %v7098_v29, %v6649_v18  ;;  %v726_v32 = vpop.f32.mrb[5].mxu0 }
 0x1ec   : > { %v727_v33 = vadd.f32 %v6649_v18, %v726_v32  ;;  %7945 = vrot.lane.b32.xlu0 %v9079_v30, %s8649_s10 }
 0x1ee   : > { %v7101_v34 = vpop.f32.mrb[6].mxu0  ;;  %v9086_v35 = vpack.i.bf16 %v9081_v31, %v727_v33  ;;  %v9140_v11 = vmul.f32 0.25, %v727_v33 }
 0x1ef   : > { %v742_v36 = vadd.f32 %v7101_v34, %v6649_v18  ;;  %v736_v37 = vpop.f32.mrb[7].mxu0 }
 0x1f0   : > { %v737_v38 = vadd.f32 %v6649_v18, %v736_v37  ;;  %7950 = vrot.lane.b32.xlu1 %v9086_v35, %s8649_s10 }
 0x1f1   : > { %v9148_v15 = vmul.f32 0.25, %v742_v36 }
 0x1f2   : > { %v7104_v39 = vpop.f32.mrb[8].mxu0  ;;  %v9090_v40 = vmul.f32 0.25, %v737_v38  ;;  %v9092_v41 = vpack.i.bf16 %v742_v36, %v737_v38 }
 0x1f3   : > { %v9094_v42 = vadd.f32 %v7104_v39, %v6649_v18  ;;  %v746_v43 = vpop.f32.mrb[9].mxu0 }
 0x1f4   : > { %v747_v44 = vadd.f32 %v6649_v18, %v746_v43  ;;  %7133 = vmatprep.mubr.msk.f32.mxu0 %vm783_vm1, %v9090_v40  ;;  %7955 = vrot.lane.b32.xlu1 %v9092_v41, %s8649_s10 }
 0x1f5   : > { %v9178_v21 = vmul.f32 0.25, %v9094_v42 }
 0x1f6   : > { %v7107_v45 = vpop.f32.mrb[10].mxu0  ;;  %v9101_v46 = vpack.i.bf16 %v9094_v42, %v747_v44  ;;  %v9165_v19 = vmul.f32 0.25, %v747_v44 }
 0x1f7   : > { %v762_v47 = vadd.f32 %v7107_v45, %v6649_v18  ;;  %v756_v48 = vpop.f32.mrb[11].mxu0 }
 0x1f8   : > { %v757_v49 = vadd.f32 %v6649_v18, %v756_v48  ;;  %7960 = vrot.lane.b32.xlu0 %v9101_v46, %s8649_s10  ;;  %v9163_v18 = vmul.f32 0.25, %v9081_v31 }
 0x1f9   : > { %v9173_v20 = vmul.f32 0.25, %v762_v47 }
 0x1fa   : > { %v9105_v50 = vpack.i.bf16 %v762_v47, %v757_v49  ;;  %v9152_v17 = vmul.f32 0.25, %v757_v49 }
 0x1fc   : > { %7965 = vrot.lane.b32.xlu1 %v9105_v50, %s8649_s10 }
 0x25a   : > { %v7941_v51 = vpop.permute.xlu0 %7940 }
 0x25b   : > { %v7943_v52 = vunpack.i.h.bf16 %v7941_v51  ;;  %v7942_v53 = vunpack.i.l.bf16 %v7941_v51 }
 0x25d   : > { %v7569_v55 = vpack.c.bf16 %v7943_v52, %v7942_v53 }
 0x25e   : > { %v7946_v56 = vpop.permute.xlu0 %7945 }
 0x25f   : > { %v7948_v57 = vunpack.i.h.bf16 %v7946_v56  ;;  %v7947_v58 = vunpack.i.l.bf16 %v7946_v56  ;;  %7571 = vmatprep.subr.msk.bf16.mxu1 %vm9111_vm2, %v7569_v55 }
 0x260   : > { %7574 = vmatpush3.bf16.xpose.msk.msra.mxu1 %vm9111_vm2, %v7569_v55 }
 0x261   : > { %v7575_v59 = vpack.c.bf16 %v7948_v57, %v7947_v58 }
 0x262   : > { %v7951_v60 = vpop.permute.xlu1 %7950 }
 0x263   : > { %v7953_v61 = vunpack.i.h.bf16 %v7951_v60  ;;  %v7952_v62 = vunpack.i.l.bf16 %v7951_v60  ;;  %7577 = vmatprep.subr.msk.bf16.mxu1 %vm9111_vm2, %v7575_v59 }
 0x265   : > { %v7581_v2 = vpack.c.bf16 %v7953_v61, %v7952_v62 }
 0x266   : > { %v7956_v0 = vpop.permute.xlu1 %7955 }
 0x267   : > { %v7958_v3 = vunpack.i.h.bf16 %v7956_v0  ;;  %v7957_v4 = vunpack.i.l.bf16 %v7956_v0  ;;  %7113 = vmatmul.mubr.msk.f32.vlgmr.msra.gmra.mrb[0].mxu1 %vm783_vm1, %v9121_v63 }
 0x268   : > { %7580 = vmatpush3.bf16.xpose.msk.msra.mxu1 %vm9111_vm2, %v7575_v59  ;;  %7119 = vmatprep.mubr.msk.f32.mxu1 %vm783_vm1, %v9123_v1 }
 0x269   : > { %v7587_v5 = vpack.c.bf16 %v7958_v3, %v7957_v4  ;;  %7583 = vmatprep.subr.msk.bf16.mxu1 %vm9111_vm2, %v7581_v2 }
 0x26a   : > { %v7961_v6 = vpop.permute.xlu0 %7960 }
 0x26b   : > { %v7963_v7 = vunpack.i.h.bf16 %v7961_v6  ;;  %v7962_v8 = vunpack.i.l.bf16 %v7961_v6  ;;  %7589 = vmatprep.subr.msk.bf16.mxu0 %vm9111_vm2, %v7587_v5 }
 0x26c   : > { %7592 = vmatpush3.bf16.xpose.msk.msra.mxu0 %vm9111_vm2, %v7587_v5 }
 0x26d   : > { %v7593_v12 = vpack.c.bf16 %v7963_v7, %v7962_v8 }
 0x26e   : > { %v7966_v10 = vpop.permute.xlu1 %7965 }
 0x26f   : > { %v7968_v13 = vunpack.i.h.bf16 %v7966_v10  ;;  %v7967_v14 = vunpack.i.l.bf16 %v7966_v10  ;;  %7120 = vmatmul.mubr.msk.f32.vlgmr.msra.gmra.mrb[2].mxu1 %vm783_vm1, %v9138_v9 }
 0x270   : > { %7586 = vmatpush3.bf16.xpose.msk.msra.mxu1 %vm9111_vm2, %v7581_v2  ;;  %7126 = vmatprep.mubr.msk.f32.mxu1 %vm783_vm1, %v9140_v11 }
 0x271   : > { %v7599_v16 = vpack.c.bf16 %v7968_v13, %v7967_v14  ;;  %7595 = vmatprep.subr.msk.bf16.mxu1 %vm9111_vm2, %v7593_v12 }
 0x273   : > { %7134 = vmatmul.mubr.msk.f32.vlgmr.msra.gmra.mrb[12].mxu0 %vm783_vm1, %v9148_v15  ;;  %7601 = vmatprep.subr.msk.bf16.mxu0 %vm9111_vm2, %v7599_v16 }
 0x274   : > { %7604 = vmatpush3.bf16.xpose.msk.msra.mxu0 %vm9111_vm2, %v7599_v16  ;;  %7147 = vmatprep.mubr.msk.f32.mxu0 %vm783_vm1, %v9152_v17 }
 0x277   : > { %7127 = vmatmul.mubr.msk.f32.vlgmr.msra.gmra.mrb[4].mxu1 %vm783_vm1, %v9163_v18 }
 0x278   : > { %7598 = vmatpush3.bf16.xpose.msk.msra.mxu1 %vm9111_vm2, %v7593_v12  ;;  %7140 = vmatprep.mubr.msk.f32.mxu1 %vm783_vm1, %v9165_v19 }
 0x27b   : > { %7148 = vmatmul.mubr.msk.f32.vlgmr.msra.gmra.mrb[14].mxu0 %vm783_vm1, %v9173_v20 }
 0x27f   : > { %7141 = vmatmul.mubr.msk.f32.vlgmr.msra.gmra.mrb[6].mxu1 %vm783_vm1, %v9178_v21 }
 0x33a   : > { %v7114_v22 = vpop.f32.mrb[0].mxu1 }
 0x33b   : > { %v860_v23 = vpop.f32.mrb[1].mxu1  ;;  %v1327_v26 = vsel %vm783_vm1, %v7114_v22, -inf }
 0x33c   : > { %1328 = vmax.xlane.f32.xlu1 %v1327_v26  ;;  %v1324_v27 = vsel %vm783_vm1, %v860_v23, -inf }
 0x33d   : > { %1325 = vmax.xlane.f32.xlu0 %v1324_v27 }
 0x342   : > { %v7121_v28 = vpop.f32.mrb[2].mxu1 }
 0x343   : > { %v951_v29 = vpop.f32.mrb[3].mxu1  ;;  %v1333_v31 = vsel %vm783_vm1, %v7121_v28, -inf }
 0x344   : > { %1334 = vmax.xlane.f32.xlu1 %v1333_v31  ;;  %v1330_v32 = vsel %vm783_vm1, %v951_v29, -inf }
 0x345   : > { %1331 = vmax.xlane.f32.xlu0 %v1330_v32 }
 0x346   : > { %v9186_v33 = vpop.f32.mrb[12].mxu0 }
 0x347   : > { %v1133_v34 = vpop.f32.mrb[13].mxu0  ;;  %v1345_v49 = vsel %vm783_vm1, %v9186_v33, -inf }
 0x348   : > { %v1342_v36 = vsel %vm783_vm1, %v1133_v34, -inf }
 0x349   : > { %1343 = vmax.xlane.f32.xlu1 %v1342_v36 }
 0x34a   : > { %v9189_v37 = vpop.f32.mrb[4].mxu1 }
 0x34b   : > { %v9191_v38 = vpop.f32.mrb[5].mxu1  ;;  %v1339_v39 = vsel %vm783_vm1, %v9189_v37, -inf }
 0x34c   : > { %1340 = vmax.xlane.f32.xlu0 %v1339_v39  ;;  %v1336_v44 = vsel %vm783_vm1, %v9191_v38, -inf }
 0x34e   : > { %v9195_v42 = vpop.f32.mrb[14].mxu0 }
 0x34f   : > { %v1315_v43 = vpop.f32.mrb[15].mxu0  ;;  %v1357_v52 = vsel %vm783_vm1, %v9195_v42, -inf }
 0x350   : > { %1337 = vmax.xlane.f32.xlu0 %v1336_v44  ;;  %v1354_v45 = vsel %vm783_vm1, %v1315_v43, -inf }
 0x351   : > { %1355 = vmax.xlane.f32.xlu1 %v1354_v45 }
 0x352   : > { %v9200_v47 = vpop.f32.mrb[6].mxu1 }
 0x353   : > { %v9202_v48 = vpop.f32.mrb[7].mxu1  ;;  %v1351_v51 = vsel %vm783_vm1, %v9200_v47, -inf }
 0x354   : > { %1346 = vmax.xlane.f32.xlu0 %v1345_v49  ;;  %v1348_v53 = vsel %vm783_vm1, %v9202_v48, -inf }
 0x358   : > { %1352 = vmax.xlane.f32.xlu0 %v1351_v51 }
 0x35c   : > { %1358 = vmax.xlane.f32.xlu0 %v1357_v52 }
 0x362   : > { %7970 = vrot.lane.b32.xlu1 %v9068_v24, %s8650_s12 }
 0x366   : > { %7980 = vrot.lane.b32.xlu1 %v9086_v35, %s8650_s12 }
 0x36a   : > { %7985 = vrot.lane.b32.xlu1 %v9092_v41, %s8650_s12 }
 0x36e   : > { %7995 = vrot.lane.b32.xlu1 %v9105_v50, %s8650_s12 }
 0x372   : > { %8005 = vrot.lane.b32.xlu1 %v9079_v30, %s8651_s7  ;;  %7975 = vrot.lane.b32.xlu0 %v9079_v30, %s8650_s12 }
 0x376   : > { %7990 = vrot.lane.b32.xlu0 %v9101_v46, %s8650_s12 }
 0x37a   : > { %8000 = vrot.lane.b32.xlu0 %v9068_v24, %s8651_s7 }
 0x37e   : > { %8010 = vrot.lane.b32.xlu0 %v9086_v35, %s8651_s7 }
 0x396   : > { %1349 = vmax.xlane.f32.xlu1 %v1348_v53 }
 0x3a7   : > { %1978 = vrot.lane.b32.xlu1 %v9070_v25, %s8652_s17 }
 0x3c9   : > { %v1329_v55 = vpop.xlane.xlu1 %1328 }
 0x3ca   : > { %v1361_v56 = vsub.f32 %v7114_v22, %v1329_v55  ;;  %v1326_v57 = vpop.xlane.xlu0 %1325 }
 0x3cb   : > { %v1360_v58 = vsub.f32 %v860_v23, %v1326_v57 }
 0x3cc   : > { %v1374_v59 = vmul.f32 1.442695, %v1361_v56 }
 0x3cd   : > { %v1372_v60 = vmul.f32 1.442695, %v1360_v58 }
 0x3ce   : > { %8149 = vpow2.f32 %v1374_v59 }
 0x3cf   : > { %8151 = vpow2.f32 %v1372_v60 }
 0x3d1   : > { %v1335_v61 = vpop.xlane.xlu1 %1334 }
 0x3d2   : > { %v1363_v62 = vsub.f32 %v7121_v28, %v1335_v61  ;;  %v1332_v0 = vpop.xlane.xlu0 %1331 }
 0x3d3   : > { %v1362_v2 = vsub.f32 %v951_v29, %v1332_v0 }
 0x3d4   : > { %v1378_v3 = vmul.f32 1.442695, %v1363_v62 }
 0x3d5   : > { %v1376_v4 = vmul.f32 1.442695, %v1362_v2 }
 0x3d6   : > { %8153 = vpow2.f32 %v1378_v3  ;;  %v1344_v5 = vpop.xlane.xlu1 %1343 }
 0x3d7   : > { %v1366_v6 = vsub.f32 %v1133_v34, %v1344_v5  ;;  %8155 = vpow2.f32 %v1376_v4 }
 0x3d8   : > { %v9226_v7 = vpop.eup %8149 }
 0x3d9   : > { %v9228_v25 = vpop.eup %8151  ;;  %v1384_v8 = vmul.f32 1.442695, %v1366_v6  ;;  %v1341_v10 = vpop.xlane.xlu0 %1340  ;;  %v1399_v12 = vsel %vm783_vm1, %v9226_v7, 0.0 }
 0x3da   : > { %1400 = vadd.xlane.f32.xlu0 %v1399_v12  ;;  %v1396_v13 = vsel %vm783_vm1, %v9228_v25, 0.0  ;;  %v1365_v26 = vsub.f32 %v9189_v37, %v1341_v10 }
 0x3db   : > { %1397 = vadd.xlane.f32.xlu1 %v1396_v13  ;;  %8157 = vpow2.f32 %v1384_v8 }
 0x3dc   : > { %v1382_v44 = vmul.f32 1.442695, %v1365_v26 }
 0x3dd   : > { %v1338_v14 = vpop.xlane.xlu0 %1337 }
 0x3de   : > { %v1356_v16 = vpop.xlane.xlu1 %1355 }
 0x3df   : > { %v1370_v22 = vsub.f32 %v1315_v43, %v1356_v16  ;;  %v1364_v43 = vsub.f32 %v9191_v38, %v1338_v14 }
 0x3e0   : > { %v9234_v23 = vpop.eup %8153 }
 0x3e1   : > { %v1392_v27 = vmul.f32 1.442695, %v1370_v22  ;;  %v1347_v28 = vpop.xlane.xlu0 %1346  ;;  %v1405_v29 = vsel %vm783_vm1, %v9234_v23, 0.0  ;;  %v9239_v31 = vpop.eup %8155  ;;  %v1380_v56 = vmul.f32 1.442695, %v1364_v43 }
 0x3e2   : > { %v1367_v32 = vsub.f32 %v9186_v33, %v1347_v28  ;;  %v7971_v34 = vpop.permute.xlu1 %7970  ;;  %1406 = vadd.xlane.f32.xlu1 %v1405_v29  ;;  %v1402_v37 = vsel %vm783_vm1, %v9239_v31, 0.0 }
 0x3e3   : > { %8159 = vpow2.f32 %v1392_v27  ;;  %v7973_v36 = vunpack.i.h.bf16 %v7971_v34  ;;  %v7972_v39 = vunpack.i.l.bf16 %v7971_v34 }
 0x3e4   : > { %v1386_v45 = vmul.f32 1.442695, %v1367_v32 }
 0x3e5   : > { %v1353_v49 = vpop.xlane.xlu0 %1352  ;;  %v7605_v51 = vpack.c.bf16 %v7973_v36, %v7972_v39  ;;  %v9245_v52 = vpop.eup %8157 }
 0x3e6   : > { %8161 = vpow2.f32 %v1386_v45  ;;  %v7981_v53 = vpop.permute.xlu1 %7980  ;;  %1403 = vadd.xlane.f32.xlu1 %v1402_v37  ;;  %v1414_v38 = vsel %vm783_vm1, %v9245_v52, 0.0  ;;  %v1369_v60 = vsub.f32 %v9200_v47, %v1353_v49 }
 0x3e7   : > { %v7983_v33 = vunpack.i.h.bf16 %v7981_v53  ;;  %v7982_v55 = vunpack.i.l.bf16 %v7981_v53  ;;  %7606 = vmatprep.subr.bf16.mxu1 %v7605_v51  ;;  %8163 = vpow2.f32 %v1382_v44 }
 0x3e8   : > { %7608 = vmatpush3.bf16.msra.mxu1 %v7605_v51  ;;  %8165 = vpow2.f32 %v1380_v56  ;;  %v1390_v6 = vmul.f32 1.442695, %v1369_v60 }
 0x3e9   : > { %v1359_v57 = vpop.xlane.xlu0 %1358  ;;  %v7613_v58 = vpack.c.bf16 %v7983_v33, %v7982_v55 }
 0x3ea   : > { %v1371_v59 = vsub.f32 %v9195_v42, %v1359_v57  ;;  %1415 = vadd.xlane.f32.xlu1 %v1414_v38  ;;  %v7986_v34 = vpop.permute.xlu1 %7985 }
 0x3eb   : > { %7614 = vmatprep.subr.bf16.mxu0 %v7613_v58  ;;  %v7987_v37 = vunpack.i.l.bf16 %v7986_v34 }
 0x3ec   : > { %v1394_v61 = vmul.f32 1.442695, %v1371_v59  ;;  %7616 = vmatpush3.bf16.msra.mxu0 %v7613_v58 }
 0x3ed   : > { %v9251_v62 = vpop.eup %8159  ;;  %v7976_v0 = vpop.permute.xlu0 %7975 }
 0x3ee   : > { %v7978_v2 = vunpack.i.h.bf16 %v7976_v0  ;;  %v7977_v3 = vunpack.i.l.bf16 %v7976_v0  ;;  %v1426_v4 = vsel %vm783_vm1, %v9251_v62, 0.0  ;;  %8167 = vpow2.f32 %v1394_v61  ;;  %v7996_v36 = vpop.permute.xlu1 %7995 }
 0x3ef   : > { %1427 = vadd.xlane.f32.xlu1 %v1426_v4  ;;  %8169 = vpow2.f32 %v1390_v6  ;;  %v7998_v38 = vunpack.i.h.bf16 %v7996_v36  ;;  %v7997_v58 = vunpack.i.l.bf16 %v7996_v36 }
 0x3f0   : > { %v9255_v5 = vpop.eup %8161  ;;  %v9257_v42 = vpack.c.bf16 %v7978_v2, %v7977_v3 }
 0x3f1   : > { %v7991_v8 = vpop.permute.xlu0 %7990  ;;  %v1417_v47 = vsel %vm783_vm1, %v9255_v5, 0.0  ;;  %v9261_v10 = vpop.eup %8163  ;;  %v7625_v61 = vpack.c.bf16 %v7998_v38, %v7997_v58 }
 0x3f2   : > { %v7993_v12 = vunpack.i.h.bf16 %v7991_v8  ;;  %v7992_v13 = vunpack.i.l.bf16 %v7991_v8  ;;  %1418 = vadd.xlane.f32.xlu0 %v1417_v47  ;;  %7610 = vmatprep.subr.bf16.mxu1 %v9257_v42  ;;  %v1411_v16 = vsel %vm783_vm1, %v9261_v10, 0.0  ;;  %v9268_v22 = vpop.eup %8165  ;;  %v9287_v39 = vpop.permute.xlu1 %8005 }
 0x3f3   : > { %v1408_v26 = vsel %vm783_vm1, %v9268_v22, 0.0  ;;  %v8008_v4 = vunpack.i.h.bf16 %v9287_v39 }
 0x3f4   : > { %v9264_v14 = vpack.c.bf16 %v7993_v12, %v7992_v13 }
 0x3f6   : > { %1412 = vadd.xlane.f32.xlu0 %v1411_v16  ;;  %7622 = vmatprep.subr.bf16.mxu0 %v9264_v14 }
 0x3f8   : > { %v9273_v27 = vpop.eup %8167 }
 0x3f9   : > { %v1429_v28 = vsel %vm783_vm1, %v9273_v27, 0.0  ;;  %v9277_v29 = vpop.eup %8169 }
 0x3fa   : > { %1409 = vadd.xlane.f32.xlu0 %v1408_v26  ;;  %v1423_v32 = vsel %vm783_vm1, %v9277_v29, 0.0 }
 0x3fe   : > { %1430 = vadd.xlane.f32.xlu0 %v1429_v28 }
 0x400   : > { %8015 = vrot.lane.b32.xlu1 %v9092_v41, %s8651_s7 }
 0x402   : > { %1424 = vadd.xlane.f32.xlu0 %v1423_v32 }
 0x418   : > { %1980 = vrot.lane.b32.xlu0 %v9121_v63, %s8652_s17 }
 0x41c   : > { %2069 = vrot.lane.b32.xlu0 %v9123_v1, %s8652_s17 }
 0x420   : > { %2160 = vrot.lane.b32.xlu0 %v9140_v11, %s8652_s17  ;;  %v9316_v11 = vpop.permute.xlu0 %8000 }
 0x421   : > { %v8003_v26 = vunpack.i.h.bf16 %v9316_v11  ;;  %v8002_v28 = vunpack.i.l.bf16 %v9316_v11 }
 0x423   : > { %v1350_v44 = vpop.xlane.xlu1 %1349 }
 0x424   : > { %v1368_v43 = vsub.f32 %v9202_v48, %v1350_v44  ;;  %2162 = vrot.lane.b32.xlu0 %v9163_v18, %s8652_s17 }
 0x426   : > { %v1388_v45 = vmul.f32 1.442695, %v1368_v43  ;;  %v7629_v43 = vpack.c.bf16 %v8003_v26, %v8002_v28 }
 0x428   : > { %8171 = vpow2.f32 %v1388_v45  ;;  %8025 = vrot.lane.b32.xlu0 %v9105_v50, %s8651_s7 }
 0x42c   : > { %2342 = vrot.lane.b32.xlu0 %v9165_v19, %s8652_s17 }
 0x430   : > { %2433 = vrot.lane.b32.xlu0 %v9152_v17, %s8652_s17  ;;  %v9318_v17 = vpop.permute.xlu0 %8010 }
 0x432   : > { %v9300_v63 = vpop.eup %8171 }
 0x433   : > { %v1420_v1 = vsel %vm783_vm1, %v9300_v63, 0.0 }
 0x434   : > { %1421 = vadd.xlane.f32.xlu1 %v1420_v1 }
 0x445   : > { %2071 = vrot.lane.b32.xlu1 %v9138_v9, %s8652_s17  ;;  %v9320_v9 = vpop.permute.xlu1 %1978 }
 0x449   : > { %8020 = vrot.lane.b32.xlu1 %v9101_v46, %s8651_s7 }
 0x44d   : > { %2251 = vrot.lane.b32.xlu1 %v9090_v40, %s8652_s17 }
 0x451   : > { %2253 = vrot.lane.b32.xlu1 %v9148_v15, %s8652_s17  ;;  %v7988_v15 = vunpack.i.h.bf16 %v7986_v34 }
 0x453   : > { %v7617_v33 = vpack.c.bf16 %v7988_v15, %v7987_v37 }
 0x455   : > { %2344 = vrot.lane.b32.xlu1 %v9178_v21, %s8652_s17 }
 0x459   : > { %2435 = vrot.lane.b32.xlu1 %v9173_v20, %s8652_s17 }
 0x467   : > { %v1401_v18 = vpop.xlane.xlu0 %1400 }
 0x468   : > { %8173 = vrcp.f32 %v1401_v18  ;;  %v1398_v19 = vpop.xlane.xlu1 %1397 }
 0x469   : > { %8175 = vrcp.f32 %v1398_v19 }
 0x46f   : > { %v1407_v40 = vpop.xlane.xlu1 %1406 }
 0x470   : > { %8177 = vrcp.f32 %v1407_v40 }
 0x472   : > { %v8174_v48 = vpop.eup %8173 }
 0x473   : > { %v8176_v49 = vpop.eup %8175  ;;  %v1404_v21 = vpop.xlane.xlu1 %1403  ;;  %v1445_v51 = vmul.f32 %v8174_v48, %v9226_v7 }
 0x474   : > { %8179 = vrcp.f32 %v1404_v21  ;;  %v1444_v20 = vmul.f32 %v8176_v49, %v9228_v25  ;;  %v8013_v21 = vunpack.i.h.bf16 %v9318_v17 }
 0x476   : > { %7154 = vmatprep.mubr.msk.f32.mxu1 %vm783_vm1, %v1444_v20  ;;  %v8012_v20 = vunpack.i.l.bf16 %v9318_v17 }
 0x477   : > { %7155 = vmatmul.mubr.msk.f32.vlgmr.msra.gmra.mrb[8].mxu1 %vm783_vm1, %v1445_v51  ;;  %v1416_v53 = vpop.xlane.xlu1 %1415 }
 0x478   : > { %7612 = vmatpush3.bf16.msra.mxu1 %v9257_v42  ;;  %8181 = vrcp.f32 %v1416_v53 }
 0x479   : > { %7618 = vmatprep.subr.bf16.mxu1 %v7617_v33 }
 0x47a   : > { %v8178_v56 = vpop.eup %8177 }
 0x47b   : > { %v1447_v7 = vmul.f32 %v8178_v56, %v9234_v23  ;;  %v8007_v23 = vunpack.i.l.bf16 %v9287_v39  ;;  %v7641_v56 = vpack.c.bf16 %v8013_v21, %v8012_v20 }
 0x47c   : > { %v1428_v55 = vpop.xlane.xlu1 %1427 }
 0x47d   : > { %8183 = vrcp.f32 %v1428_v55  ;;  %v7635_v12 = vpack.c.bf16 %v8008_v4, %v8007_v23 }
 0x47e   : > { %v8180_v57 = vpop.eup %8179 }
 0x47f   : > { %v1419_v59 = vpop.xlane.xlu0 %1418  ;;  %v1446_v25 = vmul.f32 %v8180_v57, %v9239_v31 }
 0x480   : > { %8185 = vrcp.f32 %v1419_v59 }
 0x481   : > { %7161 = vmatprep.mubr.msk.f32.mxu1 %vm783_vm1, %v1446_v25 }
 0x482   : > { %v8182_v60 = vpop.eup %8181  ;;  %7162 = vmatmul.mubr.msk.f32.vlgmr.msra.gmra.mrb[10].mxu1 %vm783_vm1, %v1447_v7 }
 0x483   : > { %7620 = vmatpush3.bf16.msra.mxu1 %v7617_v33  ;;  %v1413_v0 = vpop.xlane.xlu0 %1412  ;;  %v1450_v2 = vmul.f32 %v8182_v60, %v9245_v52 }
 0x484   : > { %7626 = vmatprep.subr.bf16.mxu1 %v7625_v61  ;;  %8187 = vrcp.f32 %v1413_v0 }
 0x485   : > { %7175 = vmatprep.mubr.msk.f32.mxu1 %vm783_vm1, %v1450_v2 }
 0x487   : > { %v1410_v3 = vpop.xlane.xlu0 %1409  ;;  %v8184_v31 = vpop.eup %8183 }
 0x488   : > { %8189 = vrcp.f32 %v1410_v3  ;;  %v1454_v47 = vmul.f32 %v8184_v31, %v9251_v62 }
 0x48a   : > { %v8186_v6 = vpop.eup %8185 }
 0x48b   : > { %v1431_v42 = vpop.xlane.xlu0 %1430  ;;  %v1451_v8 = vmul.f32 %v8186_v6, %v9255_v5  ;;  %v8016_v5 = vpop.permute.xlu1 %8015 }
 0x48c   : > { %8191 = vrcp.f32 %v1431_v42  ;;  %v8018_v36 = vunpack.i.h.bf16 %v8016_v5  ;;  %v8017_v39 = vunpack.i.l.bf16 %v8016_v5 }
 0x48d   : > { %7176 = vmatmul.mubr.msk.f32.vlgmr.msra.gmra.mrb[12].mxu1 %vm783_vm1, %v1451_v8 }
 0x48e   : > { %7628 = vmatpush3.bf16.msra.mxu1 %v7625_v61  ;;  %7189 = vmatprep.mubr.msk.f32.mxu1 %vm783_vm1, %v1454_v47  ;;  %v8188_v13 = vpop.eup %8187  ;;  %v7647_v1 = vpack.c.bf16 %v8018_v36, %v8017_v39 }
 0x48f   : > { %7637 = vmatprep.subr.msk.bf16.mxu1 %vm9111_vm2, %v7635_v12  ;;  %v1425_v52 = vpop.xlane.xlu0 %1424  ;;  %v1449_v34 = vmul.f32 %v8188_v13, %v9261_v10 }
 0x490   : > { %8193 = vrcp.f32 %v1425_v52 }
 0x492   : > { %v8190_v16 = vpop.eup %8189 }
 0x493   : > { %v1981_v32 = vpop.permute.xlu0 %1980  ;;  %v1448_v62 = vmul.f32 %v8190_v16, %v9268_v22 }
 0x495   : > { %7168 = vmatprep.mubr.msk.f32.mxu0 %vm783_vm1, %v1448_v62 }
 0x496   : > { %v8192_v44 = vpop.eup %8191  ;;  %7169 = vmatmul.mubr.msk.f32.vlgmr.msra.gmra.mrb[16].mxu0 %vm783_vm1, %v1449_v34 }
 0x497   : > { %7624 = vmatpush3.bf16.msra.mxu0 %v9264_v14  ;;  %v1455_v45 = vmul.f32 %v8192_v44, %v9273_v27  ;;  %v2070_v11 = vpop.permute.xlu0 %2069 }
 0x498   : > { %7631 = vmatprep.subr.msk.bf16.mxu0 %vm9111_vm2, %v7629_v43 }
 0x499   : > { %7190 = vmatmul.mubr.msk.f32.vlgmr.msra.gmra.mrb[14].mxu1 %vm783_vm1, %v1455_v45 }
 0x49a   : > { %7640 = vmatpush3.bf16.xpose.msk.msra.mxu1 %vm9111_vm2, %v7635_v12  ;;  %7203 = vmatprep.mubr.msk.f32.mxu1 %vm783_vm1, %v2070_v11  ;;  %v8194_v15 = vpop.eup %8193 }
 0x49b   : > { %7649 = vmatprep.subr.msk.bf16.mxu1 %vm9111_vm2, %v7647_v1  ;;  %v2161_v10 = vpop.permute.xlu0 %2160  ;;  %v1453_v55 = vmul.f32 %v8194_v15, %v9277_v29 }
 0x49f   : > { %v2163_v22 = vpop.permute.xlu0 %2162 }
 0x4a3   : > { %v8026_v14 = vpop.permute.xlu0 %8025 }
 0x4a4   : > { %v8028_v18 = vunpack.i.h.bf16 %v8026_v14  ;;  %v8027_v19 = vunpack.i.l.bf16 %v8026_v14 }
 0x4a6   : > { %v7659_v48 = vpack.c.bf16 %v8028_v18, %v8027_v19 }
 0x4a7   : > { %v2343_v51 = vpop.permute.xlu0 %2342 }
 0x4ab   : > { %v2434_v57 = vpop.permute.xlu0 %2433 }
 0x4c1   : > { %v1422_v27 = vpop.xlane.xlu1 %1421 }
 0x4c2   : > { %8195 = vrcp.f32 %v1422_v27 }
 0x4c5   : > { %v2072_v40 = vpop.permute.xlu1 %2071 }
 0x4c6   : > { %7204 = vmatmul.mubr.msk.f32.vlgmr.msra.gmra.mrb[16].mxu1 %vm783_vm1, %v2072_v40 }
 0x4c7   : > { %7652 = vmatpush3.bf16.xpose.msk.msra.mxu1 %vm9111_vm2, %v7647_v1 }
 0x4c8   : > { %7661 = vmatprep.subr.msk.bf16.mxu1 %vm9111_vm2, %v7659_v48 }
 0x4c9   : > { %v8021_v49 = vpop.permute.xlu1 %8020 }
 0x4ca   : > { %v8023_v29 = vunpack.i.h.bf16 %v8021_v49 }
 0x4cc   : > { %v8196_v37 = vpop.eup %8195 }
 0x4cd   : > { %v2252_v53 = vpop.permute.xlu1 %2251  ;;  %v1452_v33 = vmul.f32 %v8196_v37, %v9300_v63  ;;  %v8022_v63 = vunpack.i.l.bf16 %v8021_v49 }
 0x4ce   : > { %7217 = vmatprep.mubr.msk.f32.mxu1 %vm783_vm1, %v2252_v53 }
 0x4cf   : > { %7182 = vmatprep.mubr.msk.f32.mxu0 %vm783_vm1, %v1452_v33  ;;  %v7653_v58 = vpack.c.bf16 %v8023_v29, %v8022_v63 }
 0x4d0   : > { %7183 = vmatmul.mubr.msk.f32.vlgmr.msra.gmra.mrb[18].mxu0 %vm783_vm1, %v1453_v55 }
 0x4d1   : > { %7634 = vmatpush3.bf16.xpose.msk.msra.mxu0 %vm9111_vm2, %v7629_v43  ;;  %7196 = vmatprep.mubr.msk.f32.mxu0 %vm783_vm1, %v9320_v9  ;;  %v2254_v17 = vpop.permute.xlu1 %2253 }
 0x4d2   : > { %7643 = vmatprep.subr.msk.bf16.mxu0 %vm9111_vm2, %v7641_v56  ;;  %7218 = vmatmul.mubr.msk.f32.vlgmr.msra.gmra.mrb[18].mxu1 %vm783_vm1, %v2254_v17 }
 0x4d3   : > { %7664 = vmatpush3.bf16.xpose.msk.msra.mxu1 %vm9111_vm2, %v7659_v48  ;;  %7231 = vmatprep.mubr.msk.f32.mxu1 %vm783_vm1, %v2434_v57 }
 0x4d5   : > { %v2345_v38 = vpop.permute.xlu1 %2344 }
 0x4d8   : > { %7197 = vmatmul.mubr.msk.f32.vlgmr.msra.gmra.mrb[20].mxu0 %vm783_vm1, %v1981_v32 }
 0x4d9   : > { %7646 = vmatpush3.bf16.xpose.msk.msra.mxu0 %vm9111_vm2, %v7641_v56  ;;  %7210 = vmatprep.mubr.msk.f32.mxu0 %vm783_vm1, %v2161_v10  ;;  %v2436_v9 = vpop.permute.xlu1 %2435 }
 0x4da   : > { %7655 = vmatprep.subr.msk.bf16.mxu0 %vm9111_vm2, %v7653_v58  ;;  %7232 = vmatmul.mubr.msk.f32.vlgmr.msra.gmra.mrb[20].mxu1 %vm783_vm1, %v2436_v9 }
 0x4e0   : > { %7211 = vmatmul.mubr.msk.f32.vlgmr.msra.gmra.mrb[22].mxu0 %vm783_vm1, %v2163_v22 }
 0x4e1   : > { %7658 = vmatpush3.bf16.xpose.msk.msra.mxu0 %vm9111_vm2, %v7653_v58  ;;  %7224 = vmatprep.mubr.msk.f32.mxu0 %vm783_vm1, %v2343_v51 }
 0x4e8   : > { %7225 = vmatmul.mubr.msk.f32.vlgmr.msra.gmra.mrb[24].mxu0 %vm783_vm1, %v2345_v38 }
 0x54a   : > { %v9391_v59 = vpop.f32.mrb[8].mxu1 }
 0x54b   : > { %v9393_v25 = vpop.f32.mrb[9].mxu1 }
 0x555   : > { %v9395_v7 = vpop.f32.mrb[10].mxu1 }
 0x556   : > { %v9397_v60 = vpop.f32.mrb[11].mxu1 }
 0x560   : > { %v9399_v61 = vpop.f32.mrb[12].mxu1 }
 0x561   : > { %v9401_v0 = vpop.f32.mrb[13].mxu1 }
 0x569   : > { %v9403_v2 = vpop.f32.mrb[16].mxu0 }
 0x56a   : > { %v9405_v3 = vpop.f32.mrb[17].mxu0 }
 0x56c   : > { %v9407_v31 = vpop.f32.mrb[14].mxu1 }
 0x56d   : > { %v9409_v4 = vpop.f32.mrb[15].mxu1 }
 0x599   : > { %v7205_v23 = vpop.f32.mrb[16].mxu1 }
 0x59a   : > { %v2151_v6 = vpop.f32.mrb[17].mxu1  ;;  %v2533_v39 = vsel %vm783_vm1, %v7205_v23, -inf }
 0x59b   : > { %v2530_v62 = vsel %vm783_vm1, %v2151_v6, -inf }
 0x5a3   : > { %v9411_v42 = vpop.f32.mrb[18].mxu0 }
 0x5a4   : > { %v9413_v8 = vpop.f32.mrb[19].mxu0 }
 0x5a5   : > { %v9415_v47 = vpop.f32.mrb[18].mxu1 }
 0x5a6   : > { %v2333_v12 = vpop.f32.mrb[19].mxu1  ;;  %v2545_v10 = vsel %vm783_vm1, %v9415_v47, -inf }
 0x5a7   : > { %v2542_v32 = vsel %vm783_vm1, %v2333_v12, -inf }
 0x5ab   : > { %v7198_v52 = vpop.f32.mrb[20].mxu0 }
 0x5ac   : > { %v2060_v13 = vpop.f32.mrb[21].mxu0  ;;  %v2527_v16 = vsel %vm783_vm1, %v7198_v52, -inf }
 0x5ad   : > { %2528 = vmax.xlane.f32.xlu1 %v2527_v16  ;;  %v2524_v26 = vsel %vm783_vm1, %v2060_v13, -inf  ;;  %v9419_v28 = vpop.f32.mrb[20].mxu1 }
 0x5ae   : > { %2525 = vmax.xlane.f32.xlu0 %v2524_v26  ;;  %v9421_v5 = vpop.f32.mrb[21].mxu1  ;;  %v2557_v27 = vsel %vm783_vm1, %v9419_v28, -inf }
 0x5af   : > { %v2554_v45 = vsel %vm783_vm1, %v9421_v5, -inf }
 0x5b1   : > { %2543 = vmax.xlane.f32.xlu1 %v2542_v32 }
 0x5b2   : > { %2531 = vmax.xlane.f32.xlu0 %v2530_v62 }
 0x5b3   : > { %v7212_v34 = vpop.f32.mrb[22].mxu0 }
 0x5b4   : > { %v2242_v36 = vpop.f32.mrb[23].mxu0  ;;  %v2539_v43 = vsel %vm783_vm1, %v7212_v34, -inf }
 0x5b5   : > { %v2536_v44 = vsel %vm783_vm1, %v2242_v36, -inf }
 0x5b6   : > { %2534 = vmax.xlane.f32.xlu0 %v2533_v39  ;;  %2537 = vmax.xlane.f32.xlu1 %v2536_v44 }
 0x5ba   : > { %2540 = vmax.xlane.f32.xlu0 %v2539_v43  ;;  %2555 = vmax.xlane.f32.xlu1 %v2554_v45 }
 0x5bb   : > { %v9430_v1 = vpop.f32.mrb[24].mxu0 }
 0x5bc   : > { %v9432_v11 = vpop.f32.mrb[25].mxu0  ;;  %v2551_v14 = vsel %vm783_vm1, %v9430_v1, -inf }
 0x5bd   : > { %v2548_v22 = vsel %vm783_vm1, %v9432_v11, -inf }
 0x5be   : > { %2546 = vmax.xlane.f32.xlu0 %v2545_v10  ;;  %2549 = vmax.xlane.f32.xlu1 %v2548_v22 }
 0x5c2   : > { %2552 = vmax.xlane.f32.xlu0 %v2551_v14 }
 0x5c6   : > { %2558 = vmax.xlane.f32.xlu0 %v2557_v27 }
 0x5cf   : > { %8030 = vrot.lane.b32.xlu1 %v9068_v24, %s8653_s14 }
 0x5d3   : > { %8040 = vrot.lane.b32.xlu1 %v9086_v35, %s8653_s14 }
 0x5d7   : > { %8045 = vrot.lane.b32.xlu1 %v9092_v41, %s8653_s14 }
 0x5dc   : > { %8035 = vrot.lane.b32.xlu0 %v9079_v30, %s8653_s14 }
 0x63a   : > { %v2529_v18 = vpop.xlane.xlu1 %2528 }
 0x63b   : > { %v2526_v19 = vpop.xlane.xlu0 %2525  ;;  %v2561_v37 = vsub.f32 %v7198_v52, %v2529_v18 }
 0x63c   : > { %v2560_v40 = vsub.f32 %v2060_v13, %v2526_v19 }
 0x63d   : > { %v2574_v33 = vmul.f32 1.442695, %v2561_v37 }
 0x63e   : > { %v2544_v48 = vpop.xlane.xlu1 %2543  ;;  %v2572_v21 = vmul.f32 1.442695, %v2560_v40 }
 0x63f   : > { %v2532_v49 = vpop.xlane.xlu0 %2531  ;;  %v2566_v20 = vsub.f32 %v2333_v12, %v2544_v48 }
 0x640   : > { %v2562_v15 = vsub.f32 %v2151_v6, %v2532_v49 }
 0x641   : > { %v2584_v41 = vmul.f32 1.442695, %v2566_v20 }
 0x642   : > { %v2576_v51 = vmul.f32 1.442695, %v2562_v15 }
 0x643   : > { %v2535_v24 = vpop.xlane.xlu0 %2534  ;;  %v2538_v53 = vpop.xlane.xlu1 %2537 }
 0x644   : > { %8197 = vpow2.f32 %v2576_v51  ;;  %v2563_v35 = vsub.f32 %v7205_v23, %v2535_v24  ;;  %v2564_v56 = vsub.f32 %v2242_v36, %v2538_v53 }
 0x645   : > { %8199 = vpow2.f32 %v2572_v21 }
 0x646   : > { %v2578_v55 = vmul.f32 1.442695, %v2563_v35  ;;  %v2580_v29 = vmul.f32 1.442695, %v2564_v56 }
 0x647   : > { %v2541_v30 = vpop.xlane.xlu0 %2540  ;;  %v2556_v17 = vpop.xlane.xlu1 %2555 }
 0x648   : > { %8201 = vpow2.f32 %v2578_v55  ;;  %v2565_v57 = vsub.f32 %v7212_v34, %v2541_v30  ;;  %v2570_v63 = vsub.f32 %v9421_v5, %v2556_v17 }
 0x649   : > { %8203 = vpow2.f32 %v2574_v33 }
 0x64a   : > { %8205 = vpow2.f32 %v2584_v41  ;;  %v2582_v23 = vmul.f32 1.442695, %v2565_v57  ;;  %v2592_v52 = vmul.f32 1.442695, %v2570_v63 }
 0x64b   : > { %v2547_v38 = vpop.xlane.xlu0 %2546  ;;  %v2550_v58 = vpop.xlane.xlu1 %2549  ;;  %8207 = vpow2.f32 %v2580_v29 }
 0x64c   : > { %v2567_v9 = vsub.f32 %v9415_v47, %v2547_v38  ;;  %v2568_v13 = vsub.f32 %v9432_v11, %v2550_v58 }
 0x64e   : > { %v9452_v6 = vpop.eup %8197  ;;  %v2586_v12 = vmul.f32 1.442695, %v2567_v9  ;;  %v2588_v43 = vmul.f32 1.442695, %v2568_v13 }
 0x64f   : > { %v2553_v16 = vpop.xlane.xlu0 %2552  ;;  %v8031_v26 = vpop.permute.xlu1 %8030  ;;  %v2602_v32 = vsel %vm783_vm1, %v9452_v6, 0.0 }
 0x650   : > { %v9457_v62 = vpop.eup %8199  ;;  %8209 = vpow2.f32 %v2586_v12  ;;  %v8033_v5 = vunpack.i.h.bf16 %v8031_v26  ;;  %v8032_v34 = vunpack.i.l.bf16 %v8031_v26  ;;  %2603 = vadd.xlane.f32.xlu1 %v2602_v32  ;;  %v2569_v36 = vsub.f32 %v9430_v1, %v2553_v16 }
 0x651   : > { %8211 = vpow2.f32 %v2582_v23  ;;  %v2596_v22 = vsel %vm783_vm1, %v9457_v62, 0.0 }
 0x652   : > { %v9459_v47 = vpop.eup %8201  ;;  %v7665_v39 = vpack.c.bf16 %v8033_v5, %v8032_v34  ;;  %8213 = vpow2.f32 %v2592_v52  ;;  %v2590_v1 = vmul.f32 1.442695, %v2569_v36 }
 0x653   : > { %v9462_v44 = vpop.eup %8203  ;;  %v2559_v45 = vpop.xlane.xlu0 %2558  ;;  %v2605_v10 = vsel %vm783_vm1, %v9459_v47, 0.0  ;;  %8215 = vpow2.f32 %v2588_v43 }
 0x654   : > { %v8041_v11 = vpop.permute.xlu1 %8040  ;;  %v9468_v14 = vpop.eup %8205  ;;  %v2571_v27 = vsub.f32 %v9419_v28, %v2559_v45  ;;  %2606 = vadd.xlane.f32.xlu0 %v2605_v10  ;;  %2597 = vadd.xlane.f32.xlu1 %v2596_v22  ;;  %v2599_v37 = vsel %vm783_vm1, %v9462_v44, 0.0 }
 0x655   : > { %v8043_v18 = vunpack.i.h.bf16 %v8041_v11  ;;  %v8042_v19 = vunpack.i.l.bf16 %v8041_v11  ;;  %7666 = vmatprep.subr.bf16.mxu0 %v7665_v39  ;;  %v2614_v21 = vsel %vm783_vm1, %v9468_v14, 0.0  ;;  %v9477_v24 = vpop.eup %8207 }
 0x656   : > { %v2594_v40 = vmul.f32 1.442695, %v2571_v27  ;;  %7668 = vmatpush3.bf16.msra.mxu0 %v7665_v39  ;;  %v2608_v56 = vsel %vm783_vm1, %v9477_v24, 0.0 }
 0x657   : > { %v9471_v48 = vpack.c.bf16 %v8043_v18, %v8042_v19  ;;  %v8036_v49 = vpop.permute.xlu0 %8035 }
 0x658   : > { %v8046_v15 = vpop.permute.xlu1 %8045  ;;  %8217 = vpow2.f32 %v2594_v40  ;;  %v8038_v28 = vunpack.i.h.bf16 %v8036_v49  ;;  %v8037_v20 = vunpack.i.l.bf16 %v8036_v49  ;;  %2600 = vadd.xlane.f32.xlu0 %v2599_v37  ;;  %2615 = vadd.xlane.f32.xlu1 %v2614_v21 }
 0x659   : > { %v8048_v51 = vunpack.i.h.bf16 %v8046_v15  ;;  %v8047_v53 = vunpack.i.l.bf16 %v8046_v15  ;;  %7674 = vmatprep.subr.bf16.mxu0 %v9471_v48  ;;  %8219 = vpow2.f32 %v2590_v1 }
 0x65a   : > { %v9480_v35 = vpop.eup %8209  ;;  %v7669_v33 = vpack.c.bf16 %v8038_v28, %v8037_v20 }
 0x65b   : > { %v2617_v41 = vsel %vm783_vm1, %v9480_v35, 0.0  ;;  %v9484_v55 = vpop.eup %8211  ;;  %v7677_v30 = vpack.c.bf16 %v8048_v51, %v8047_v53 }
 0x65c   : > { %2618 = vadd.xlane.f32.xlu0 %v2617_v41  ;;  %7670 = vmatprep.subr.bf16.mxu1 %v7669_v33  ;;  %v9488_v17 = vpop.eup %8213  ;;  %v2611_v57 = vsel %vm783_vm1, %v9484_v55, 0.0 }
 0x65d   : > { %2609 = vadd.xlane.f32.xlu1 %v2608_v56  ;;  %7672 = vmatpush3.bf16.msra.mxu1 %v7669_v33  ;;  %v2626_v29 = vsel %vm783_vm1, %v9488_v17, 0.0  ;;  %v9494_v63 = vpop.eup %8215 }
 0x65e   : > { %7678 = vmatprep.subr.bf16.mxu1 %v7677_v30  ;;  %v2620_v23 = vsel %vm783_vm1, %v9494_v63, 0.0 }
 0x660   : > { %2612 = vadd.xlane.f32.xlu0 %v2611_v57 }
 0x661   : > { %2627 = vadd.xlane.f32.xlu1 %v2626_v29  ;;  %v3238_v29 = vld [vmem:[#allocation7] sm:$0xff] }
 0x662   : > { %v9496_v38 = vpop.eup %8217 }
 0x663   : > { %v2629_v58 = vsel %vm783_vm1, %v9496_v38, 0.0  ;;  %v9500_v9 = vpop.eup %8219 }
 0x664   : > { %2630 = vadd.xlane.f32.xlu0 %v2629_v58  ;;  %v2623_v12 = vsel %vm783_vm1, %v9500_v9, 0.0  ;;  %v3239_v58 = vld [vmem:[#allocation7 + $0x8] sm:$0xff] }
 0x665   : > { %2621 = vadd.xlane.f32.xlu1 %v2620_v23  ;;  %v3240_v23 = vld [vmem:[#allocation7 + $0x10] sm:$0xff] }
 0x668   : > { %2624 = vadd.xlane.f32.xlu0 %v2623_v12  ;;  %v7689_v12 = vpack.c.bf16 %v3239_v58, %v3238_v29 }
 0x676   : > { %8055 = vrot.lane.b32.xlu1 %v9105_v50, %s8653_s14 }
 0x67e   : > { %8050 = vrot.lane.b32.xlu0 %v9101_v46, %s8653_s14  ;;  %s10237_s14 = sld [smem:[#allocation29_spill]] }
 0x6dd   : > { %v2604_v52 = vpop.xlane.xlu1 %2603 }
 0x6de   : > { %8221 = vrcp.f32 %v2604_v52  ;;  %v3241_v52 = vld [vmem:[#allocation7 + $0x18] sm:$0xff] }
 0x6e1   : > { %v2607_v13 = vpop.xlane.xlu0 %2606  ;;  %v2598_v16 = vpop.xlane.xlu1 %2597 }
 0x6e2   : > { %8223 = vrcp.f32 %v2607_v13  ;;  %v7693_v13 = vpack.c.bf16 %v3241_v52, %v3240_v23 }
 0x6e3   : > { %8225 = vrcp.f32 %v2598_v16 }
 0x6e5   : > { %v2601_v26 = vpop.xlane.xlu0 %2600  ;;  %v2616_v32 = vpop.xlane.xlu1 %2615 }
 0x6e6   : > { %8227 = vrcp.f32 %v2601_v26 }
 0x6e7   : > { %8229 = vrcp.f32 %v2616_v32 }
 0x6e8   : > { %v8222_v5 = vpop.eup %8221 }
 0x6e9   : > { %v2619_v34 = vpop.xlane.xlu0 %2618  ;;  %v2646_v36 = vmul.f32 %v8222_v5, %v9452_v6 }
 0x6ea   : > { %8231 = vrcp.f32 %v2619_v34  ;;  %v2610_v39 = vpop.xlane.xlu1 %2609 }
 0x6eb   : > { %8233 = vrcp.f32 %v2610_v39  ;;  %7245 = vmatprep.mubr.msk.f32.mxu1 %vm783_vm1, %v2646_v36 }
 0x6ec   : > { %v8224_v46 = vpop.eup %8223 }
 0x6ed   : > { %v8226_v50 = vpop.eup %8225  ;;  %v2613_v43 = vpop.xlane.xlu0 %2612  ;;  %v2647_v45 = vmul.f32 %v8224_v46, %v9459_v47 }
 0x6ee   : > { %8235 = vrcp.f32 %v2613_v43  ;;  %v2628_v11 = vpop.xlane.xlu1 %2627  ;;  %v2644_v10 = vmul.f32 %v8226_v50, %v9457_v62 }
 0x6ef   : > { %8237 = vrcp.f32 %v2628_v11  ;;  %7246 = vmatmul.mubr.msk.f32.vlgmr.msra.gmra.mrb[22].mxu1 %vm783_vm1, %v2647_v45 }
 0x6f0   : > { %v8228_v22 = vpop.eup %8227  ;;  %7238 = vmatprep.mubr.msk.f32.mxu0 %vm783_vm1, %v2644_v10  ;;  %7680 = vmatpush3.bf16.msra.mxu1 %v7677_v30 }
 0x6f1   : > { %v8230_v6 = vpop.eup %8229  ;;  %v2631_v27 = vpop.xlane.xlu0 %2630  ;;  %v2645_v18 = vmul.f32 %v8228_v22, %v9462_v44 }
 0x6f2   : > { %8239 = vrcp.f32 %v2631_v27  ;;  %v2622_v19 = vpop.xlane.xlu1 %2621  ;;  %v2650_v1 = vmul.f32 %v8230_v6, %v9468_v14 }
 0x6f3   : > { %8241 = vrcp.f32 %v2622_v19  ;;  %7239 = vmatmul.mubr.msk.f32.vlgmr.msra.gmra.mrb[26].mxu0 %vm783_vm1, %v2645_v18 }
 0x6f4   : > { %v8232_v47 = vpop.eup %8231  ;;  %7676 = vmatpush3.bf16.msra.mxu0 %v9471_v48  ;;  %7259 = vmatprep.mubr.msk.f32.mxu1 %vm783_vm1, %v2650_v1 }
 0x6f5   : > { %v8234_v62 = vpop.eup %8233  ;;  %v2625_v40 = vpop.xlane.xlu0 %2624  ;;  %v2651_v49 = vmul.f32 %v8232_v47, %v9480_v35 }
 0x6f6   : > { %8243 = vrcp.f32 %v2625_v40  ;;  %v8056_v15 = vpop.permute.xlu1 %8055  ;;  %v2648_v44 = vmul.f32 %v8234_v62, %v9477_v24 }
 0x6f7   : > { %v8058_v37 = vunpack.i.h.bf16 %v8056_v15  ;;  %v8057_v21 = vunpack.i.l.bf16 %v8056_v15  ;;  %7260 = vmatmul.mubr.msk.f32.vlgmr.msra.gmra.mrb[24].mxu1 %vm783_vm1, %v2651_v49 }
 0x6f8   : > { %v8236_v14 = vpop.eup %8235  ;;  %7252 = vmatprep.mubr.msk.f32.mxu0 %vm783_vm1, %v2648_v44 }
 0x6f9   : > { %v8238_v28 = vpop.eup %8237  ;;  %v7685_v20 = vpack.c.bf16 %v8058_v37, %v8057_v21  ;;  %v8051_v48 = vpop.permute.xlu0 %8050  ;;  %v2649_v51 = vmul.f32 %v8236_v14, %v9484_v55 }
 0x6fa   : > { %v8053_v53 = vunpack.i.h.bf16 %v8051_v48  ;;  %v8052_v33 = vunpack.i.l.bf16 %v8051_v48  ;;  %v2654_v35 = vmul.f32 %v8238_v28, %v9488_v17 }
 0x6fb   : > { %7686 = vmatprep.subr.bf16.mxu1 %v7685_v20  ;;  %7253 = vmatmul.mubr.msk.f32.vlgmr.msra.gmra.mrb[28].mxu0 %vm783_vm1, %v2649_v51 }
 0x6fc   : > { %v8240_v24 = vpop.eup %8239  ;;  %v7681_v41 = vpack.c.bf16 %v8053_v53, %v8052_v33  ;;  %7688 = vmatpush3.bf16.msra.mxu1 %v7685_v20  ;;  %7273 = vmatprep.mubr.msk.f32.mxu1 %vm783_vm1, %v2654_v35 }
 0x6fd   : > { %v8242_v56 = vpop.eup %8241  ;;  %v2655_v30 = vmul.f32 %v8240_v24, %v9496_v38 }
 0x6fe   : > { %7682 = vmatprep.subr.bf16.mxu0 %v7681_v41  ;;  %v2652_v57 = vmul.f32 %v8242_v56, %v9494_v63 }
 0x6ff   : > { %7684 = vmatpush3.bf16.msra.mxu0 %v7681_v41  ;;  %7274 = vmatmul.mubr.msk.f32.vlgmr.msra.gmra.mrb[26].mxu1 %vm783_vm1, %v2655_v30 }
 0x700   : > { %v8244_v55 = vpop.eup %8243  ;;  %7266 = vmatprep.mubr.msk.f32.mxu0 %vm783_vm1, %v2652_v57  ;;  %7690 = vmatprep.subr.bf16.mxu0 %v7689_v12 }
 0x701   : > { %v2653_v17 = vmul.f32 %v8244_v55, %v9500_v9 }
 0x703   : > { %7267 = vmatmul.mubr.msk.f32.vlgmr.msra.gmra.mrb[30].mxu0 %vm783_vm1, %v2653_v17 }
 0x704   : > { %7692 = vmatpush3.bf16.msra.mxu0 %v7689_v12 }
 0x705   : > { %7694 = vmatprep.subr.bf16.mxu0 %v7693_v13 }
 0x708   : > { %7696 = vmatpush3.bf16.msra.mxu0 %v7693_v13 }
 0x7c2   : > { %v7247_v63 = vpop.f32.mrb[22].mxu1 }
 0x7c3   : > { %v2821_v38 = vpop.f32.mrb[23].mxu1 }
 0x7c6   : > { %v7240_v16 = vpop.f32.mrb[26].mxu0 }
 0x7c7   : > { %3192 = vrot.lane.b32.xlu1 %v7240_v16, %s8654_s22  ;;  %v2734_v26 = vpop.f32.mrb[27].mxu0 }
 0x7c8   : > { %3190 = vrot.lane.b32.xlu0 %v2734_v26, %s8654_s22 }
 0x7ca   : > { %v7261_v9 = vpop.f32.mrb[24].mxu1 }
 0x7cb   : > { %v2995_v32 = vpop.f32.mrb[25].mxu1  ;;  %3196 = vrot.lane.b32.xlu1 %v7247_v63, %s8654_s22 }
 0x7cc   : > { %3194 = vrot.lane.b32.xlu0 %v2821_v38, %s8654_s22 }
 0x7ce   : > { %v7254_v5 = vpop.f32.mrb[28].mxu0 }
 0x7cf   : > { %3200 = vrot.lane.b32.xlu1 %v7254_v5, %s8654_s22  ;;  %v2908_v34 = vpop.f32.mrb[29].mxu0 }
 0x7d0   : > { %3198 = vrot.lane.b32.xlu0 %v2908_v34, %s8654_s22 }
 0x7d2   : > { %v7275_v36 = vpop.f32.mrb[26].mxu1 }
 0x7d3   : > { %v3169_v39 = vpop.f32.mrb[27].mxu1  ;;  %3204 = vrot.lane.b32.xlu1 %v7261_v9, %s8654_s22 }
 0x7d4   : > { %3202 = vrot.lane.b32.xlu0 %v2995_v32, %s8654_s22 }
 0x7d6   : > { %v7268_v46 = vpop.f32.mrb[30].mxu0 }
 0x7d7   : > { %3208 = vrot.lane.b32.xlu1 %v7268_v46, %s8654_s22  ;;  %v3082_v50 = vpop.f32.mrb[31].mxu0 }
 0x7d8   : > { %3206 = vrot.lane.b32.xlu0 %v3082_v50, %s8654_s22 }
 0x7db   : > { %3212 = vrot.lane.b32.xlu1 %v7275_v36, %s8654_s22 }
 0x7dc   : > { %3210 = vrot.lane.b32.xlu0 %v3169_v39, %s8654_s22 }
 0x839   : > { %v3193_v43 = vpop.permute.xlu1 %3192 }
 0x83a   : > { %v3191_v45 = vpop.permute.xlu0 %3190  ;;  %v3227_v10 = vsel %vm783_vm1, %v9391_v59, %v3193_v43 }
 0x83b   : > { %v3226_v11 = vsel %vm783_vm1, %v9393_v25, %v3191_v45 }
 0x83c   : > { %7284 = vmatprep.mubr.msk.f32.mxu0 %vm603_vm0, %v3226_v11 }
 0x83d   : > { %v3197_v22 = vpop.permute.xlu1 %3196  ;;  %7285 = vmatmul.mubr.msk.f32.vlgmr.msra.gmra.mrb[32].mxu0 %vm603_vm0, %v3227_v10 }
 0x83e   : > { %v3195_v6 = vpop.permute.xlu0 %3194  ;;  %v3229_v18 = vsel %vm783_vm1, %v9395_v7, %v3197_v22 }
 0x83f   : > { %v3228_v27 = vsel %vm783_vm1, %v9397_v60, %v3195_v6 }
 0x840   : > { %7287 = vmatprep.mubr.msk.f32.mxu0 %vm603_vm0, %v3228_v27 }
 0x841   : > { %7288 = vmatmul.mubr.msk.f32.gmra.mrb[34].mxu0 %vm603_vm0, %v3229_v18  ;;  %v3201_v25 = vpop.permute.xlu1 %3200 }
 0x842   : > { %v3199_v19 = vpop.permute.xlu0 %3198  ;;  %v3231_v1 = vsel %vm783_vm1, %v9403_v2, %v3201_v25 }
 0x843   : > { %v3230_v59 = vsel %vm783_vm1, %v9405_v3, %v3199_v19 }
 0x844   : > { %7290 = vmatprep.mubr.msk.f32.mxu0 %vm603_vm0, %v3230_v59 }
 0x845   : > { %v3205_v47 = vpop.permute.xlu1 %3204  ;;  %7291 = vmatmul.mubr.msk.f32.gmra.mrb[36].mxu0 %vm603_vm0, %v3231_v1 }
 0x846   : > { %v3203_v60 = vpop.permute.xlu0 %3202  ;;  %v3233_v62 = vsel %vm783_vm1, %v9399_v61, %v3205_v47 }
 0x847   : > { %v3232_v7 = vsel %vm783_vm1, %v9401_v0, %v3203_v60 }
 0x848   : > { %7293 = vmatprep.mubr.msk.f32.mxu0 %vm603_vm0, %v3232_v7 }
 0x849   : > { %7294 = vmatmul.mubr.msk.f32.gmra.mrb[38].mxu0 %vm603_vm0, %v3233_v62  ;;  %v3209_v3 = vpop.permute.xlu1 %3208 }
 0x84a   : > { %v3207_v40 = vpop.permute.xlu0 %3206  ;;  %v3235_v49 = vsel %vm783_vm1, %v9411_v42, %v3209_v3 }
 0x84b   : > { %v3234_v2 = vsel %vm783_vm1, %v9413_v8, %v3207_v40  ;;  %v6734_v8 = vld [vmem:[#allocation8] ss:$0 sm:$0xff] }
 0x84c   : > { %7296 = vmatprep.mubr.msk.f32.mxu0 %vm603_vm0, %v3234_v2 }
 0x84d   : > { %v3213_v15 = vpop.permute.xlu1 %3212  ;;  %7297 = vmatmul.mubr.msk.f32.gmra.mrb[40].mxu0 %vm603_vm0, %v3235_v49 }
 0x84e   : > { %v3211_v0 = vpop.permute.xlu0 %3210  ;;  %v3237_v44 = vsel %vm783_vm1, %v9407_v31, %v3213_v15 }
 0x84f   : > { %v3236_v61 = vsel %vm783_vm1, %v9409_v4, %v3211_v0 }
 0x850   : > { %7299 = vmatprep.mubr.msk.f32.mxu0 %vm603_vm0, %v3236_v61 }
 0x851   : > { %7300 = vmatmul.mubr.msk.f32.gmra.mrb[42].mxu0 %vm603_vm0, %v3237_v44 }
 0x910   : > { %v7286_v37 = vpop.f32.mrb[32].mxu0 }
 0x911   : > { %v3357_v21 = vadd.f32 %v7286_v37, %v6734_v8  ;;  %v3351_v42 = vpop.f32.mrb[33].mxu0 }
 0x912   : > { %v3352_v14 = vadd.f32 %v6734_v8, %v3351_v42 }
 0x913   : > { %v3415_v28 = vsel %vm603_vm0, %v3357_v21, 0.0 }
 0x914   : > { %3416 = vadd.xlane.f32.xlu1 %v3415_v28  ;;  %v7289_v20 = vpop.f32.mrb[34].mxu0  ;;  %v3412_v48 = vsel %vm603_vm0, %v3352_v14, 0.0 }
 0x915   : > { %v3361_v51 = vpop.f32.mrb[35].mxu0  ;;  %3413 = vadd.xlane.f32.xlu0 %v3412_v48  ;;  %v3367_v53 = vadd.f32 %v7289_v20, %v6734_v8 }
 0x916   : > { %v3362_v4 = vadd.f32 %v6734_v8, %v3361_v51 }
 0x917   : > { %v3421_v57 = vsel %vm603_vm0, %v3367_v53, 0.0 }
 0x918   : > { %v7292_v31 = vpop.f32.mrb[36].mxu0  ;;  %v3418_v33 = vsel %vm603_vm0, %v3362_v4, 0.0 }
 0x919   : > { %v3371_v35 = vpop.f32.mrb[37].mxu0  ;;  %3419 = vadd.xlane.f32.xlu0 %v3418_v33  ;;  %v3377_v41 = vadd.f32 %v7292_v31, %v6734_v8 }
 0x91a   : > { %v3372_v24 = vadd.f32 %v6734_v8, %v3371_v35 }
 0x91b   : > { %v3427_v12 = vsel %vm603_vm0, %v3377_v41, 0.0 }
 0x91c   : > { %v7295_v56 = vpop.f32.mrb[38].mxu0  ;;  %v3424_v30 = vsel %vm603_vm0, %v3372_v24, 0.0 }
 0x91d   : > { %v3381_v55 = vpop.f32.mrb[39].mxu0  ;;  %3425 = vadd.xlane.f32.xlu1 %v3424_v30  ;;  %3422 = vadd.xlane.f32.xlu0 %v3421_v57  ;;  %v9588_v29 = vadd.f32 %v7295_v56, %v6734_v8 }
 0x91e   : > { %v3382_v17 = vadd.f32 %v6734_v8, %v3381_v55 }
 0x91f   : > { %v3433_v26 = vsel %vm603_vm0, %v9588_v29, 0.0 }
 0x920   : > { %v7298_v58 = vpop.f32.mrb[40].mxu0  ;;  %v3430_v23 = vsel %vm603_vm0, %v3382_v17, 0.0 }
 0x921   : > { %v3391_v52 = vpop.f32.mrb[41].mxu0  ;;  %3431 = vadd.xlane.f32.xlu1 %v3430_v23  ;;  %3428 = vadd.xlane.f32.xlu0 %v3427_v12  ;;  %v9592_v63 = vadd.f32 %v7298_v58, %v6734_v8 }
 0x922   : > { %v3392_v13 = vadd.f32 %v6734_v8, %v3391_v52 }
 0x923   : > { %v3439_v36 = vsel %vm603_vm0, %v9592_v63, 0.0 }
 0x924   : > { %v7301_v38 = vpop.f32.mrb[42].mxu0  ;;  %v3436_v16 = vsel %vm603_vm0, %v3392_v13, 0.0 }
 0x925   : > { %v3401_v9 = vpop.f32.mrb[43].mxu0  ;;  %3437 = vadd.xlane.f32.xlu1 %v3436_v16  ;;  %3434 = vadd.xlane.f32.xlu0 %v3433_v26  ;;  %v9597_v5 = vadd.f32 %v7301_v38, %v6734_v8 }
 0x926   : > { %v3402_v32 = vadd.f32 %v6734_v8, %v3401_v9 }
 0x927   : > { %v3445_v39 = vsel %vm603_vm0, %v9597_v5, 0.0 }
 0x928   : > { %v3442_v34 = vsel %vm603_vm0, %v3402_v32, 0.0 }
 0x929   : > { %3443 = vadd.xlane.f32.xlu1 %v3442_v34  ;;  %3440 = vadd.xlane.f32.xlu0 %v3439_v36  ;;  %v3605_v36 = vld [vmem:[#allocation13] sm:$0xff] }
 0x92d   : > { %3446 = vadd.xlane.f32.xlu0 %v3445_v39  ;;  %v3606_v39 = vld [vmem:[#allocation13 + $0x8] sm:$0xff] }
 0x9a1   : > { %v3417_v46 = vpop.xlane.xlu1 %3416 }
 0x9a2   : > { %v3450_v50 = vmul.f32 0.03125, %v3417_v46  ;;  %v3414_v43 = vpop.xlane.xlu0 %3413  ;;  %v7697_v46 = vpack.c.bf16 %v3606_v39, %v3605_v36 }
 0x9a3   : > { %v3449_v45 = vmul.f32 0.03125, %v3414_v43 }
 0x9a4   : > { %v9604_v11 = vsub.f32 %v3357_v21, %v3450_v50  ;;  %7698 = vmatprep.subr.bf16.mxu1 %v7697_v46  ;;  %v3607_v50 = vld [vmem:[#allocation13 + $0x10] sm:$0xff] }
 0x9a5   : > { %v9606_v10 = vsub.f32 %v3352_v14, %v3449_v45  ;;  %7700 = vmatpush3.bf16.msra.mxu1 %v7697_v46 }
 0x9a6   : > { %v3420_v22 = vpop.xlane.xlu0 %3419  ;;  %v3474_v6 = vmul.f32 %v9604_v11, %v9604_v11 }
 0x9a7   : > { %v3451_v27 = vmul.f32 0.03125, %v3420_v22  ;;  %v3473_v18 = vmul.f32 %v9606_v10, %v9606_v10 }
 0x9a8   : > { %v3488_v25 = vsel %vm603_vm0, %v3474_v6, 0.0 }
 0x9a9   : > { %v9613_v19 = vsub.f32 %v3362_v4, %v3451_v27  ;;  %3489 = vadd.xlane.f32.xlu0 %v3488_v25  ;;  %v3485_v59 = vsel %vm603_vm0, %v3473_v18, 0.0 }
 0x9aa   : > { %v3426_v1 = vpop.xlane.xlu1 %3425  ;;  %3486 = vadd.xlane.f32.xlu1 %v3485_v59  ;;  %v3423_v47 = vpop.xlane.xlu0 %3422 }
 0x9ab   : > { %v3453_v60 = vmul.f32 0.03125, %v3426_v1  ;;  %v3452_v7 = vmul.f32 0.03125, %v3423_v47  ;;  %v3475_v62 = vmul.f32 %v9613_v19, %v9613_v19 }
 0x9ad   : > { %v9618_v3 = vsub.f32 %v3372_v24, %v3453_v60  ;;  %v9620_v40 = vsub.f32 %v3367_v53, %v3452_v7  ;;  %v3491_v2 = vsel %vm603_vm0, %v3475_v62, 0.0 }
 0x9ae   : > { %v3432_v49 = vpop.xlane.xlu1 %3431  ;;  %3492 = vadd.xlane.f32.xlu1 %v3491_v2  ;;  %v3429_v15 = vpop.xlane.xlu0 %3428 }
 0x9af   : > { %v3455_v0 = vmul.f32 0.03125, %v3432_v49  ;;  %v3454_v61 = vmul.f32 0.03125, %v3429_v15  ;;  %v3477_v44 = vmul.f32 %v9618_v3, %v9618_v3  ;;  %v3476_v8 = vmul.f32 %v9620_v40, %v9620_v40 }
 0x9b1   : > { %v9627_v37 = vsub.f32 %v3382_v17, %v3455_v0  ;;  %v9629_v21 = vsub.f32 %v3377_v41, %v3454_v61  ;;  %v3497_v42 = vsel %vm603_vm0, %v3477_v44, 0.0  ;;  %v3494_v14 = vsel %vm603_vm0, %v3476_v8, 0.0 }
 0x9b2   : > { %v3438_v28 = vpop.xlane.xlu1 %3437  ;;  %3498 = vadd.xlane.f32.xlu1 %v3497_v42  ;;  %3495 = vadd.xlane.f32.xlu0 %v3494_v14  ;;  %v3435_v20 = vpop.xlane.xlu0 %3434  ;;  %v9667_v14 = vld [vmem:[#allocation10] ss:$0 sm:$0xff] }
 0x9b3   : > { %v3457_v48 = vmul.f32 0.03125, %v3438_v28  ;;  %v3456_v51 = vmul.f32 0.03125, %v3435_v20  ;;  %v3479_v4 = vmul.f32 %v9627_v37, %v9627_v37  ;;  %v3478_v53 = vmul.f32 %v9629_v21, %v9629_v21 }
 0x9b5   : > { %v9637_v31 = vsub.f32 %v3392_v13, %v3457_v48  ;;  %v9640_v33 = vsub.f32 %v9588_v29, %v3456_v51  ;;  %v3503_v35 = vsel %vm603_vm0, %v3479_v4, 0.0  ;;  %v3500_v24 = vsel %vm603_vm0, %v3478_v53, 0.0 }
 0x9b6   : > { %v3444_v41 = vpop.xlane.xlu1 %3443  ;;  %3504 = vadd.xlane.f32.xlu1 %v3503_v35  ;;  %3501 = vadd.xlane.f32.xlu0 %v3500_v24  ;;  %v3441_v56 = vpop.xlane.xlu0 %3440 }
 0x9b7   : > { %v3459_v30 = vmul.f32 0.03125, %v3444_v41  ;;  %v3458_v57 = vmul.f32 0.03125, %v3441_v56  ;;  %v3481_v55 = vmul.f32 %v9637_v31, %v9637_v31  ;;  %v3480_v17 = vmul.f32 %v9640_v33, %v9640_v33  ;;  %v9671_v56 = vld [vmem:[#allocation11] ss:$0 sm:$0xff] }
 0x9b9   : > { %v9648_v58 = vsub.f32 %v3402_v32, %v3459_v30  ;;  %v9651_v29 = vsub.f32 %v9592_v63, %v3458_v57  ;;  %v3509_v23 = vsel %vm603_vm0, %v3481_v55, 0.0  ;;  %v3506_v12 = vsel %vm603_vm0, %v3480_v17, 0.0 }
 0x9ba   : > { %3510 = vadd.xlane.f32.xlu1 %v3509_v23  ;;  %3507 = vadd.xlane.f32.xlu0 %v3506_v12  ;;  %v3447_v52 = vpop.xlane.xlu0 %3446 }
 0x9bb   : > { %v3460_v13 = vmul.f32 0.03125, %v3447_v52  ;;  %v3483_v38 = vmul.f32 %v9648_v58, %v9648_v58  ;;  %v3482_v16 = vmul.f32 %v9651_v29, %v9651_v29 }
 0x9bd   : > { %v9660_v26 = vsub.f32 %v9597_v5, %v3460_v13  ;;  %v3515_v63 = vsel %vm603_vm0, %v3483_v38, 0.0  ;;  %v3512_v9 = vsel %vm603_vm0, %v3482_v16, 0.0  ;;  %v3608_v5 = vld [vmem:[#allocation13 + $0x18] sm:$0xff] }
 0x9be   : > { %3516 = vadd.xlane.f32.xlu1 %v3515_v63  ;;  %3513 = vadd.xlane.f32.xlu0 %v3512_v9  ;;  %v7701_v43 = vpack.c.bf16 %v3608_v5, %v3607_v50 }
 0x9bf   : > { %v3484_v32 = vmul.f32 %v9660_v26, %v9660_v26 }
 0x9c0   : > { %7702 = vmatprep.subr.bf16.mxu1 %v7701_v43 }
 0x9c1   : > { %v3518_v34 = vsel %vm603_vm0, %v3484_v32, 0.0  ;;  %7704 = vmatpush3.bf16.msra.mxu1 %v7701_v43 }
 0x9c2   : > { %3519 = vadd.xlane.f32.xlu0 %v3518_v34 }
 0xa36   : > { %v3490_v45 = vpop.xlane.xlu0 %3489 }
 0xa37   : > { %v3522_v22 = vmul.f32 0.03125, %v3490_v45  ;;  %v3487_v6 = vpop.xlane.xlu1 %3486 }
 0xa38   : > { %v3521_v27 = vmul.f32 0.03125, %v3487_v6 }
 0xa39   : > { %v3534_v18 = vadd.f32 1e-05, %v3522_v22 }
 0xa3a   : > { %v3533_v25 = vadd.f32 1e-05, %v3521_v27 }
 0xa3b   : > { %8245 = vrsqrt.f32 %v3534_v18  ;;  %v3493_v59 = vpop.xlane.xlu1 %3492 }
 0xa3c   : > { %8247 = vrsqrt.f32 %v3533_v25  ;;  %v3523_v1 = vmul.f32 0.03125, %v3493_v59 }
 0xa3e   : > { %v3535_v47 = vadd.f32 1e-05, %v3523_v1 }
 0xa3f   : > { %v3499_v60 = vpop.xlane.xlu1 %3498  ;;  %v3496_v7 = vpop.xlane.xlu0 %3495 }
 0xa40   : > { %8249 = vrsqrt.f32 %v3535_v47  ;;  %v3525_v62 = vmul.f32 0.03125, %v3499_v60  ;;  %v3524_v2 = vmul.f32 0.03125, %v3496_v7 }
 0xa42   : > { %v3537_v49 = vadd.f32 1e-05, %v3525_v62  ;;  %v3536_v15 = vadd.f32 1e-05, %v3524_v2 }
 0xa43   : > { %v3505_v0 = vpop.xlane.xlu1 %3504  ;;  %v3502_v61 = vpop.xlane.xlu0 %3501 }
 0xa44   : > { %8251 = vrsqrt.f32 %v3537_v49  ;;  %v3527_v44 = vmul.f32 0.03125, %v3505_v0  ;;  %v3526_v8 = vmul.f32 0.03125, %v3502_v61 }
 0xa45   : > { %v8246_v42 = vpop.eup %8245  ;;  %8253 = vrsqrt.f32 %v3536_v15 }
 0xa46   : > { %v8248_v28 = vpop.eup %8247  ;;  %v3558_v20 = vmul.f32 %v8246_v42, %v9604_v11  ;;  %v3539_v48 = vadd.f32 1e-05, %v3527_v44  ;;  %v3538_v51 = vadd.f32 1e-05, %v3526_v8 }
 0xa47   : > { %v3511_v4 = vpop.xlane.xlu1 %3510  ;;  %v3508_v53 = vpop.xlane.xlu0 %3507  ;;  %v3557_v35 = vmul.f32 %v8248_v28, %v9606_v10 }
 0xa48   : > { %8255 = vrsqrt.f32 %v3539_v48  ;;  %v3529_v24 = vmul.f32 0.03125, %v3511_v4  ;;  %v3528_v41 = vmul.f32 0.03125, %v3508_v53  ;;  %v3576_v30 = vmul.f32 %v9667_v14, %v3558_v20 }
 0xa49   : > { %8257 = vrsqrt.f32 %v3538_v51  ;;  %v3575_v57 = vmul.f32 %v9667_v14, %v3557_v35  ;;  %v8655_v4 = vmov 0.0|0.0   ;;  %v8657_v53 = vmov 0.0  }
 0xa4a   : > { %v8250_v55 = vpop.eup %8249  ;;  %v3541_v17 = vadd.f32 1e-05, %v3529_v24  ;;  %v3540_v23 = vadd.f32 1e-05, %v3528_v41  ;;  %v3594_v16 = vadd.f32 %v9671_v56, %v3576_v30  ;;  %7705 = vmatprep.subr.bf16.mxu0 %v8655_v4  ;;  %7709 = vmatprep.subr.bf16.mxu1 %v8655_v4 }
 0xa4b   : > { %v3517_v11 = vpop.xlane.xlu1 %3516  ;;  %v3514_v12 = vpop.xlane.xlu0 %3513  ;;  %v3593_v52 = vadd.f32 %v9671_v56, %v3575_v57  ;;  %v3559_v13 = vmul.f32 %v8250_v55, %v9613_v19  ;;  %7332 = vmatprep.mubr.msk.f32.mxu0 %vm10195_vm3, %v8657_v53  ;;  %v3777_v57 = vld [vmem:[%s10235_s26] sm:$0xf] }
 0xa4c   : > { %8259 = vrsqrt.f32 %v3541_v17  ;;  %v3531_v10 = vmul.f32 0.03125, %v3517_v11  ;;  %v3530_v38 = vmul.f32 0.03125, %v3514_v12  ;;  %v9735_v11 = vmul.f32 0.25, %v3777_v57 }
 0xa4d   : > { %8261 = vrsqrt.f32 %v3540_v23  ;;  %7310 = vmatprep.mubr.msk.f32.mxu1 %vm603_vm0, %v3593_v52  ;;  %v3577_v63 = vmul.f32 %v9667_v14, %v3559_v13 }
 0xa4e   : > { %v8252_v9 = vpop.eup %8251  ;;  %v3543_v32 = vadd.f32 1e-05, %v3531_v10  ;;  %v3542_v34 = vadd.f32 1e-05, %v3530_v38  ;;  %7311 = vmatmul.mubr.msk.f32.vlgmr.msra.gmra.mrb[28].mxu1 %vm603_vm0, %v3594_v16 }
 0xa4f   : > { %v8254_v36 = vpop.eup %8253  ;;  %v3520_v39 = vpop.xlane.xlu0 %3519  ;;  %v3595_v46 = vadd.f32 %v9671_v56, %v3577_v63  ;;  %v3561_v19 = vmul.f32 %v8252_v9, %v9618_v3 }
 0xa50   : > { %8263 = vrsqrt.f32 %v3543_v32  ;;  %v3532_v50 = vmul.f32 0.03125, %v3520_v39  ;;  %v3560_v5 = vmul.f32 %v8254_v36, %v9620_v40 }
 0xa51   : > { %8265 = vrsqrt.f32 %v3542_v34  ;;  %7313 = vmatprep.mubr.msk.f32.mxu1 %vm603_vm0, %v3595_v46  ;;  %v3579_v43 = vmul.f32 %v9667_v14, %v3561_v19 }
 0xa52   : > { %v8256_v45 = vpop.eup %8255  ;;  %v3544_v22 = vadd.f32 1e-05, %v3532_v50  ;;  %v3578_v6 = vmul.f32 %v9667_v14, %v3560_v5 }
 0xa53   : > { %v8258_v27 = vpop.eup %8257  ;;  %v3597_v18 = vadd.f32 %v9671_v56, %v3579_v43  ;;  %v3563_v25 = vmul.f32 %v8256_v45, %v9627_v37 }
 0xa54   : > { %8267 = vrsqrt.f32 %v3544_v22  ;;  %v3596_v3 = vadd.f32 %v9671_v56, %v3578_v6  ;;  %v3562_v59 = vmul.f32 %v8258_v27, %v9629_v21 }
 0xa55   : > { %v3581_v40 = vmul.f32 %v9667_v14, %v3563_v25 }
 0xa56   : > { %v8260_v1 = vpop.eup %8259  ;;  %7314 = vmatmul.mubr.msk.f32.gmra.mrb[30].mxu1 %vm603_vm0, %v3596_v3  ;;  %v3580_v47 = vmul.f32 %v9667_v14, %v3562_v59 }
 0xa57   : > { %v8262_v60 = vpop.eup %8261  ;;  %7316 = vmatprep.mubr.msk.f32.mxu1 %vm603_vm0, %v3597_v18  ;;  %v3599_v7 = vadd.f32 %v9671_v56, %v3581_v40  ;;  %v3565_v62 = vmul.f32 %v8260_v1, %v9637_v31 }
 0xa58   : > { %v3598_v37 = vadd.f32 %v9671_v56, %v3580_v47  ;;  %v3564_v2 = vmul.f32 %v8262_v60, %v9640_v33 }
 0xa59   : > { %v3583_v21 = vmul.f32 %v9667_v14, %v3565_v62 }
 0xa5a   : > { %v8264_v49 = vpop.eup %8263  ;;  %7317 = vmatmul.mubr.msk.f32.gmra.mrb[32].mxu1 %vm603_vm0, %v3598_v37  ;;  %v3582_v15 = vmul.f32 %v9667_v14, %v3564_v2 }
 0xa5b   : > { %v8266_v0 = vpop.eup %8265  ;;  %7319 = vmatprep.mubr.msk.f32.mxu1 %vm603_vm0, %v3599_v7  ;;  %v3601_v61 = vadd.f32 %v9671_v56, %v3583_v21  ;;  %v3567_v44 = vmul.f32 %v8264_v49, %v9648_v58 }
 0xa5c   : > { %v3600_v31 = vadd.f32 %v9671_v56, %v3582_v15  ;;  %v3566_v8 = vmul.f32 %v8266_v0, %v9651_v29 }
 0xa5d   : > { %v3585_v33 = vmul.f32 %v9667_v14, %v3567_v44 }
 0xa5e   : > { %v8268_v42 = vpop.eup %8267  ;;  %7320 = vmatmul.mubr.msk.f32.gmra.mrb[34].mxu1 %vm603_vm0, %v3600_v31  ;;  %v3584_v28 = vmul.f32 %v9667_v14, %v3566_v8 }
 0xa5f   : > { %7322 = vmatprep.mubr.msk.f32.mxu1 %vm603_vm0, %v3601_v61  ;;  %v3603_v20 = vadd.f32 %v9671_v56, %v3585_v33  ;;  %v3568_v48 = vmul.f32 %v8268_v42, %v9660_v26  ;;  %v6749_v26 = vld [vmem:[#allocation14] ss:$0 sm:$0xff] }
 0xa60   : > { %v3602_v51 = vadd.f32 %v9671_v56, %v3584_v28 }
 0xa61   : > { %v3586_v58 = vmul.f32 %v9667_v14, %v3568_v48 }
 0xa62   : > { %7323 = vmatmul.mubr.msk.f32.gmra.mrb[36].mxu1 %vm603_vm0, %v3602_v51 }
 0xa63   : > { %7325 = vmatprep.mubr.msk.f32.mxu1 %vm603_vm0, %v3603_v20  ;;  %v3604_v29 = vadd.f32 %v9671_v56, %v3586_v58 }
 0xa66   : > { %7326 = vmatmul.mubr.msk.f32.gmra.mrb[38].mxu1 %vm603_vm0, %v3604_v29 }
 0xa67   : > { %7339 = vmatprep.mubr.msk.f32.mxu1 %vm10195_vm3, %v8657_v53 }
 0xb21   : > { %v7312_v14 = vpop.f32.mrb[28].mxu1 }
 0xb22   : > { %v3724_v35 = vadd.f32 %v7312_v14, %v6749_v26  ;;  %v3718_v24 = vpop.f32.mrb[29].mxu1 }
 0xb23   : > { %v3719_v41 = vadd.f32 %v6749_v26, %v3718_v24 }
 0xb25   : > { %v7706_v56 = vpack.c.bf16 %v3724_v35, %v3719_v41  ;;  %v9725_v30 = vpack.i.bf16 %v3724_v35, %v3719_v41 }
 0xb27   : > { %8060 = vrot.lane.b32.xlu1 %v9725_v30, %s8649_s10  ;;  %7708 = vmatpush3.bf16.xpose.msk.msra.mxu0 %vm9111_vm2, %v7706_v56 }
 0xb28   : > { %7713 = vmatprep.subr.bf16.mxu0 %v8655_v4 }
 0xb29   : > { %v7315_v55 = vpop.f32.mrb[30].mxu1 }
 0xb2a   : > { %v3734_v17 = vadd.f32 %v7315_v55, %v6749_v26  ;;  %v3728_v23 = vpop.f32.mrb[31].mxu1 }
 0xb2b   : > { %v3729_v12 = vadd.f32 %v6749_v26, %v3728_v23 }
 0xb2d   : > { %v7710_v52 = vpack.c.bf16 %v3734_v17, %v3729_v12  ;;  %v7318_v13 = vpop.f32.mrb[32].mxu1  ;;  %v9737_v10 = vpack.i.bf16 %v3734_v17, %v3729_v12 }
 0xb2e   : > { %v3744_v38 = vadd.f32 %v7318_v13, %v6749_v26  ;;  %v3738_v16 = vpop.f32.mrb[33].mxu1  ;;  %7333 = vmatmul.mubr.msk.f32.vlgmr.msra.gmra.mrb[44].mxu0 %vm783_vm1, %v9735_v11 }
 0xb2f   : > { %v3739_v63 = vadd.f32 %v6749_v26, %v3738_v16  ;;  %8065 = vrot.lane.b32.xlu0 %v9737_v10, %s8649_s10  ;;  %7712 = vmatpush3.bf16.xpose.msk.msra.mxu1 %vm9111_vm2, %v7710_v52 }
 0xb30   : > { %7717 = vmatprep.subr.bf16.mxu1 %v8655_v4  ;;  %7346 = vmatprep.mubr.msk.f32.mxu0 %vm10195_vm3, %v8657_v53 }
 0xb31   : > { %v7714_v9 = vpack.c.bf16 %v3744_v38, %v3739_v63  ;;  %v7321_v32 = vpop.f32.mrb[34].mxu1  ;;  %v9748_v34 = vpack.i.bf16 %v3744_v38, %v3739_v63 }
 0xb32   : > { %v3754_v36 = vadd.f32 %v7321_v32, %v6749_v26  ;;  %v3748_v39 = vpop.f32.mrb[35].mxu1 }
 0xb33   : > { %v3749_v46 = vadd.f32 %v6749_v26, %v3748_v39  ;;  %8070 = vrot.lane.b32.xlu1 %v9748_v34, %s8649_s10  ;;  %7716 = vmatpush3.bf16.xpose.msk.msra.mxu0 %vm9111_vm2, %v7714_v9 }
 0xb34   : > { %7721 = vmatprep.subr.bf16.mxu0 %v8655_v4 }
 0xb35   : > { %v7718_v19 = vpack.c.bf16 %v3754_v36, %v3749_v46  ;;  %v7324_v50 = vpop.f32.mrb[36].mxu1  ;;  %v9755_v5 = vpack.i.bf16 %v3754_v36, %v3749_v46 }
 0xb36   : > { %v3764_v43 = vadd.f32 %v7324_v50, %v6749_v26  ;;  %v3758_v45 = vpop.f32.mrb[37].mxu1  ;;  %7340 = vmatmul.mubr.msk.f32.vlgmr.msra.gmra.mrb[40].mxu1 %vm783_vm1, %v9735_v11 }
 0xb37   : > { %v3759_v22 = vadd.f32 %v6749_v26, %v3758_v45  ;;  %8075 = vrot.lane.b32.xlu1 %v9755_v5, %s8649_s10  ;;  %7720 = vmatpush3.bf16.xpose.msk.msra.mxu1 %vm9111_vm2, %v7718_v19 }
 0xb38   : > { %7353 = vmatprep.mubr.msk.f32.mxu1 %vm10195_vm3, %v8657_v53  ;;  %7725 = vmatprep.subr.bf16.mxu1 %v8655_v4 }
 0xb39   : > { %v7722_v6 = vpack.c.bf16 %v3764_v43, %v3759_v22  ;;  %v7327_v27 = vpop.f32.mrb[38].mxu1  ;;  %v9766_v18 = vpack.i.bf16 %v3764_v43, %v3759_v22 }
 0xb3a   : > { %v3774_v25 = vadd.f32 %v7327_v27, %v6749_v26  ;;  %v3768_v3 = vpop.f32.mrb[39].mxu1  ;;  %7347 = vmatmul.mubr.msk.f32.vlgmr.msra.gmra.mrb[46].mxu0 %vm783_vm1, %v9735_v11 }
 0xb3b   : > { %v3769_v59 = vadd.f32 %v6749_v26, %v3768_v3  ;;  %7724 = vmatpush3.bf16.xpose.msk.msra.mxu0 %vm9111_vm2, %v7722_v6  ;;  %7360 = vmatprep.mubr.msk.f32.mxu0 %vm10195_vm3, %v8657_v53 }
 0xb3c   : > { %7729 = vmatprep.subr.bf16.mxu0 %v8655_v4 }
 0xb3d   : > { %v7726_v40 = vpack.c.bf16 %v3774_v25, %v3769_v59  ;;  %v9775_v1 = vpack.i.bf16 %v3774_v25, %v3769_v59 }
 0xb3e   : > { %7354 = vmatmul.mubr.msk.f32.vlgmr.msra.gmra.mrb[42].mxu1 %vm783_vm1, %v9735_v11 }
 0xb3f   : > { %7728 = vmatpush3.bf16.xpose.msk.msra.mxu1 %vm9111_vm2, %v7726_v40  ;;  %7367 = vmatprep.mubr.msk.f32.mxu1 %vm10195_vm3, %v8657_v53 }
 0xb40   : > { %7732 = vmatprep.subr.bf16.mxu1 %v8655_v4 }
 0xb42   : > { %7361 = vmatmul.mubr.msk.f32.vlgmr.msra.gmra.mrb[48].mxu0 %vm783_vm1, %v9735_v11 }
 0xb43   : > { %7374 = vmatprep.mubr.msk.f32.mxu0 %vm10195_vm3, %v8657_v53 }
 0xb46   : > { %7368 = vmatmul.mubr.msk.f32.vlgmr.msra.gmra.mrb[44].mxu1 %vm783_vm1, %v9735_v11 }
 0xb47   : > { %7381 = vmatprep.mubr.msk.f32.mxu1 %vm10195_vm3, %v8657_v53 }
 0xb99   : > { %v8061_v47 = vpop.permute.xlu1 %8060 }
 0xb9a   : > { %v8063_v60 = vunpack.i.h.bf16 %v8061_v47  ;;  %v8062_v7 = vunpack.i.l.bf16 %v8061_v47 }
 0xb9c   : > { %v7730_v62 = vpack.c.bf16 %v8063_v60, %v8062_v7 }
 0xb9e   : > { %7731 = vmatpush3.bf16.msra.mxu0 %v7730_v62 }
 0xb9f   : > { %7735 = vmatprep.subr.bf16.mxu0 %v8655_v4 }
 0xba1   : > { %v8066_v37 = vpop.permute.xlu0 %8065 }
 0xba2   : > { %v8068_v2 = vunpack.i.h.bf16 %v8066_v37  ;;  %v8067_v21 = vunpack.i.l.bf16 %v8066_v37 }
 0xba4   : > { %v7733_v49 = vpack.c.bf16 %v8068_v2, %v8067_v21 }
 0xba5   : > { %v9804_v41 = vpop.permute.xlu1 %8070 }
 0xba6   : > { %7734 = vmatpush3.bf16.msra.mxu1 %v7733_v49 }
 0xba7   : > { %7738 = vmatprep.subr.bf16.mxu1 %v8655_v4 }
 0xba9   : > { %v9806_v56 = vpop.permute.xlu1 %8075 }
 0xc01   : > { %v3854_v15 = vpop.f32.mrb[44].mxu0 }
 0xc02   : > { %v4239_v0 = vsel %vm4238_vm4, %v3854_v15, -inf  ;;  %v7334_v61 = vpop.f32.mrb[45].mxu0 }
 0xc03   : > { %4240 = vmax.xlane.f32.xlu1 %v4239_v0  ;;  %v8072_v0 = vunpack.i.l.bf16 %v9804_v41 }
 0xc09   : > { %v3930_v44 = vpop.f32.mrb[40].mxu1 }
 0xc0a   : > { %v4242_v31 = vsel %vm4238_vm4, %v3930_v44, -inf  ;;  %v7341_v8 = vpop.f32.mrb[41].mxu1 }
 0xc0b   : > { %4243 = vmax.xlane.f32.xlu0 %v4242_v31 }
 0xc0d   : > { %v4006_v33 = vpop.f32.mrb[46].mxu0 }
 0xc0e   : > { %v4245_v42 = vsel %vm4238_vm4, %v4006_v33, -inf  ;;  %v7348_v28 = vpop.f32.mrb[47].mxu0 }
 0xc0f   : > { %4246 = vmax.xlane.f32.xlu1 %v4245_v42  ;;  %v8077_v42 = vunpack.i.l.bf16 %v9806_v56 }
 0xc11   : > { %v4082_v20 = vpop.f32.mrb[42].mxu1 }
 0xc12   : > { %v4248_v48 = vsel %vm4238_vm4, %v4082_v20, -inf  ;;  %v7355_v51 = vpop.f32.mrb[43].mxu1 }
 0xc13   : > { %4249 = vmax.xlane.f32.xlu0 %v4248_v48 }
 0xc15   : > { %v4158_v58 = vpop.f32.mrb[48].mxu0 }
 0xc16   : > { %v4251_v29 = vsel %vm4238_vm4, %v4158_v58, -inf  ;;  %v7362_v26 = vpop.f32.mrb[49].mxu0 }
 0xc17   : > { %4252 = vmax.xlane.f32.xlu1 %v4251_v29 }
 0xc19   : > { %v4234_v14 = vpop.f32.mrb[44].mxu1 }
 0xc1a   : > { %v4254_v35 = vsel %vm4238_vm4, %v4234_v14, -inf  ;;  %v7369_v24 = vpop.f32.mrb[45].mxu1 }
 0xc1b   : > { %4255 = vmax.xlane.f32.xlu0 %v4254_v35 }
 0xc28   : > { %8085 = vrot.lane.b32.xlu1 %v9775_v1, %s8649_s10 }
 0xc31   : > { %8080 = vrot.lane.b32.xlu0 %v9766_v18, %s8649_s10 }
 0xc90   : > { %v4241_v57 = vpop.xlane.xlu1 %4240 }
 0xc91   : > { %v4257_v55 = vsub.f32 %v3854_v15, %v4241_v57  ;;  %v8073_v15 = vunpack.i.h.bf16 %v9804_v41 }
 0xc93   : > { %v4263_v17 = vmul.f32 1.442695, %v4257_v55  ;;  %v7736_v8 = vpack.c.bf16 %v8073_v15, %v8072_v0 }
 0xc95   : > { %8269 = vpow2.f32 %v4263_v17 }
 0xc98   : > { %v4244_v23 = vpop.xlane.xlu0 %4243 }
 0xc99   : > { %v4258_v12 = vsub.f32 %v3930_v44, %v4244_v23 }
 0xc9b   : > { %v4265_v52 = vmul.f32 1.442695, %v4258_v12 }
 0xc9c   : > { %v4247_v13 = vpop.xlane.xlu1 %4246 }
 0xc9d   : > { %8271 = vpow2.f32 %v4265_v52  ;;  %v4259_v38 = vsub.f32 %v4006_v33, %v4247_v13  ;;  %v8078_v33 = vunpack.i.h.bf16 %v9806_v56 }
 0xc9f   : > { %v8270_v16 = vpop.eup %8269  ;;  %v4267_v63 = vmul.f32 1.442695, %v4259_v38  ;;  %v7739_v48 = vpack.c.bf16 %v8078_v33, %v8077_v42 }
 0xca0   : > { %v4250_v9 = vpop.xlane.xlu0 %4249  ;;  %v4275_v32 = vsel %vm4238_vm4, %v8270_v16, 0.0 }
 0xca1   : > { %8273 = vpow2.f32 %v4267_v63  ;;  %v4260_v36 = vsub.f32 %v4082_v20, %v4250_v9  ;;  %4276 = vadd.xlane.f32.xlu1 %v4275_v32 }
 0xca3   : > { %v4269_v39 = vmul.f32 1.442695, %v4260_v36 }
 0xca4   : > { %v4253_v6 = vpop.xlane.xlu1 %4252 }
 0xca5   : > { %8275 = vpow2.f32 %v4269_v39  ;;  %v4261_v27 = vsub.f32 %v4158_v58, %v4253_v6 }
 0xca7   : > { %v8272_v46 = vpop.eup %8271  ;;  %v4271_v3 = vmul.f32 1.442695, %v4261_v27 }
 0xca8   : > { %v4278_v19 = vsel %vm4238_vm4, %v8272_v46, 0.0  ;;  %v4256_v25 = vpop.xlane.xlu0 %4255  ;;  %v8086_v37 = vpop.permute.xlu1 %8085 }
 0xca9   : > { %4279 = vadd.xlane.f32.xlu0 %v4278_v19  ;;  %v4262_v59 = vsub.f32 %v4234_v14, %v4256_v25  ;;  %8277 = vpow2.f32 %v4271_v3  ;;  %v8088_v14 = vunpack.i.h.bf16 %v8086_v37  ;;  %v8087_v35 = vunpack.i.l.bf16 %v8086_v37 }
 0xcab   : > { %v8274_v50 = vpop.eup %8273  ;;  %v4273_v40 = vmul.f32 1.442695, %v4262_v59  ;;  %v7745_v57 = vpack.c.bf16 %v8088_v14, %v8087_v35 }
 0xcac   : > { %v4281_v43 = vsel %vm4238_vm4, %v8274_v50, 0.0  ;;  %v8081_v21 = vpop.permute.xlu0 %8080 }
 0xcad   : > { %4282 = vadd.xlane.f32.xlu1 %v4281_v43  ;;  %8279 = vpow2.f32 %v4273_v40  ;;  %v8083_v51 = vunpack.i.h.bf16 %v8081_v21  ;;  %v8082_v58 = vunpack.i.l.bf16 %v8081_v21 }
 0xcaf   : > { %v9811_v45 = vpop.eup %8275  ;;  %v7742_v24 = vpack.c.bf16 %v8083_v51, %v8082_v58 }
 0xcb0   : > { %v4284_v22 = vsel %vm4238_vm4, %v9811_v45, 0.0 }
 0xcb1   : > { %4285 = vadd.xlane.f32.xlu0 %v4284_v22 }
 0xcb3   : > { %v9819_v47 = vpop.eup %8277 }
 0xcb4   : > { %v4287_v60 = vsel %vm4238_vm4, %v9819_v47, 0.0 }
 0xcb7   : > { %v9823_v7 = vpop.eup %8279 }
 0xcb8   : > { %v4290_v62 = vsel %vm4238_vm4, %v9823_v7, 0.0 }
 0xcbe   : > { %8095 = vrot.lane.b32.xlu1 %v9737_v10, %s8652_s17 }
 0xcc7   : > { %8090 = vrot.lane.b32.xlu0 %v9725_v30, %s8652_s17 }
 0xce2   : > { %4288 = vadd.xlane.f32.xlu1 %v4287_v60 }
 0xce6   : > { %4291 = vadd.xlane.f32.xlu0 %v4290_v62 }
 0xcf3   : > { %8105 = vrot.lane.b32.xlu1 %v9755_v5, %s8652_s17 }
 0xcf7   : > { %8110 = vrot.lane.b32.xlu1 %v9766_v18, %s8652_s17 }
 0xcfc   : > { %8100 = vrot.lane.b32.xlu0 %v9748_v34, %s8652_s17 }
 0xd00   : > { %4779 = vrot.lane.b32.xlu0 %v9735_v11, %s8652_s17 }
 0xd04   : > { %8115 = vrot.lane.b32.xlu0 %v9775_v1, %s8652_s17 }
 0xd2e   : > { %v4277_v2 = vpop.xlane.xlu1 %4276 }
 0xd2f   : > { %8281 = vrcp.f32 %v4277_v2 }
 0xd36   : > { %v4280_v49 = vpop.xlane.xlu0 %4279 }
 0xd37   : > { %8283 = vrcp.f32 %v4280_v49 }
 0xd39   : > { %v8282_v61 = vpop.eup %8281 }
 0xd3a   : > { %v4299_v44 = vmul.f32 %v8282_v61, %v8270_v16  ;;  %v4283_v31 = vpop.xlane.xlu1 %4282 }
 0xd3b   : > { %8285 = vrcp.f32 %v4283_v31 }
 0xd3c   : > { %7375 = vmatmul.mubr.msk.f32.vlgmr.msra.gmra.mrb[50].mxu0 %vm783_vm1, %v4299_v44 }
 0xd3d   : > { %7737 = vmatpush3.bf16.msra.mxu0 %v7736_v8  ;;  %7388 = vmatprep.mubr.msk.f32.mxu0 %vm10195_vm3, %v8657_v53 }
 0xd3e   : > { %v4286_v11 = vpop.xlane.xlu0 %4285  ;;  %7741 = vmatprep.subr.bf16.mxu0 %v8655_v4  ;;  %v8096_v55 = vpop.permute.xlu1 %8095 }
 0xd3f   : > { %8287 = vrcp.f32 %v4286_v11  ;;  %v8098_v63 = vunpack.i.h.bf16 %v8096_v55  ;;  %v8097_v9 = vunpack.i.l.bf16 %v8096_v55 }
 0xd41   : > { %v8284_v28 = vpop.eup %8283 }
 0xd42   : > { %v4300_v20 = vmul.f32 %v8284_v28, %v8272_v46  ;;  %v8091_v17 = vpop.permute.xlu0 %8090 }
 0xd43   : > { %v8093_v52 = vunpack.i.h.bf16 %v8091_v17  ;;  %v8092_v13 = vunpack.i.l.bf16 %v8091_v17 }
 0xd44   : > { %7382 = vmatmul.mubr.msk.f32.vlgmr.msra.gmra.mrb[46].mxu1 %vm783_vm1, %v4300_v20 }
 0xd45   : > { %v8286_v29 = vpop.eup %8285  ;;  %7740 = vmatpush3.bf16.msra.mxu1 %v7739_v48  ;;  %7395 = vmatprep.mubr.msk.f32.mxu1 %vm10195_vm3, %v8657_v53  ;;  %v7748_v32 = vpack.c.bf16 %v8093_v52, %v8092_v13 }
 0xd46   : > { %v4301_v26 = vmul.f32 %v8286_v29, %v8274_v50  ;;  %7744 = vmatprep.subr.bf16.mxu1 %v8655_v4  ;;  %v7752_v50 = vpack.c.bf16 %v8098_v63, %v8097_v9 }
 0xd48   : > { %7389 = vmatmul.mubr.msk.f32.vlgmr.msra.gmra.mrb[52].mxu0 %vm783_vm1, %v4301_v26 }
 0xd49   : > { %v8288_v41 = vpop.eup %8287  ;;  %7743 = vmatpush3.bf16.msra.mxu0 %v7742_v24  ;;  %7402 = vmatprep.mubr.msk.f32.mxu0 %vm10195_vm3, %v8657_v53 }
 0xd4a   : > { %v4302_v56 = vmul.f32 %v8288_v41, %v9811_v45  ;;  %7747 = vmatprep.subr.bf16.mxu0 %v8655_v4 }
 0xd4c   : > { %7396 = vmatmul.mubr.msk.f32.vlgmr.msra.gmra.mrb[48].mxu1 %vm783_vm1, %v4302_v56 }
 0xd4d   : > { %7746 = vmatpush3.bf16.msra.mxu1 %v7745_v57  ;;  %7409 = vmatprep.mubr.msk.f32.mxu1 %vm10195_vm3, %v8657_v53 }
 0xd4e   : > { %7751 = vmatprep.subr.bf16.mxu1 %v8655_v4 }
 0xd6f   : > { %v4289_v23 = vpop.xlane.xlu1 %4288 }
 0xd70   : > { %8289 = vrcp.f32 %v4289_v23 }
 0xd73   : > { %v4292_v12 = vpop.xlane.xlu0 %4291  ;;  %v8106_v46 = vpop.permute.xlu1 %8105 }
 0xd74   : > { %8291 = vrcp.f32 %v4292_v12  ;;  %v8108_v6 = vunpack.i.h.bf16 %v8106_v46  ;;  %v8107_v27 = vunpack.i.l.bf16 %v8106_v46 }
 0xd76   : > { %v7760_v59 = vpack.c.bf16 %v8108_v6, %v8107_v27 }
 0xd77   : > { %v8101_v36 = vpop.permute.xlu0 %8100  ;;  %v8111_v3 = vpop.permute.xlu1 %8110 }
 0xd78   : > { %v8103_v43 = vunpack.i.h.bf16 %v8101_v36  ;;  %v8102_v45 = vunpack.i.l.bf16 %v8101_v36  ;;  %v8113_v40 = vunpack.i.h.bf16 %v8111_v3 }
 0xd7a   : > { %v8290_v38 = vpop.eup %8289  ;;  %v7756_v25 = vpack.c.bf16 %v8103_v43, %v8102_v45 }
 0xd7b   : > { %v4303_v16 = vmul.f32 %v8290_v38, %v9819_v47  ;;  %v4780_v22 = vpop.permute.xlu0 %4779  ;;  %v8112_v47 = vunpack.i.l.bf16 %v8111_v3 }
 0xd7d   : > { %7403 = vmatmul.mubr.msk.f32.vlgmr.msra.gmra.mrb[54].mxu0 %vm783_vm1, %v4303_v16 }
 0xd7e   : > { %v8292_v39 = vpop.eup %8291  ;;  %7750 = vmatpush3.bf16.xpose.msk.msra.mxu0 %vm9111_vm2, %v7748_v32  ;;  %7416 = vmatprep.mubr.msk.f32.mxu0 %vm10195_vm3, %v8657_v53 }
 0xd7f   : > { %v4304_v19 = vmul.f32 %v8292_v39, %v9823_v7  ;;  %7755 = vmatprep.subr.bf16.mxu0 %v8655_v4  ;;  %v8116_v60 = vpop.permute.xlu0 %8115  ;;  %v7764_v7 = vpack.c.bf16 %v8113_v40, %v8112_v47 }
 0xd80   : > { %v8118_v62 = vunpack.i.h.bf16 %v8116_v60  ;;  %v8117_v37 = vunpack.i.l.bf16 %v8116_v60 }
 0xd81   : > { %7410 = vmatmul.mubr.msk.f32.vlgmr.msra.gmra.mrb[50].mxu1 %vm783_vm1, %v4304_v19 }
 0xd82   : > { %7754 = vmatpush3.bf16.xpose.msk.msra.mxu1 %vm9111_vm2, %v7752_v50  ;;  %7423 = vmatprep.mubr.msk.f32.mxu1 %vm10195_vm3, %v8657_v53  ;;  %v7768_v2 = vpack.c.bf16 %v8118_v62, %v8117_v37 }
 0xd83   : > { %7759 = vmatprep.subr.bf16.mxu1 %v8655_v4 }
 0xd85   : > { %7417 = vmatmul.mubr.msk.f32.vlgmr.msra.gmra.mrb[56].mxu0 %vm783_vm1, %v4780_v22 }
 0xd86   : > { %7758 = vmatpush3.bf16.xpose.msk.msra.mxu0 %vm9111_vm2, %v7756_v25  ;;  %7430 = vmatprep.mubr.msk.f32.mxu0 %vm10195_vm3, %v8657_v53 }
 0xd87   : > { %7763 = vmatprep.subr.bf16.mxu0 %v8655_v4 }
 0xd89   : > { %7424 = vmatmul.mubr.msk.f32.vlgmr.msra.gmra.mrb[52].mxu1 %vm783_vm1, %v4780_v22 }
 0xd8a   : > { %7762 = vmatpush3.bf16.xpose.msk.msra.mxu1 %vm9111_vm2, %v7760_v59  ;;  %7437 = vmatprep.mubr.msk.f32.mxu1 %vm10195_vm3, %v8657_v53 }
 0xd8b   : > { %7767 = vmatprep.subr.bf16.mxu1 %v8655_v4 }
 0xd8d   : > { %7431 = vmatmul.mubr.msk.f32.vlgmr.msra.gmra.mrb[58].mxu0 %vm783_vm1, %v4780_v22 }
 0xd8e   : > { %7766 = vmatpush3.bf16.xpose.msk.msra.mxu0 %vm9111_vm2, %v7764_v7  ;;  %7444 = vmatprep.mubr.msk.f32.mxu0 %vm10195_vm3, %v8657_v53 }
 0xd8f   : > { %7771 = vmatprep.subr.bf16.mxu0 %v8655_v4 }
 0xd91   : > { %7438 = vmatmul.mubr.msk.f32.vlgmr.msra.gmra.mrb[54].mxu1 %vm783_vm1, %v4780_v22 }
 0xd92   : > { %7770 = vmatpush3.bf16.xpose.msk.msra.mxu1 %vm9111_vm2, %v7768_v2  ;;  %7451 = vmatprep.mubr.msk.f32.mxu1 %vm10195_vm3, %v8657_v53 }
 0xd93   : > { %7774 = vmatprep.subr.bf16.mxu1 %v8655_v4 }
 0xd95   : > { %7445 = vmatmul.mubr.msk.f32.vlgmr.msra.gmra.mrb[60].mxu0 %vm783_vm1, %v4780_v22 }
 0xd96   : > { %7458 = vmatprep.mubr.msk.f32.mxu0 %vm10195_vm3, %v8657_v53 }
 0xd99   : > { %7452 = vmatmul.mubr.msk.f32.vlgmr.msra.gmra.mrb[56].mxu1 %vm783_vm1, %v4780_v22 }
 0xd9a   : > { %7465 = vmatprep.mubr.msk.f32.mxu1 %vm10195_vm3, %v8657_v53 }
 0xe0f   : > { %v9902_v21 = vpop.f32.mrb[50].mxu0 }
 0xe10   : > { %v7376_v49 = vpop.f32.mrb[51].mxu0 }
 0xe17   : > { %v9904_v54 = vpop.f32.mrb[46].mxu1 }
 0xe18   : > { %v5797_v15 = vcombine.low %v9902_v21, %v9904_v54  ;;  %v7383_v0 = vpop.f32.mrb[47].mxu1  ;;  %v6810_v54 = vld [vmem:[%s10237_s14] ss:$0 sm:$0xff]  ;;  %s6479_s14 = scalar_lea.sflag [#allocation4], %s9015_s3 }
 0xe1b   : > { %v9908_v61 = vpop.f32.mrb[52].mxu0 }
 0xe1c   : > { %v7390_v44 = vpop.f32.mrb[53].mxu0 }
 0xe1f   : > { %v9910_v31 = vpop.f32.mrb[48].mxu1 }
 0xe20   : > { %v5798_v8 = vcombine.low %v9908_v61, %v9910_v31  ;;  %v7397_v11 = vpop.f32.mrb[49].mxu1 }
 0xe50   : > { %v9914_v33 = vpop.f32.mrb[54].mxu0 }
 0xe51   : > { %v7404_v42 = vpop.f32.mrb[55].mxu0 }
 0xe54   : > { %v9916_v28 = vpop.f32.mrb[50].mxu1 }
 0xe55   : > { %v5799_v20 = vcombine.low %v9914_v33, %v9916_v28  ;;  %v7411_v48 = vpop.f32.mrb[51].mxu1 }
 0xe58   : > { %v4857_v51 = vpop.f32.mrb[56].mxu0 }
 0xe59   : > { %v5251_v58 = vsel %vm4238_vm4, %v4857_v51, -inf  ;;  %v7418_v29 = vpop.f32.mrb[57].mxu0 }
 0xe5a   : > { %5252 = vmax.xlane.f32.xlu1 %v5251_v58 }
 0xe5c   : > { %v4935_v26 = vpop.f32.mrb[52].mxu1 }
 0xe5d   : > { %v5254_v14 = vsel %vm4238_vm4, %v4935_v26, -inf  ;;  %v7425_v35 = vpop.f32.mrb[53].mxu1 }
 0xe5e   : > { %5255 = vmax.xlane.f32.xlu0 %v5254_v14 }
 0xe60   : > { %v5013_v24 = vpop.f32.mrb[58].mxu0 }
 0xe61   : > { %v5257_v41 = vsel %vm4238_vm4, %v5013_v24, -inf  ;;  %v7432_v56 = vpop.f32.mrb[59].mxu0 }
 0xe62   : > { %5258 = vmax.xlane.f32.xlu0 %v5257_v41 }
 0xe64   : > { %v5091_v57 = vpop.f32.mrb[54].mxu1 }
 0xe65   : > { %v5260_v55 = vsel %vm4238_vm4, %v5091_v57, -inf  ;;  %v7439_v17 = vpop.f32.mrb[55].mxu1 }
 0xe66   : > { %5261 = vmax.xlane.f32.xlu1 %v5260_v55 }
 0xe68   : > { %v5169_v23 = vpop.f32.mrb[60].mxu0 }
 0xe69   : > { %v7446_v12 = vpop.f32.mrb[61].mxu0  ;;  %v5263_v52 = vsel %vm4238_vm4, %v5169_v23, -inf }
 0xe6a   : > { %5264 = vmax.xlane.f32.xlu0 %v5263_v52 }
 0xe6c   : > { %v5247_v13 = vpop.f32.mrb[56].mxu1 }
 0xe6d   : > { %v7453_v38 = vpop.f32.mrb[57].mxu1  ;;  %v5266_v16 = vsel %vm4238_vm4, %v5247_v13, -inf }
 0xe6e   : > { %5267 = vmax.xlane.f32.xlu1 %v5266_v16 }
 0xe7f   : > { %8125 = vrot.lane.b32.xlu1 %v9737_v10, %s8651_s7 }
 0xe80   : > { %8120 = vrot.lane.b32.xlu0 %v9725_v30, %s8651_s7 }
 0xe83   : > { %8130 = vrot.lane.b32.xlu1 %v9748_v34, %s8651_s7 }
 0xe84   : > { %8135 = vrot.lane.b32.xlu0 %v9755_v5, %s8651_s7 }
 0xee7   : > { %v5253_v63 = vpop.xlane.xlu1 %5252 }
 0xee8   : > { %v5269_v9 = vsub.f32 %v4857_v51, %v5253_v63 }
 0xeea   : > { %v5275_v32 = vmul.f32 1.442695, %v5269_v9 }
 0xeeb   : > { %v5256_v36 = vpop.xlane.xlu0 %5255 }
 0xeec   : > { %8293 = vpow2.f32 %v5275_v32  ;;  %v5270_v39 = vsub.f32 %v4935_v26, %v5256_v36 }
 0xeee   : > { %v5277_v46 = vmul.f32 1.442695, %v5270_v39 }
 0xeef   : > { %v5259_v19 = vpop.xlane.xlu0 %5258 }
 0xef0   : > { %8295 = vpow2.f32 %v5277_v46  ;;  %v5271_v50 = vsub.f32 %v5013_v24, %v5259_v19 }
 0xef2   : > { %v5279_v10 = vmul.f32 1.442695, %v5271_v50 }
 0xef3   : > { %v5262_v43 = vpop.xlane.xlu1 %5261 }
 0xef4   : > { %8297 = vpow2.f32 %v5279_v10  ;;  %v5272_v30 = vsub.f32 %v5091_v57, %v5262_v43 }
 0xef6   : > { %v8294_v45 = vpop.eup %8293  ;;  %v5281_v22 = vmul.f32 1.442695, %v5272_v30 }
 0xef7   : > { %v5265_v34 = vpop.xlane.xlu0 %5264  ;;  %v5287_v6 = vsel %vm4238_vm4, %v8294_v45, 0.0 }
 0xef8   : > { %8299 = vpow2.f32 %v5281_v22  ;;  %v5273_v5 = vsub.f32 %v5169_v23, %v5265_v34  ;;  %5288 = vadd.xlane.f32.xlu0 %v5287_v6 }
 0xefa   : > { %v8296_v27 = vpop.eup %8295  ;;  %v5283_v25 = vmul.f32 1.442695, %v5273_v5 }
 0xefb   : > { %v8121_v3 = vpop.permute.xlu0 %8120  ;;  %v5268_v59 = vpop.xlane.xlu1 %5267  ;;  %v5290_v40 = vsel %vm4238_vm4, %v8296_v27, 0.0 }
 0xefc   : > { %8301 = vpow2.f32 %v5283_v25  ;;  %v8123_v47 = vunpack.i.h.bf16 %v8121_v3  ;;  %v8122_v60 = vunpack.i.l.bf16 %v8121_v3  ;;  %v5274_v7 = vsub.f32 %v5247_v13, %v5268_v59  ;;  %5291 = vadd.xlane.f32.xlu1 %v5290_v40  ;;  %v5824_v59 = vld [vmem:[%s10236_s5] sm:$0xff]  ;;  %v5825_v40 = vld [vmem:[%s10236_s5 + $0x8] sm:$0xff] }
 0xefe   : > { %v8298_v62 = vpop.eup %8297  ;;  %v7772_v37 = vpack.c.bf16 %v8123_v47, %v8122_v60  ;;  %v5285_v2 = vmul.f32 1.442695, %v5274_v7  ;;  %v5826_v47 = vld [vmem:[%s10236_s5 + $0x10] sm:$0xff]  ;;  %v7790_v60 = vpack.c.bf16 %v5825_v40, %v5824_v59  ;;  %v5827_v7 = vld [vmem:[%s10236_s5 + $0x18] sm:$0xff]  ;;  %v6814_v59 = vld [vmem:[%s10238_s25] ss:$0 sm:$0xff] }
 0xeff   : > { %v8126_v49 = vpop.permute.xlu1 %8125  ;;  %v5293_v0 = vsel %vm4238_vm4, %v8298_v62, 0.0  ;;  %v8136_v35 = vpop.permute.xlu0 %8135  ;;  %s8561_s25 = scalar_lea.vmem %s8560_s28, 128 }
 0xf00   : > { %8303 = vpow2.f32 %v5285_v2  ;;  %v8128_v44 = vunpack.i.h.bf16 %v8126_v49  ;;  %5294 = vadd.xlane.f32.xlu0 %v5293_v0  ;;  %7773 = vmatpush3.bf16.msra.mxu0 %v7772_v37  ;;  %v8127_v11 = vunpack.i.l.bf16 %v8126_v49  ;;  %v8138_v13 = vunpack.i.h.bf16 %v8136_v35 }
 0xf01   : > { %7777 = vmatprep.subr.bf16.mxu0 %v8655_v4  ;;  %v8137_v38 = vunpack.i.l.bf16 %v8136_v35 }
 0xf02   : > { %v8300_v42 = vpop.eup %8299  ;;  %v7775_v48 = vpack.c.bf16 %v8128_v44, %v8127_v11 }
 0xf03   : > { %v5296_v51 = vsel %vm4238_vm4, %v8300_v42, 0.0  ;;  %v8131_v24 = vpop.permute.xlu1 %8130  ;;  %v7781_v9 = vpack.c.bf16 %v8138_v13, %v8137_v38 }
 0xf04   : > { %5297 = vadd.xlane.f32.xlu1 %v5296_v51  ;;  %7776 = vmatpush3.bf16.msra.mxu1 %v7775_v48  ;;  %v8133_v55 = vunpack.i.h.bf16 %v8131_v24  ;;  %v8132_v17 = vunpack.i.l.bf16 %v8131_v24 }
 0xf05   : > { %7780 = vmatprep.subr.bf16.mxu1 %v8655_v4 }
 0xf06   : > { %v8302_v58 = vpop.eup %8301  ;;  %v7778_v16 = vpack.c.bf16 %v8133_v55, %v8132_v17 }
 0xf07   : > { %v5299_v29 = vsel %vm4238_vm4, %v8302_v58, 0.0 }
 0xf08   : > { %5300 = vadd.xlane.f32.xlu0 %v5299_v29 }
 0xf0a   : > { %v8304_v26 = vpop.eup %8303 }
 0xf0b   : > { %v5302_v14 = vsel %vm4238_vm4, %v8304_v26, 0.0 }
 0xf0c   : > { %5303 = vadd.xlane.f32.xlu1 %v5302_v14 }
 0xf1d   : > { %8140 = vrot.lane.b32.xlu1 %v9766_v18, %s8651_s7 }
 0xf1e   : > { %8145 = vrot.lane.b32.xlu0 %v9775_v1, %s8651_s7  ;;  %s10251_s7 = sld [smem:[#allocation32_spill]] }
 0xf24   : > { %s10126_s17 = scalar_lea.hbm %s10251_s7, %s6836_s13 }
 0xf85   : > { %v5289_v41 = vpop.xlane.xlu0 %5288 }
 0xf86   : > { %8305 = vrcp.f32 %v5289_v41 }
 0xf89   : > { %v5292_v56 = vpop.xlane.xlu1 %5291 }
 0xf8a   : > { %8307 = vrcp.f32 %v5292_v56 }
 0xf8d   : > { %v5295_v57 = vpop.xlane.xlu0 %5294 }
 0xf8e   : > { %8309 = vrcp.f32 %v5295_v57 }
 0xf90   : > { %v8306_v23 = vpop.eup %8305 }
 0xf91   : > { %v5311_v12 = vmul.f32 %v8306_v23, %v8294_v45  ;;  %v5298_v52 = vpop.xlane.xlu1 %5297 }
 0xf92   : > { %8311 = vrcp.f32 %v5298_v52 }
 0xf93   : > { %7459 = vmatmul.mubr.msk.f32.vlgmr.msra.gmra.mrb[62].mxu0 %vm783_vm1, %v5311_v12 }
 0xf94   : > { %v8308_v18 = vpop.eup %8307  ;;  %7779 = vmatpush3.bf16.msra.mxu0 %v7778_v16  ;;  %7472 = vmatprep.mubr.msk.f32.mxu0 %vm10195_vm3, %v8657_v53 }
 0xf95   : > { %v5312_v1 = vmul.f32 %v8308_v18, %v8296_v27  ;;  %v5301_v63 = vpop.xlane.xlu0 %5300  ;;  %7783 = vmatprep.subr.bf16.mxu0 %v8655_v4 }
 0xf96   : > { %8313 = vrcp.f32 %v5301_v63 }
 0xf97   : > { %7466 = vmatmul.mubr.msk.f32.vlgmr.msra.gmra.mrb[58].mxu1 %vm783_vm1, %v5312_v1 }
 0xf98   : > { %v8310_v32 = vpop.eup %8309  ;;  %7782 = vmatpush3.bf16.msra.mxu1 %v7781_v9  ;;  %7479 = vmatprep.mubr.msk.f32.mxu1 %vm10195_vm3, %v8657_v53 }
 0xf99   : > { %v5313_v36 = vmul.f32 %v8310_v32, %v8298_v62  ;;  %v8146_v39 = vpop.permute.xlu0 %8145  ;;  %v5304_v46 = vpop.xlane.xlu1 %5303  ;;  %7786 = vmatprep.subr.bf16.mxu1 %v8655_v4  ;;  %v7793_v62 = vpack.c.bf16 %v5827_v7, %v5826_v47  ;;  %v6815_v7 = vld [vmem:[%s10239_s4] ss:$0 sm:$0xff] }
 0xf9a   : > { %v8148_v19 = vunpack.i.h.bf16 %v8146_v39  ;;  %v8147_v50 = vunpack.i.l.bf16 %v8146_v39  ;;  %8315 = vrcp.f32 %v5304_v46 }
 0xf9b   : > { %7473 = vmatmul.mubr.msk.f32.vlgmr.msra.gmra.mrb[64].mxu0 %vm783_vm1, %v5313_v36 }
 0xf9c   : > { %v8312_v10 = vpop.eup %8311  ;;  %v7787_v43 = vpack.c.bf16 %v8148_v19, %v8147_v50  ;;  %7486 = vmatprep.mubr.msk.f32.mxu0 %vm10195_vm3, %v8657_v53 }
 0xf9d   : > { %v5314_v30 = vmul.f32 %v8312_v10, %v8300_v42  ;;  %v8141_v45 = vpop.permute.xlu1 %8140 }
 0xf9e   : > { %v8143_v22 = vunpack.i.h.bf16 %v8141_v45  ;;  %v8142_v34 = vunpack.i.l.bf16 %v8141_v45 }
 0xf9f   : > { %7480 = vmatmul.mubr.msk.f32.vlgmr.msra.gmra.mrb[60].mxu1 %vm783_vm1, %v5314_v30 }
 0xfa0   : > { %v8314_v6 = vpop.eup %8313  ;;  %v7784_v5 = vpack.c.bf16 %v8143_v22, %v8142_v34  ;;  %7788 = vmatpush3.bf16.msra.mxu1 %v7787_v43  ;;  %7493 = vmatprep.mubr.msk.f32.mxu1 %vm10195_vm3, %v8657_v53 }
 0xfa1   : > { %7795 = vmatprep.subr.bf16.mxu1 %v8655_v4  ;;  %v5315_v27 = vmul.f32 %v8314_v6, %v8302_v58 }
 0xfa2   : > { %7785 = vmatpush3.bf16.msra.mxu0 %v7784_v5 }
 0xfa3   : > { %7789 = vmatprep.subr.bf16.mxu0 %v8655_v4 }
 0xfa4   : > { %v8316_v25 = vpop.eup %8315 }
 0xfa5   : > { %v5316_v3 = vmul.f32 %v8316_v25, %v8304_v26  ;;  %7487 = vmatmul.mubr.msk.f32.vlgmr.msra.gmra.mrb[66].mxu0 %vm783_vm1, %v5315_v27 }
 0xfa6   : > { %7504 = vmatprep.mubr.msk.f32.mxu0 %vm10195_vm3, %v8657_v53  ;;  %7791 = vmatpush3.bf16.msra.mxu0 %v7790_v60 }
 0xfa7   : > { %7494 = vmatmul.mubr.msk.f32.vlgmr.msra.gmra.mrb[62].mxu1 %vm783_vm1, %v5316_v3  ;;  %7792 = vmatprep.subr.bf16.mxu0 %v8655_v4 }
 0xfa8   : > { %7519 = vmatprep.mubr.msk.f32.mxu1 %vm10195_vm3, %v8657_v53 }
 0xfaa   : > { %7794 = vmatpush3.bf16.msra.mxu0 %v7793_v62 }
 0xfab   : > { %7799 = vmatprep.subr.bf16.mxu0 %v8655_v4 }
0x1066   : > { %v5392_v37 = vpop.f32.mrb[62].mxu0 }
0x1067   : > { %v7460_v2 = vpop.f32.mrb[63].mxu0 }
0x106a   : > { %v5471_v49 = vpop.f32.mrb[58].mxu1 }
0x106b   : > { %v5809_v0 = vcombine.low %v5392_v37, %v5471_v49  ;;  %v7467_v44 = vpop.f32.mrb[59].mxu1 }
0x106d   : > { %5812 = vrot.lane.b32.xlu1 %v5809_v0, %s8654_s22 }
0x106e   : > { %v5550_v11 = vpop.f32.mrb[64].mxu0 }
0x106f   : > { %v7474_v42 = vpop.f32.mrb[65].mxu0 }
0x1072   : > { %v5629_v48 = vpop.f32.mrb[60].mxu1 }
0x1073   : > { %v5810_v51 = vcombine.low %v5550_v11, %v5629_v48  ;;  %v7481_v58 = vpop.f32.mrb[61].mxu1 }
0x1075   : > { %5814 = vrot.lane.b32.xlu0 %v5810_v51, %s8654_s22 }
0x1078   : > { %v5708_v29 = vpop.f32.mrb[66].mxu0 }
0x1079   : > { %v7488_v26 = vpop.f32.mrb[67].mxu0 }
0x107a   : > { %v5787_v14 = vpop.f32.mrb[62].mxu1 }
0x107b   : > { %v5811_v35 = vcombine.low %v5708_v29, %v5787_v14  ;;  %v7495_v24 = vpop.f32.mrb[63].mxu1 }
0x107d   : > { %5816 = vrot.lane.b32.xlu1 %v5811_v35, %s8654_s22  ;;  %s8555_s22 = scalar_lea.vmem %s10128_s20, 64 }
0x107e   : > { %p8556_p12 = scmp.ne.s32.totalorder %s10128_s20, %s8555_s22  ;;  %p8563_p8 = scmp.lt.s32.totalorder %s8561_s25, %s8555_s22 }
0x1080   : > { %p8557_p13 = pnand %p8556_p12, %p10252_p1  ;;  %p8564_p6 = por %p8563_p8, %p8562_p2 }
0x1082   : > { %p8558_p0 = pneg %p8557_p13 }
0x1084   : > { %p8565_p10 = pnand %p8564_p6, %p8558_p0 }
0x10df   : > { %v5813_v41 = vpop.permute.xlu1 %5812 }
0x10e0   : > { %v5821_v56 = vsel %vm783_vm1, %v5797_v15, %v5813_v41 }
0x10e1   : > { %7505 = vmatmul.mubr.msk.f32.vlgmr.msra.gmra.mrb[68].mxu0 %vm603_vm0, %v5821_v56 }
0x10e2   : > { %7507 = vmatprep.mubr.msk.f32.mxu0 %vm10195_vm3, %v8657_v53 }
0x10e7   : > { %v5815_v57 = vpop.permute.xlu0 %5814 }
0x10e8   : > { %v5822_v55 = vsel %vm783_vm1, %v5798_v8, %v5815_v57 }
0x10e9   : > { %7508 = vmatmul.mubr.msk.f32.gmra.mrb[70].mxu0 %vm603_vm0, %v5822_v55 }
0x10ea   : > { %7510 = vmatprep.mubr.msk.f32.mxu0 %vm10195_vm3, %v8657_v53 }
0x10ef   : > { %v5817_v17 = vpop.permute.xlu1 %5816 }
0x10f0   : > { %v5823_v21 = vsel %vm783_vm1, %v5799_v20, %v5817_v17 }
0x10f1   : > { %7511 = vmatmul.mubr.msk.f32.gmra.mrb[72].mxu0 %vm603_vm0, %v5823_v21 }
0x10f2   : > { %7534 = vmatprep.mubr.msk.f32.mxu0 %vm10195_vm3, %v8657_v53 }
0x11b4   : > { %v5910_v15 = vpop.f32.mrb[68].mxu0 }
0x11b5   : > { %v5911_v61 = vadd.f32 %v6810_v54, %v5910_v15  ;;  %v7506_v31 = vpop.f32.mrb[69].mxu0 }
0x11b7   : > { %v5926_v8 = vsel %vm603_vm0, %v5911_v61, 0.0 }
0x11b8   : > { %5927 = vadd.xlane.f32.xlu0 %v5926_v8 }
0x11bc   : > { %v5915_v23 = vpop.f32.mrb[70].mxu0 }
0x11bd   : > { %v5916_v12 = vadd.f32 %v6810_v54, %v5915_v23  ;;  %v7509_v33 = vpop.f32.mrb[71].mxu0 }
0x11bf   : > { %v5929_v28 = vsel %vm603_vm0, %v5916_v12, 0.0 }
0x11c0   : > { %5930 = vadd.xlane.f32.xlu1 %v5929_v28 }
0x11c4   : > { %v5920_v20 = vpop.f32.mrb[72].mxu0 }
0x11c5   : > { %v5921_v52 = vadd.f32 %v6810_v54, %v5920_v20  ;;  %v7512_v13 = vpop.f32.mrb[73].mxu0 }
0x11c7   : > { %v5932_v38 = vsel %vm603_vm0, %v5921_v52, 0.0 }
0x11c8   : > { %5933 = vadd.xlane.f32.xlu0 %v5932_v38 }
0x1245   : > { %v5928_v16 = vpop.xlane.xlu0 %5927 }
0x1246   : > { %v5935_v18 = vmul.f32 0.03125, %v5928_v16 }
0x1248   : > { %v5938_v1 = vsub.f32 %v5911_v61, %v5935_v18  ;;  %v6087_v61 = vlaneseq }
0x124a   : > { %v5941_v63 = vmul.f32 %v5938_v1, %v5938_v1  ;;  %v10038_v31 = vshrl.u32 %v6087_v61, 7  ;;  %v10040_v8 = vand.u32 127, %v6087_v61 }
0x124c   : > { %v5944_v9 = vsel %vm603_vm0, %v5941_v63, 0.0  ;;  %vm10194_vm6 = vcmp.eq.s32.totalorder %v10038_v31, %v10040_v8  ;;  %v6089_v23 = vadd.s32 8, %v10038_v31  ;;  %vm6180_vm10 = vcmp.ge.s32.totalorder %v10040_v8, 2 }
0x124d   : > { %5945 = vadd.xlane.f32.xlu0 %v5944_v9  ;;  %v5931_v32 = vpop.xlane.xlu1 %5930  ;;  %vm6181_vm11 = vcmp.lt.s32.totalorder %v10040_v8, 6  ;;  %vm10198_vm12 = vcmp.lt.s32.totalorder %v10040_v8, 2 }
0x124e   : > { %v5936_v36 = vmul.f32 0.03125, %v5931_v32  ;;  %vm6094_vm8 = vcmp.eq.s32.totalorder %v6089_v23, %v10040_v8  ;;  %vm10069_vm15 = vmand %vm6180_vm10, %vm6181_vm11 }
0x1250   : > { %v5939_v39 = vsub.f32 %v5916_v12, %v5936_v36 }
0x1252   : > { %v5942_v46 = vmul.f32 %v5939_v39, %v5939_v39 }
0x1254   : > { %v5947_v19 = vsel %vm603_vm0, %v5942_v46, 0.0  ;;  %v6822_v46 = vadd.s32 4294967294, %v10040_v8 }
0x1255   : > { %v5934_v50 = vpop.xlane.xlu0 %5933  ;;  %5948 = vadd.xlane.f32.xlu1 %v5947_v19 }
0x1256   : > { %v5937_v10 = vmul.f32 0.03125, %v5934_v50  ;;  %v6164_v19 = vmul.u32 4, %v6822_v46  ;;  %v6162_v50 = vmul.u32 4, %v10040_v8 }
0x1258   : > { %v5940_v43 = vsub.f32 %v5921_v52, %v5937_v10  ;;  %v6090_v52 = vadd.s32 16, %v10038_v31  ;;  %v6165_v10 = vadd.s32 8, %v6164_v19  ;;  %vm6167_vm13 = vcmp.ge.s32.totalorder %v10038_v31, %v6162_v50 }
0x1259   : > { %vm6168_vm14 = vcmp.ge.s32.totalorder %v6089_v23, %v6162_v50 }
0x125a   : > { %v5943_v30 = vmul.f32 %v5940_v43, %v5940_v43  ;;  %vm6095_vm9 = vcmp.eq.s32.totalorder %v6090_v52, %v10040_v8  ;;  %vm6171_vm4 = vmand %vm10198_vm12, %vm6168_vm14  ;;  %vm6169_vm14 = vcmp.ge.s32.totalorder %v6090_v52, %v6162_v50 }
0x125c   : > { %v5950_v45 = vsel %vm603_vm0, %v5943_v30, 0.0  ;;  %v10240_v30 = vmov 0 }
0x125d   : > { %5951 = vadd.xlane.f32.xlu0 %v5950_v45  ;;  %v10241_v30 = vsel %vm10069_vm15, 4294967295, %v10240_v30  ;;  %v6189_v45 = vadd.s32 4, %v6165_v10 }
0x125f   : > { %vm6190_vm10 = vcmp.lt.s32.totalorder %v10038_v31, %v6189_v45 }
0x12da   : > { %v5946_v22 = vpop.xlane.xlu0 %5945 }
0x12db   : > { %v5953_v34 = vmul.f32 0.03125, %v5946_v22 }
0x12dd   : > { %v5956_v6 = vadd.f32 1e-05, %v5953_v34 }
0x12df   : > { %8317 = vrsqrt.f32 %v5956_v6 }
0x12e2   : > { %v5949_v5 = vpop.xlane.xlu1 %5948 }
0x12e3   : > { %v5954_v27 = vmul.f32 0.03125, %v5949_v5 }
0x12e5   : > { %v5957_v25 = vadd.f32 1e-05, %v5954_v27 }
0x12e7   : > { %8319 = vrsqrt.f32 %v5957_v25 }
0x12e9   : > { %v8318_v3 = vpop.eup %8317 }
0x12ea   : > { %v5952_v40 = vpop.xlane.xlu0 %5951  ;;  %v5962_v47 = vmul.f32 %v8318_v3, %v5938_v1 }
0x12eb   : > { %v5955_v60 = vmul.f32 0.03125, %v5952_v40 }
0x12ec   : > { %v5971_v62 = vmul.f32 %v6814_v59, %v5962_v47 }
0x12ed   : > { %v5958_v37 = vadd.f32 1e-05, %v5955_v60 }
0x12ee   : > { %v5980_v2 = vadd.f32 %v6815_v7, %v5971_v62 }
0x12ef   : > { %8321 = vrsqrt.f32 %v5958_v37 }
0x12f0   : > { %v5983_v49 = vsel %vm603_vm0, %v5980_v2, 0.0 }
0x12f1   : > { %v8320_v0 = vpop.eup %8319  ;;  %5984 = vadd.xlane.f32.xlu1 %v5983_v49 }
0x12f2   : > { %v5963_v44 = vmul.f32 %v8320_v0, %v5939_v39 }
0x12f4   : > { %v5972_v11 = vmul.f32 %v6814_v59, %v5963_v44 }
0x12f6   : > { %v5981_v42 = vadd.f32 %v6815_v7, %v5972_v11 }
0x12f8   : > { %v5986_v48 = vsel %vm603_vm0, %v5981_v42, 0.0 }
0x12f9   : > { %v8322_v51 = vpop.eup %8321  ;;  %5987 = vadd.xlane.f32.xlu0 %v5986_v48 }
0x12fa   : > { %v5964_v58 = vmul.f32 %v8322_v51, %v5940_v43  ;;  %v6173_v43 = vadd.s32 4, %v6162_v50 }
0x12fc   : > { %v5973_v29 = vmul.f32 %v6814_v59, %v5964_v58  ;;  %vm6174_vm1 = vcmp.lt.s32.totalorder %v10038_v31, %v6173_v43  ;;  %vm6175_vm2 = vcmp.lt.s32.totalorder %v6089_v23, %v6173_v43 }
0x12fe   : > { %v5982_v26 = vadd.f32 %v6815_v7, %v5973_v29 }
0x1300   : > { %v5989_v14 = vsel %vm603_vm0, %v5982_v26, 0.0 }
0x1301   : > { %5990 = vadd.xlane.f32.xlu1 %v5989_v14 }
0x137e   : > { %v5985_v35 = vpop.xlane.xlu1 %5984 }
0x137f   : > { %v5992_v24 = vmul.f32 0.03125, %v5985_v35 }
0x1381   : > { %v5995_v57 = vsub.f32 %v5980_v2, %v5992_v24 }
0x1386   : > { %v5988_v41 = vpop.xlane.xlu0 %5987 }
0x1387   : > { %v5993_v56 = vmul.f32 0.03125, %v5988_v41 }
0x1389   : > { %v5996_v55 = vsub.f32 %v5981_v42, %v5993_v56 }
0x138b   : > { %v7796_v17 = vpack.c.bf16 %v5996_v55, %v5995_v57 }
0x138d   : > { %7798 = vmatpush3.bf16.xpose.msk.msra.mxu1 %vm7797_vm5, %v7796_v17  ;;  %vm6183_vm5 = vcmp.ge.s32.totalorder %v10038_v31, %v6165_v10 }
0x138e   : > { %v5991_v21 = vpop.xlane.xlu1 %5990  ;;  %7517 = vmatprep.subr.mxu1 %v8657_v53  ;;  %vm6186_vm11 = vmand %vm10069_vm15, %vm6183_vm5  ;;  %vm10242_vm5 = vcmp.lt.s32.totalorder %v10040_v8, 2 }
0x138f   : > { %v5994_v54 = vmul.f32 0.03125, %v5991_v21 }
0x1391   : > { %v5997_v15 = vsub.f32 %v5982_v26, %v5994_v54 }
0x1395   : > { %7518 = vmatpush3.xpose.msk.msra.mxu1 %vm603_vm0, %v5997_v15 }
0x1396   : > { %7802 = vmatprep.subr.bf16.mxu1 %v8655_v4 }
0x1398   : > { %7520 = vmatmul.mubr.msk.f32.vlgmr.msra.gmra.mrb[64].mxu1 %vm603_vm0, %v5995_v57 }
0x1399   : > { %7522 = vmatprep.mubr.msk.f32.mxu1 %vm10195_vm3, %v8657_v53 }
0x139c   : > { %7523 = vmatmul.mubr.msk.f32.gmra.mrb[66].mxu1 %vm603_vm0, %v5996_v55 }
0x139d   : > { %7525 = vmatprep.mubr.msk.f32.mxu1 %vm10195_vm3, %v8657_v53 }
0x13a0   : > { %7526 = vmatmul.mubr.msk.f32.gmra.mrb[68].mxu1 %vm603_vm0, %v5997_v15  ;;  %vm6170_vm0 = vmand %vm10198_vm12, %vm6167_vm13 }
0x13a1   : > { %7549 = vmatprep.mubr.msk.f32.mxu1 %vm10195_vm3, %v8657_v53  ;;  %vm6191_vm3 = vcmp.lt.s32.totalorder %v6089_v23, %v6189_v45 }
0x146b   : > { %v10045_v12 = vpop.f32.mrb[64].mxu1 }
0x146c   : > { %v6096_v33 = vsel %vm10194_vm6, %v10045_v12, 0.0  ;;  %v7521_v28 = vpop.f32.mrb[65].mxu1  ;;  %vm6178_vm6 = vmand %vm6171_vm4, %vm6175_vm2  ;;  %vm6185_vm4 = vcmp.ge.s32.totalorder %v6090_v52, %v6165_v10  ;;  %v6120_v7 = vmul.f32 2.0, %v10045_v12 }
0x146d   : > { %v6100_v20 = vsel %vm10197_vm7, %v6096_v33, 0.0 }
0x146e   : > { %6101 = vadd.xlane.f32.xlu0 %v6100_v20 }
0x146f   : > { %v10054_v13 = vpop.f32.mrb[66].mxu1 }
0x1470   : > { %v6097_v38 = vsel %vm6094_vm8, %v10054_v13, 0.0  ;;  %v7524_v16 = vpop.f32.mrb[67].mxu1  ;;  %vm6177_vm8 = vmand %vm6170_vm0, %vm6174_vm1  ;;  %vm6176_vm1 = vcmp.lt.s32.totalorder %v6090_v52, %v6173_v43  ;;  %v6121_v49 = vmul.f32 2.0, %v10054_v13 }
0x1471   : > { %v6103_v18 = vsel %vm10197_vm7, %v6097_v38, 0.0 }
0x1472   : > { %6104 = vadd.xlane.f32.xlu1 %v6103_v18  ;;  %v6109_v1 = vadd.f32 %v6103_v18, %v6100_v20 }
0x1473   : > { %v10059_v63 = vpop.f32.mrb[68].mxu1 }
0x1474   : > { %v6098_v9 = vsel %vm6095_vm9, %v10059_v63, 0.0  ;;  %v7527_v32 = vpop.f32.mrb[69].mxu1  ;;  %vm6184_vm9 = vcmp.ge.s32.totalorder %v6089_v23, %v6165_v10  ;;  %v6122_v51 = vmul.f32 2.0, %v10059_v63 }
0x1475   : > { %v6106_v36 = vsel %vm10197_vm7, %v6098_v9, 0.0  ;;  %vm6187_vm13 = vmand %vm10069_vm15, %vm6184_vm9  ;;  %vm6192_vm15 = vcmp.lt.s32.totalorder %v6090_v52, %v6189_v45 }
0x1476   : > { %6107 = vadd.xlane.f32.xlu0 %v6106_v36  ;;  %v6110_v39 = vadd.f32 %v6109_v1, %v6106_v36  ;;  %vm6193_vm7 = vmand %vm6186_vm11, %vm6190_vm10  ;;  %vm10243_vm11 = vnez %v10241_v30  ;;  %v6205_v30 = vmul.u32 4, %v10038_v31 }
0x1477   : > { %vm6194_vm12 = vmand %vm6187_vm13, %vm6191_vm3 }
0x1478   : > { %vm6196_vm0 = vmor %vm6177_vm8, %vm6193_vm7  ;;  %v6111_v27 = vrot.slane %v6110_v39, 4  ;;  %v6206_v45 = vadd.s32 8, %v6205_v30 }
0x1479   : > { %vm6197_vm2 = vmor %vm6178_vm6, %vm6194_vm12  ;;  %v6823_v22 = vsel %vm6196_vm0, 1.0, %v8657_v53  ;;  %vm10244_vm6 = vcmask 195584   ;;  %vm10245_vm12 = vmmov 0  }
0x147a   : > { %v6824_v34 = vsel %vm6197_vm2, 1.0, %v8657_v53  ;;  %vm6172_vm9 = vmand %vm10242_vm5, %vm6169_vm14  ;;  %v6112_v25 = vadd.f32 %v6111_v27, %v6110_v39  ;;  %vm6207_vm14 = vcmp.ge.s32.totalorder %v10040_v8, %v6206_v45  ;;  %vm6213_vm2 = vcmp.ge.s32.totalorder %v10040_v8, %v6205_v30 }
0x147b   : > { %v7800_v6 = vpack.c.bf16 %v6824_v34, %v6823_v22  ;;  %vm6179_vm10 = vmand %vm6172_vm9, %vm6176_vm1  ;;  %v6208_v22 = vadd.s32 4, %v6206_v45 }
0x147c   : > { %vm6188_vm3 = vmand %vm10243_vm11, %vm6185_vm4  ;;  %v6113_v3 = vrot.slane %v6112_v25, 2 }
0x147d   : > { %7801 = vmatpush3.bf16.msra.mxu0 %v7800_v6  ;;  %vm6195_vm13 = vmand %vm6188_vm3, %vm6192_vm15  ;;  %vm6209_vm0 = vcmp.lt.s32.totalorder %v10040_v8, %v6208_v22  ;;  %vm6466_vm3 = vcmask 1043456  }
0x147e   : > { %7532 = vmatprep.subr.mxu0 %v8657_v53  ;;  %vm6198_vm7 = vmor %vm6179_vm10, %vm6195_vm13  ;;  %v6114_v59 = vadd.f32 %v6113_v3, %v6112_v25  ;;  %v6214_v3 = vadd.s32 4, %v6205_v30  ;;  %vm10250_vm13 = vcmp.eq.s32.totalorder %v10038_v31, %v10040_v8 }
0x147f   : > { %v6825_v5 = vsel %vm6198_vm7, 1.0, %v8657_v53  ;;  %vm10246_vm15 = vmmov %vm10244_vm6  ;;  %vm6455_vm7 = vcmask 1041408  }
0x1480   : > { %v6115_v40 = vrot.slane %v6114_v59, 1  ;;  %vm10247_vm8 = vmmov %vm10244_vm6  ;;  %vm6215_vm4 = vcmp.lt.s32.totalorder %v10040_v8, %v6214_v3 }
0x1481   : > { %7533 = vmatpush3.msra.mxu0 %v6825_v5  ;;  %vm6210_vm1 = vmand %vm6207_vm14, %vm6209_vm0 }
0x1482   : > { %v6116_v47 = vadd.f32 %v6115_v40, %v6114_v59  ;;  %vm10248_vm5 = vmmov %vm10244_vm6 }
0x1483   : > { %vm6216_vm9 = vmand %vm6213_vm2, %vm6215_vm4 }
0x1484   : > { %vm10249_vm10 = vmmov %vm10248_vm5 }
0x14fb   : > { %v6102_v60 = vpop.xlane.xlu0 %6101 }
0x14fc   : > { %v6117_v62 = vadd.f32 %v6116_v47, %v6102_v60  ;;  %v6827_v60 = vsel %vm6216_vm9, 1.0, %v8657_v53 }
0x14fe   : > { %v6123_v37 = vsub.f32 %v6117_v62, %v6120_v7  ;;  %v6463_v7 = vadd.s32 2, %v10038_v31 }
0x14ff   : > { %v6105_v2 = vpop.xlane.xlu1 %6104 }
0x1500   : > { %v6126_v0 = vmax.f32 %v6123_v37, 0.0  ;;  %v6118_v44 = vadd.f32 %v6116_v47, %v6105_v2  ;;  %vm6464_vm11 = vcmp.eq.s32.totalorder %v10040_v8, %v6463_v7 }
0x1502   : > { %v6129_v11 = vmul.f32 -0.125, %v6126_v0  ;;  %v6124_v42 = vsub.f32 %v6118_v44, %v6121_v49 }
0x1503   : > { %v6108_v48 = vpop.xlane.xlu0 %6107 }
0x1504   : > { %v6132_v58 = vmul.f32 1.442695, %v6129_v11  ;;  %v6127_v29 = vmax.f32 %v6124_v42, 0.0  ;;  %v6119_v26 = vadd.f32 %v6116_v47, %v6108_v48  ;;  %v6826_v47 = vsel %vm6210_vm1, 1.0, %v8657_v53 }
0x1506   : > { %8323 = vpow2.f32 %v6132_v58  ;;  %v6130_v14 = vmul.f32 -0.125, %v6127_v29  ;;  %v6125_v35 = vsub.f32 %v6119_v26, %v6122_v51 }
0x1508   : > { %v6134_v24 = vmul.f32 1.442695, %v6130_v14  ;;  %v6128_v41 = vmax.f32 %v6125_v35, 0.0 }
0x150a   : > { %8325 = vpow2.f32 %v6134_v24  ;;  %v6131_v56 = vmul.f32 -0.125, %v6128_v41 }
0x150c   : > { %v6136_v57 = vmul.f32 1.442695, %v6131_v56 }
0x150e   : > { %8327 = vpow2.f32 %v6136_v57 }
0x1510   : > { %v8324_v55 = vpop.eup %8323 }
0x1511   : > { %v6138_v17 = vmul.f32 %v8324_v55, %v8324_v55 }
0x1513   : > { %v6141_v21 = vadd.f32 %v8324_v55, %v6138_v17  ;;  %v6144_v54 = vmul.f32 %v6138_v17, %v6138_v17 }
0x1514   : > { %v8326_v15 = vpop.eup %8325 }
0x1515   : > { %v6147_v61 = vadd.f32 %v6144_v54, %v6141_v21  ;;  %v6150_v23 = vmul.f32 %v6144_v54, %v6144_v54  ;;  %v6139_v12 = vmul.f32 %v8326_v15, %v8326_v15 }
0x1517   : > { %v6153_v33 = vadd.f32 %v6150_v23, %v6147_v61  ;;  %v6156_v28 = vmul.f32 %v6150_v23, %v6150_v23  ;;  %v6142_v20 = vadd.f32 %v8326_v15, %v6139_v12  ;;  %v6145_v52 = vmul.f32 %v6139_v12, %v6139_v12 }
0x1518   : > { %v8328_v13 = vpop.eup %8327 }
0x1519   : > { %v6159_v38 = vadd.f32 %v6156_v28, %v6153_v33  ;;  %v6148_v16 = vadd.f32 %v6145_v52, %v6142_v20  ;;  %v6151_v18 = vmul.f32 %v6145_v52, %v6145_v52  ;;  %v6140_v1 = vmul.f32 %v8328_v13, %v8328_v13 }
0x151b   : > { %7535 = vmatmul.mubr.msk.f32.vlgmr.msra.gmra.mrb[74].mxu0 %vm10244_vm6, %v6159_v38  ;;  %v6154_v63 = vadd.f32 %v6151_v18, %v6148_v16  ;;  %v6157_v9 = vmul.f32 %v6151_v18, %v6151_v18  ;;  %v6143_v32 = vadd.f32 %v8328_v13, %v6140_v1  ;;  %v6146_v36 = vmul.f32 %v6140_v1, %v6140_v1 }
0x151c   : > { %7537 = vmatprep.mubr.msk.f32.mxu0 %vm10245_vm12, %v8657_v53 }
0x151d   : > { %v6160_v39 = vadd.f32 %v6157_v9, %v6154_v63  ;;  %v6149_v46 = vadd.f32 %v6146_v36, %v6143_v32  ;;  %v6152_v19 = vmul.f32 %v6146_v36, %v6146_v36 }
0x151f   : > { %7538 = vmatmul.mubr.msk.f32.gmra.mrb[76].mxu0 %vm10246_vm15, %v6160_v39  ;;  %v6155_v50 = vadd.f32 %v6152_v19, %v6149_v46  ;;  %v6158_v10 = vmul.f32 %v6152_v19, %v6152_v19 }
0x1520   : > { %7540 = vmatprep.mubr.msk.f32.mxu0 %vm10245_vm12, %v8657_v53 }
0x1521   : > { %v6161_v43 = vadd.f32 %v6158_v10, %v6155_v50 }
0x1523   : > { %7541 = vmatmul.mubr.msk.f32.gmra.mrb[78].mxu0 %vm10247_vm8, %v6161_v43 }
0x15ee   : > { %v6294_v34 = vpop.f32.mrb[74].mxu0 }
0x15ef   : > { %v7536_v6 = vpop.f32.mrb[75].mxu0 }
0x15f2   : > { %v6299_v5 = vpop.f32.mrb[76].mxu0 }
0x15f3   : > { %v7803_v27 = vpack.c.bf16 %v6299_v5, %v6294_v34  ;;  %v7539_v25 = vpop.f32.mrb[77].mxu0 }
0x15f5   : > { %7804 = vmatpush3.bf16.msra.mxu1 %v7803_v27 }
0x15f6   : > { %v6304_v59 = vpop.f32.mrb[78].mxu0  ;;  %7547 = vmatprep.subr.mxu1 %v8657_v53 }
0x15f7   : > { %v7542_v40 = vpop.f32.mrb[79].mxu0 }
0x15f9   : > { %7548 = vmatpush3.msra.mxu1 %v6304_v59 }
0x15fa   : > { %7550 = vmatmul.mubr.msk.f32.vlgmr.msra.gmra.mrb[70].mxu1 %vm10248_vm5, %v6826_v47  ;;  %7805 = vmatprep.subr.bf16.mxu1 %v8655_v4 }
0x15fb   : > { %7807 = vmatpush3.bf16.msra.mxu1 %v7803_v27  ;;  %7558 = vmatprep.mubr.msk.f32.mxu1 %vm10245_vm12, %v8657_v53 }
0x15fc   : > { %7556 = vmatprep.subr.mxu1 %v8657_v53 }
0x15ff   : > { %7557 = vmatpush3.msra.mxu1 %v6304_v59 }
0x1600   : > { %7559 = vmatmul.mubr.msk.f32.vlgmr.msra.gmra.mrb[72].mxu1 %vm10249_vm10, %v6827_v60 }
0x16cd   : > { %v6377_v62 = vpop.f32.mrb[70].mxu1 }
0x16ce   : > { %v6465_v4 = vsel %vm6464_vm11, %v6377_v62, 0.0  ;;  %v7551_v37 = vpop.f32.mrb[71].mxu1  ;;  %v6475_v31 = vmul.f32 -0.125, %v6377_v62 }
0x16cf   : > { %v6467_v2 = vsel %vm6466_vm3, %v6465_v4, 0.0 }
0x16d0   : > { %6468 = vadd.xlane.f32.xlu1 %v6467_v2 }
0x16d3   : > { %v6450_v49 = vpop.f32.mrb[72].mxu1 }
0x16d4   : > { %v7560_v0 = vpop.f32.mrb[73].mxu1  ;;  %v6454_v53 = vsel %vm10250_vm13, %v6450_v49, 0.0 }
0x16d5   : > { %v6456_v44 = vsel %vm6455_vm7, %v6454_v53, 0.0 }
0x16d6   : > { %v6457_v11 = vrot.slane %v6456_v44, 4 }
0x16d8   : > { %v6458_v42 = vadd.f32 %v6457_v11, %v6456_v44 }
0x16da   : > { %v6459_v48 = vrot.slane %v6458_v42, 2 }
0x16dc   : > { %v6460_v51 = vadd.f32 %v6459_v48, %v6458_v42 }
0x16de   : > { %v6461_v58 = vrot.slane %v6460_v51, 1 }
0x16e0   : > { %v6462_v29 = vadd.f32 %v6461_v58, %v6460_v51 }
0x16e2   : > { %v6833_v26 = vadd.f32 -20.0, %v6462_v29 }
0x16e4   : > { %v6471_v24 = vmul.f32 0.083333336, %v6833_v26 }
0x175d   : > { %v6469_v14 = vpop.xlane.xlu1 %6468 }
0x175e   : > { %v6834_v35 = vadd.f32 -20.0, %v6469_v14 }
0x1760   : > { %v6473_v41 = vmul.f32 0.083333336, %v6834_v35 }
0x1762   : > { %v6474_v8 = vadd.f32 %v6473_v41, %v6471_v24 }
0x1764   : > { %v6476_v56 = vadd.f32 %v6475_v31, %v6474_v8 }
0x1766   : > { %6477 = vst [vmem:[%s579_s1] sm:$0xf] %v6476_v56 }
0x1767   : > { %8568 = shalt.err (!%p8565_p10)
}
0x1768   : > { %s8569_s3 = scalar_lea.hbm %s10126_s17, 64  ;;  %s8573_s4 = scalar_lea.hbm %s10251_s7, 128 }
0x1769   : > { %p8570_p11 = scmp.ne.s32.totalorder %s10126_s17, %s8569_s3  ;;  %p8574_p9 = scmp.lt.u32.totalorder %s10126_s17, %s10251_s7 }
0x176a   : > { %p8575_p7 = scmp.lt.u32.totalorder %s8573_s4, %s8569_s3  ;;  %p8577_p12 = scmp.lt.u32.totalorder %s8569_s3, %s10126_s17 }
0x176b   : > { %p8571_p3 = pnand %p8570_p11, %p10252_p1 }
0x176c   : > { %p8576_p4 = por %p8575_p7, %p8574_p9 }
0x176d   : > { %p8572_p5 = pneg %p8571_p3 }
0x176e   : > { %p8578_p13 = por %p8577_p12, %p8576_p4 }
0x1770   : > { %p8579_p0 = pnand %p8578_p13, %p8572_p5 }
0x1772   : > { %8582 = shalt.err (!%p8579_p0)
}
0x1773   : > { %7841 = dma.vmem_to_hbm [thread:$0]  (%p10252_p1), %s10128_s20, 64, %s10126_s17, %s6479_s14  }
0x1774 PF: > { %s6504_s1 = sand.u32 1, %s8625_s29   ;;  %p10253_p2 = scmp.ne.s32.totalorder %s10222_s27, 0 }
0x1775   : > { %p10254_p8 = scmp.ge.s32.totalorder %s8637_s16, 2  ;;  %s6505_s10 = scalar_lea.sflag [#allocation4], %s6504_s1 }
0x1777   : > { %p7870_p6 = pnand %p10254_p8, %p10253_p2 }
0x1779   : > { %8620 = dma.done.wait (!%p7870_p6), %s6505_s10, 64  }
0x177a   : > { %8622 = vsyncadd (!%p7870_p6), %s6505_s10, 4294967232  ;;  %p31_p10 = scmp.ge.s32.totalorder %s8939_s23, 4   ;;  %s10255_s29 = smov %s8629_s30 }
0x177b   : > { %s10256_s30 = smov %s8633_s15  ;;  %s10257_s15 = smov %s8951_s11 }
0x177c   : > { %s10258_s16 = smov %s8939_s23  ;;  %33 = sbr.rel (!%p31_p10) target bundleno = 20 (0x14), region = 149 }
0x1783   :  { %6510 = vsyncpa [#allocation3], 1 }
0x1784   :  { %6512 = vsyncpa [#allocation3 + $0x1], 1 }
0x1785   :  { %6513 = vsyncpa [#allocation6], 1 }
0x1786   :  { %6514 = vsyncpa [#allocation9], 1 }
0x1787   :  { %6515 = vsyncpa [#allocation12], 1 }
0x1788   :  { %6516 = vsyncpa [#allocation15], 1 }
0x1789   :  { %6517 = vsyncpa [#allocation4], 1 }
0x178a   :  { %6519 = vsyncpa [#allocation4 + $0x1], 1 }

</bundles_post_ra>
